<compile_context>
chip_gen: v6e
topology: v6e:2x2x1
jax: 0.10.0
libtpu: 0.0.40
codegen_flags: <defaults>
</compile_context>

<pallas_src>
import jax
import jax.numpy as jnp
from jax.experimental import pallas as pl
from jax.experimental.pallas import tpu as pltpu


NEG_INF_BIAS = -1e30  # bias for padded classes -> exp(logit - max) == 0


def _mlp_softmax_kernel(x_ref, w1_ref, b1_ref, w2_ref, b2_ref, w3_ref, b3_ref, o_ref):
    # linear1 + ReLU   (dropout == identity in eval mode)
    h1 = jnp.dot(x_ref[...], w1_ref[...], preferred_element_type=jnp.float32)
    h1 = jnp.maximum(h1 + b1_ref[...], 0.0)

    # linear2 + ReLU   (re-cast activations to bf16 so the MXU runs bf16 x bf16)
    h2 = jnp.dot(h1.astype(w2_ref.dtype), w2_ref[...],
                 preferred_element_type=jnp.float32)
    h2 = jnp.maximum(h2 + b2_ref[...], 0.0)

    # linear3 (class dim padded to a multiple of 128; padded bias = -1e30)
    logits = jnp.dot(h2.astype(w3_ref.dtype), w3_ref[...],
                     preferred_element_type=jnp.float32) + b3_ref[...]

    # softmax over the (padded, lane-dense) class dim
    m = jnp.max(logits, axis=1, keepdims=True)
    e = jnp.exp(logits - m)
    denom = jnp.sum(e, axis=1, keepdims=True)
    o_ref[...] = (e * pl.reciprocal(denom, approx=True)).astype(o_ref.dtype)


def nn_forward(x_nchw, params):
    """x_nchw: [B, C, H, W] float32. params: dict of w1,b1,w2,b2,w3,b3."""
    B = x_nchw.shape[0]
    x_flat = x_nchw.reshape(B, -1)  # matches torch x.view(x.size(0), -1) on NCHW
    in_dim = x_flat.shape[1]
    num_classes = params["w3"].shape[1]

    # bf16 activations/weights; f32 accumulation + biases inside the kernel.
    x_bf = x_flat.astype(jnp.bfloat16)
    w1 = params["w1"].astype(jnp.bfloat16)
    b1 = params["b1"].astype(jnp.float32)
    w2 = params["w2"].astype(jnp.bfloat16)
    b2 = params["b2"].astype(jnp.float32)

    # Pad the class dim to a lane-dense multiple of 128: zero weight columns plus
    # a very negative bias make the padded logits contribute ~0 softmax mass.
    nc_pad = max(128, ((num_classes + 127) // 128) * 128)
    w3 = jnp.zeros((params["w3"].shape[0], nc_pad), jnp.bfloat16)
    w3 = w3.at[:, :num_classes].set(params["w3"].astype(jnp.bfloat16))
    b3 = jnp.full((1, nc_pad), NEG_INF_BIAS, jnp.float32)
    b3 = b3.at[:, :num_classes].set(params["b3"].astype(jnp.float32))

    # Batch tile: fill the MXU rows; pad batch up to a whole number of tiles.
    tb = 256 if B >= 256 else 128
    grid_b = pl.cdiv(B, tb)
    b_pad = grid_b * tb
    if b_pad != B:
        x_bf = jnp.pad(x_bf, ((0, b_pad - B), (0, 0)))

    flops = 2 * b_pad * (in_dim * 512 + 512 * 256 + 256 * nc_pad)
    bytes_accessed = (
        x_bf.size * 2 + w1.size * 2 + w2.size * 2 + w3.size * 2
        + (b1.size + b2.size + b3.size) * 4
        + b_pad * nc_pad * 4
    )

    # Weights/biases stay resident in VMEM across all batch tiles.
    resident = lambda shape: pl.BlockSpec(shape, lambda i: (0,) * len(shape))

    out = pl.pallas_call(
        _mlp_softmax_kernel,
        out_shape=jax.ShapeDtypeStruct((b_pad, nc_pad), jnp.float32),
        grid=(grid_b,),
        in_specs=[
            pl.BlockSpec((tb, in_dim), lambda i: (i, 0)),  # x streams over the grid
            resident(w1.shape), resident(b1.shape),
            resident(w2.shape), resident(b2.shape),
            resident(w3.shape), resident(b3.shape),
        ],
        out_specs=pl.BlockSpec((tb, nc_pad), lambda i: (i, 0)),
        compiler_params=pltpu.CompilerParams(
            dimension_semantics=("parallel",)),  # shards batch tiles across v7x's 2 TCs
        cost_estimate=pl.CostEstimate(
            flops=flops,
            transcendentals=b_pad * nc_pad,
            bytes_accessed=bytes_accessed),
    )(x_bf, w1, b1, w2, b2, w3, b3)

    return out[:B, :num_classes]


def init_params(key, in_dim, num_classes):
    """Deterministic init mimicking PyTorch nn.Linear default (U(-1/sqrt(fan_in), +))."""
    dims = [(in_dim, 512), (512, 256), (256, num_classes)]
    params = {}
    for i, (fan_in, fan_out) in enumerate(dims, start=1):
        key, kw, kb = jax.random.split(key, 3)
        bound = 1.0 / jnp.sqrt(float(fan_in))
        params[f"w{i}"] = jax.random.uniform(
            kw, (fan_in, fan_out), jnp.float32, -bound, bound)
        params[f"b{i}"] = jax.random.uniform(
            kb, (1, fan_out), jnp.float32, -bound, bound)
    return params


if __name__ == "__main__":
    # config: image_H = image_W = 16, image_C = 4, num_classes = 10, batch = 2
    B, C, H, W = 2, 4, 16, 16
    num_classes = 10
    in_dim = C * H * W  # 1024

    key = jax.random.PRNGKey(0)
    key, kx = jax.random.split(key)
    x = jax.random.normal(kx, (B, C, H, W), jnp.float32)

    params = init_params(key, in_dim, num_classes)

    probs = nn_forward(x, params)
    jax.block_until_ready(probs)

    assert probs.shape == (B, num_classes)
    # approx reciprocal + bf16 weights -> allow a slightly loose sum-to-1 tolerance
    assert bool(jnp.allclose(jnp.sum(probs, axis=1), 1.0, atol=1e-2))
    assert bool(jnp.all(probs >= 0.0))
    print("KERNEL_OK")
</pallas_src>

<mosaic_0001>
module attributes {stable_mosaic.version = 11 : i64} {
  func.func @_mlp_softmax_kernel(%arg0: i32, %arg1: memref<128x1024xbf16, #tpu.memory_space<vmem>>, %arg2: memref<1024x512xbf16, #tpu.memory_space<vmem>>, %arg3: memref<1x512xf32, #tpu.memory_space<vmem>>, %arg4: memref<512x256xbf16, #tpu.memory_space<vmem>>, %arg5: memref<1x256xf32, #tpu.memory_space<vmem>>, %arg6: memref<256x128xbf16, #tpu.memory_space<vmem>>, %arg7: memref<1x128xf32, #tpu.memory_space<vmem>>, %arg8: memref<128x128xf32, #tpu.memory_space<vmem>>) attributes {dimension_semantics = [#tpu.dimension_semantics<parallel>], iteration_bounds = array<i64: 1>, scalar_prefetch = 0 : i64, scratch_operands = 0 : i64, tpu.core_type = #tpu.core_type<tc>, window_params = [{transform_indices = @transform_0, window_bounds = array<i64: 128, 1024>}, {pipeline_mode = #tpu.pipeline_mode<synchronous>, transform_indices = @transform_1, window_bounds = array<i64: 1024, 512>}, {pipeline_mode = #tpu.pipeline_mode<synchronous>, transform_indices = @transform_2, window_bounds = array<i64: 1, 512>}, {pipeline_mode = #tpu.pipeline_mode<synchronous>, transform_indices = @transform_3, window_bounds = array<i64: 512, 256>}, {pipeline_mode = #tpu.pipeline_mode<synchronous>, transform_indices = @transform_4, window_bounds = array<i64: 1, 256>}, {pipeline_mode = #tpu.pipeline_mode<synchronous>, transform_indices = @transform_5, window_bounds = array<i64: 256, 128>}, {pipeline_mode = #tpu.pipeline_mode<synchronous>, transform_indices = @transform_6, window_bounds = array<i64: 1, 128>}, {transform_indices = @transform_7, window_bounds = array<i64: 128, 128>}]} {
    %c0 = arith.constant 0 : index
    %c0_0 = arith.constant 0 : index
    %0 = vector.load %arg1[%c0, %c0_0] : memref<128x1024xbf16, #tpu.memory_space<vmem>>, vector<128x1024xbf16>
    %c0_1 = arith.constant 0 : index
    %c0_2 = arith.constant 0 : index
    %1 = vector.load %arg2[%c0_1, %c0_2] : memref<1024x512xbf16, #tpu.memory_space<vmem>>, vector<1024x512xbf16>
    %cst = arith.constant dense<0.000000e+00> : vector<128x512xf32>
    %2 = tpu.matmul %0, %1, %cst {dimension_numbers = #tpu.dot_dimension_numbers<[1], [0], [0], [1], [0, 0, 1, 1], [], []>} : vector<128x1024xbf16>, vector<1024x512xbf16>, vector<128x512xf32> -> vector<128x512xf32>
    %c0_3 = arith.constant 0 : index
    %c0_4 = arith.constant 0 : index
    %3 = vector.load %arg3[%c0_3, %c0_4] : memref<1x512xf32, #tpu.memory_space<vmem>>, vector<1x512xf32>
    %4 = vector.broadcast %3 : vector<1x512xf32> to vector<128x512xf32>
    %5 = arith.addf %2, %4 : vector<128x512xf32>
    %cst_5 = arith.constant 0.000000e+00 : f32
    %6 = vector.broadcast %cst_5 : f32 to vector<128x512xf32>
    %7 = arith.maximumf %5, %6 : vector<128x512xf32>
    %8 = arith.truncf %7 : vector<128x512xf32> to vector<128x512xbf16>
    %c0_6 = arith.constant 0 : index
    %c0_7 = arith.constant 0 : index
    %9 = vector.load %arg4[%c0_6, %c0_7] : memref<512x256xbf16, #tpu.memory_space<vmem>>, vector<512x256xbf16>
    %cst_8 = arith.constant dense<0.000000e+00> : vector<128x256xf32>
    %10 = tpu.matmul %8, %9, %cst_8 {dimension_numbers = #tpu.dot_dimension_numbers<[1], [0], [0], [1], [0, 0, 1, 1], [], []>} : vector<128x512xbf16>, vector<512x256xbf16>, vector<128x256xf32> -> vector<128x256xf32>
    %c0_9 = arith.constant 0 : index
    %c0_10 = arith.constant 0 : index
    %11 = vector.load %arg5[%c0_9, %c0_10] : memref<1x256xf32, #tpu.memory_space<vmem>>, vector<1x256xf32>
    %12 = vector.broadcast %11 : vector<1x256xf32> to vector<128x256xf32>
    %13 = arith.addf %10, %12 : vector<128x256xf32>
    %cst_11 = arith.constant 0.000000e+00 : f32
    %14 = vector.broadcast %cst_11 : f32 to vector<128x256xf32>
    %15 = arith.maximumf %13, %14 : vector<128x256xf32>
    %16 = arith.truncf %15 : vector<128x256xf32> to vector<128x256xbf16>
    %c0_12 = arith.constant 0 : index
    %c0_13 = arith.constant 0 : index
    %17 = vector.load %arg6[%c0_12, %c0_13] : memref<256x128xbf16, #tpu.memory_space<vmem>>, vector<256x128xbf16>
    %cst_14 = arith.constant dense<0.000000e+00> : vector<128x128xf32>
    %18 = tpu.matmul %16, %17, %cst_14 {dimension_numbers = #tpu.dot_dimension_numbers<[1], [0], [0], [1], [0, 0, 1, 1], [], []>} : vector<128x256xbf16>, vector<256x128xbf16>, vector<128x128xf32> -> vector<128x128xf32>
    %c0_15 = arith.constant 0 : index
    %c0_16 = arith.constant 0 : index
    %19 = vector.load %arg7[%c0_15, %c0_16] : memref<1x128xf32, #tpu.memory_space<vmem>>, vector<1x128xf32>
    %20 = vector.broadcast %19 : vector<1x128xf32> to vector<128x128xf32>
    %21 = arith.addf %18, %20 : vector<128x128xf32>
    %cst_17 = arith.constant dense<0xFF800000> : vector<128xf32>
    %22 = vector.multi_reduction <maximumf>, %21, %cst_17 [1] : vector<128x128xf32> to vector<128xf32>
    %23 = vector.shape_cast %22 : vector<128xf32> to vector<128x1xf32>
    %24 = vector.broadcast %23 : vector<128x1xf32> to vector<128x128xf32>
    %25 = arith.subf %21, %24 : vector<128x128xf32>
    %26 = math.exp %25 : vector<128x128xf32>
    %cst_18 = arith.constant dense<0.000000e+00> : vector<128xf32>
    %27 = vector.multi_reduction <add>, %26, %cst_18 [1] : vector<128x128xf32> to vector<128xf32>
    %28 = vector.shape_cast %27 : vector<128xf32> to vector<128x1xf32>
    %29 = tpu.reciprocal %28 {approx = true} : vector<128x1xf32> -> vector<128x1xf32>
    %30 = vector.broadcast %29 : vector<128x1xf32> to vector<128x128xf32>
    %31 = arith.mulf %26, %30 : vector<128x128xf32>
    %c0_19 = arith.constant 0 : index
    %c0_20 = arith.constant 0 : index
    %32 = vector.load %arg8[%c0_19, %c0_20] : memref<128x128xf32, #tpu.memory_space<vmem>>, vector<128x128xf32>
    tpu.vector_store %arg8[%c0_19, %c0_20], %31 {strides = array<i32>} : memref<128x128xf32, #tpu.memory_space<vmem>>, vector<128x128xf32>,
    return
  }
  func.func @transform_0(%arg0: i32) -> (i32, i32) {
    %c0_i32 = arith.constant 0 : i32
    %c0_i32_0 = arith.constant 0 : i32
    return %arg0, %c0_i32 : i32, i32
  }
  func.func @transform_1(%arg0: i32) -> (i32, i32) {
    %c0_i32 = arith.constant 0 : i32
    %c0_i32_0 = arith.constant 0 : i32
    %c0_i32_1 = arith.constant 0 : i32
    return %c0_i32, %c0_i32_0 : i32, i32
  }
  func.func @transform_2(%arg0: i32) -> (i32, i32) {
    %c0_i32 = arith.constant 0 : i32
    %c0_i32_0 = arith.constant 0 : i32
    %c0_i32_1 = arith.constant 0 : i32
    return %c0_i32, %c0_i32_0 : i32, i32
  }
  func.func @transform_3(%arg0: i32) -> (i32, i32) {
    %c0_i32 = arith.constant 0 : i32
    %c0_i32_0 = arith.constant 0 : i32
    %c0_i32_1 = arith.constant 0 : i32
    return %c0_i32, %c0_i32_0 : i32, i32
  }
  func.func @transform_4(%arg0: i32) -> (i32, i32) {
    %c0_i32 = arith.constant 0 : i32
    %c0_i32_0 = arith.constant 0 : i32
    %c0_i32_1 = arith.constant 0 : i32
    return %c0_i32, %c0_i32_0 : i32, i32
  }
  func.func @transform_5(%arg0: i32) -> (i32, i32) {
    %c0_i32 = arith.constant 0 : i32
    %c0_i32_0 = arith.constant 0 : i32
    %c0_i32_1 = arith.constant 0 : i32
    return %c0_i32, %c0_i32_0 : i32, i32
  }
  func.func @transform_6(%arg0: i32) -> (i32, i32) {
    %c0_i32 = arith.constant 0 : i32
    %c0_i32_0 = arith.constant 0 : i32
    %c0_i32_1 = arith.constant 0 : i32
    return %c0_i32, %c0_i32_0 : i32, i32
  }
  func.func @transform_7(%arg0: i32) -> (i32, i32) {
    %c0_i32 = arith.constant 0 : i32
    %c0_i32_0 = arith.constant 0 : i32
    return %arg0, %c0_i32 : i32, i32
  }
}

</mosaic_0001>

<bundles_post_ra>
// kernel: tpu_custom_call.1
= control target key start
LH: loop header
LB: loop body
LE: loop exit
PB: predicated region body
PF: predicated region fallthrough
CT: control target
= control target key end

     0   :  { %12 = vsyncpa [#allocation3], 0  ;;  %s6232_s0 = inlined_call_operand.hbm [shape: bf16[128,1024], index: 0, kind: input, shape index: {}]   ;;  %s6233_s1 = inlined_call_operand.hbm [shape: bf16[1024,512], index: 1, kind: input, shape index: {}]   ;;  %s6234_s2 = inlined_call_operand.hbm [shape: f32[1,512], index: 2, kind: input, shape index: {}]   ;;  %s6235_s3 = inlined_call_operand.hbm [shape: bf16[512,256], index: 3, kind: input, shape index: {}]   ;;  %s6236_s4 = inlined_call_operand.vmem [shape: f32[1,256], index: 4, kind: input, shape index: {}]   ;;  %s6237_s5 = inlined_call_operand.hbm [shape: bf16[256,128], index: 5, kind: input, shape index: {}]   ;;  %s6238_s6 = inlined_call_operand.vmem [shape: f32[1,128], index: 6, kind: input, shape index: {}]   ;;  %s6239_s7 = inlined_call_operand.hbm [shape: f32[128,128], index: 7, kind: output, shape index: {}]  }
   0x1   :  { %13 = vsyncpa [#allocation6], 0 }
   0x2   :  { %14 = vsyncpa [#allocation9], 0 }
   0x3   :  { %15 = vsyncpa [#allocation4], 0  ;;  %s5300_s24 = smov [#allocation5]  }
   0x4   :  { %s33_s25 = sshll.u32 %s5300_s24, 4  ;;  %s34_s25 = int_to_ptr.vmem [resolvable:$true] %s33_s25 }
   0x5   :  { %s5180_s26 = scalar_lea.vmem %s34_s25, 32768  ;;  %p5185_p1 = scmp.lt.s32.totalorder %s34_s25, %s34_s25 }
   0x6   :  { %p5181_p0 = scmp.ne.s32.totalorder %s34_s25, %s5180_s26  ;;  %p5186_p2 = scmp.lt.s32.totalorder %s5180_s26, %s5180_s26 }
   0x8   :  { %p5187_p3 = por %p5186_p2, %p5185_p1 }
   0xa   :  { %p5188_p4 = pnand %p5187_p3, %p5181_p0 }
   0xc   :  { %5191 = shalt.err (!%p5188_p4)
}
   0xd   :  { %s5301_s27 = smov 256   ;;  %s5302_s28 = smov 16  }
   0xe   :  { %39 = dma.hbm_to_vmem [thread:$0]  %s6233_s1, 32768, %s34_s25, [#allocation6], %s5301_s27, %s5301_s27, %s5302_s28  }
   0xf   :  { %s5303_s8 = smov [#allocation8]  }
  0x10   :  { %s55_s9 = sshll.u32 %s5303_s8, 4  ;;  %s56_s9 = int_to_ptr.vmem [resolvable:$true] %s55_s9 }
  0x11   :  { %s5200_s10 = scalar_lea.vmem %s56_s9, 8192  ;;  %p5205_p6 = scmp.lt.s32.totalorder %s56_s9, %s56_s9 }
  0x12   :  { %p5201_p5 = scmp.ne.s32.totalorder %s56_s9, %s5200_s10  ;;  %p5206_p7 = scmp.lt.s32.totalorder %s5200_s10, %s5200_s10 }
  0x14   :  { %p5207_p8 = por %p5206_p7, %p5205_p6 }
  0x16   :  { %p5208_p9 = pnand %p5207_p8, %p5201_p5 }
  0x18   :  { %5211 = shalt.err (!%p5208_p9)
}
  0x19   :  { %s5304_s11 = smov 128   ;;  %s5305_s12 = smov 8  }
  0x1a   :  { %61 = dma.hbm_to_vmem [thread:$0]  %s6235_s3, 8192, %s56_s9, [#allocation9], %s5304_s11, %s5304_s11, %s5305_s12  }
  0x1b   :  { %s5306_s1 = smov [#allocation2]  }
  0x1c   :  { %s21_s15 = sshll.u32 %s5306_s1, 4  ;;  %s22_s15 = int_to_ptr.vmem [resolvable:$true] %s21_s15 }
  0x1d   :  { %s5220_s16 = scalar_lea.vmem %s22_s15, 8192  ;;  %p5225_p11 = scmp.lt.s32.totalorder %s22_s15, %s22_s15 }
  0x1e   :  { %p5221_p10 = scmp.ne.s32.totalorder %s22_s15, %s5220_s16  ;;  %p5226_p12 = scmp.lt.s32.totalorder %s5220_s16, %s5220_s16 }
  0x20   :  { %p5227_p13 = por %p5226_p12, %p5225_p11 }
  0x22   :  { %p5228_p0 = pnand %p5227_p13, %p5221_p10 }
  0x24   :  { %5231 = shalt.err (!%p5228_p0)
}
  0x25   :  { %s5307_s17 = smov 512   ;;  %s5308_s18 = smov 32  }
  0x26   :  { %27 = dma.hbm_to_vmem [thread:$0]  %s6232_s0, 8192, %s22_s15, [#allocation3], %s5307_s17, %s5307_s17, %s5308_s18  }
  0x27   :  { %s5309_s21 = smov [#allocation7]   ;;  %s5310_s3 = smov [#allocation10]  }
  0x28   :  { %s46_s22 = sshll.u32 %s5309_s21, 4  ;;  %s69_s23 = sshll.u32 %s5310_s3, 4  ;;  %s47_s22 = int_to_ptr.vmem [resolvable:$true] %s46_s22  ;;  %s70_s23 = int_to_ptr.vmem [resolvable:$true] %s69_s23 }
  0x29   :  { %s5240_s24 = scalar_lea.vmem %s47_s22, 64  ;;  %p5245_p2 = scmp.lt.s32.totalorder %s47_s22, %s47_s22 }
  0x2a   :  { %p5241_p1 = scmp.ne.s32.totalorder %s47_s22, %s5240_s24  ;;  %p5246_p3 = scmp.lt.s32.totalorder %s5240_s24, %s5240_s24 }
  0x2c   :  { %p5247_p4 = por %p5246_p3, %p5245_p2 }
  0x2e   :  { %p5248_p5 = pnand %p5247_p4, %p5241_p1 }
  0x30   :  { %5251 = shalt.err (!%p5248_p5)
}
  0x31   :  { %49 = dma.hbm_to_vmem [thread:$0]  %s6234_s2, 64, %s47_s22, [#allocation6]  }
  0x32   :  { %s5260_s27 = scalar_lea.vmem %s70_s23, 2048  ;;  %p5265_p7 = scmp.lt.s32.totalorder %s70_s23, %s70_s23 }
  0x33   :  { %p5261_p6 = scmp.ne.s32.totalorder %s70_s23, %s5260_s27  ;;  %p5266_p8 = scmp.lt.s32.totalorder %s5260_s27, %s5260_s27 }
  0x35   :  { %p5267_p9 = por %p5266_p8, %p5265_p7 }
  0x37   :  { %p5268_p10 = pnand %p5267_p9, %p5261_p6 }
  0x39   :  { %5271 = shalt.err (!%p5268_p10)
}
  0x3a   :  { %s5311_s0 = smov 64   ;;  %s5312_s28 = smov 4  }
  0x3b   :  { %75 = dma.hbm_to_vmem [thread:$0]  %s6237_s5, 2048, %s70_s23, [#allocation9], %s5311_s0, %s5311_s0, %s5312_s28  }
  0x3c   :  { %5292 = dma.done.wait [#allocation3], 8192  }
  0x3d   :  { %5293 = vsyncadd [#allocation3], 4294959104 }
  0x3e   :  { %5294 = dma.done.wait [#allocation6], 32832  }
  0x3f   :  { %5295 = vsyncadd [#allocation6], 4294934464 }
  0x40   :  { %5296 = dma.done.wait [#allocation9], 10240  }
  0x41   :  { %5297 = vsyncadd [#allocation9], 4294957056  ;;  %v4612_v0 = vld [vmem:[#allocation5 + $0xe4] ss:$16 sps:$4 sm:$0xff]   ;;  %v4616_v2 = vld [vmem:[#allocation5 + $0xe0] ss:$16 sps:$4 sm:$0xff]  }
  0x42   :  { %v4614_v1 = vld [vmem:[#allocation5 + $0x2e4] ss:$16 sps:$4 sm:$0xff]   ;;  %2036 = vmatprep.subr.bf16.mxu0 %v4612_v0  ;;  %v4617_v3 = vld [vmem:[#allocation5 + $0x2e0] ss:$16 sps:$4 sm:$0xff]   ;;  %v95_v50 = vld [vmem:[#allocation2 + $0x8] sm:$0xff] }
  0x43   :  { %2149 = vmatprep.subr.bf16.mxu1 %v4614_v1  ;;  %v4618_v4 = vld [vmem:[#allocation5 + $0xc4] ss:$16 sps:$4 sm:$0xff]   ;;  %2037 = vmatpush1.bf16.msra.mxu0 %v4616_v2  ;;  %v4622_v6 = vld [vmem:[#allocation5 + $0xc0] ss:$16 sps:$4 sm:$0xff]   ;;  %v99_v51 = vld [vmem:[#allocation2 + $0x28] sm:$0xff] }
  0x44   :  { %2150 = vmatpush1.bf16.msra.mxu1 %v4617_v3  ;;  %v4620_v5 = vld [vmem:[#allocation5 + $0x2c4] ss:$16 sps:$4 sm:$0xff]   ;;  %2038 = vmatprep.subr.bf16.mxu0 %v4618_v4  ;;  %v4623_v7 = vld [vmem:[#allocation5 + $0x2c0] ss:$16 sps:$4 sm:$0xff]   ;;  %v5374_v55 = vcombine.high %v95_v50, %v99_v51 }
  0x45   :  { %2151 = vmatprep.subr.bf16.mxu1 %v4620_v5  ;;  %v4624_v8 = vld [vmem:[#allocation5 + $0xa4] ss:$16 sps:$4 sm:$0xff]   ;;  %v4628_v10 = vld [vmem:[#allocation5 + $0xa0] ss:$16 sps:$4 sm:$0xff]  }
  0x46   :  { %v4626_v9 = vld [vmem:[#allocation5 + $0x2a4] ss:$16 sps:$4 sm:$0xff]   ;;  %v4629_v11 = vld [vmem:[#allocation5 + $0x2a0] ss:$16 sps:$4 sm:$0xff]   ;;  %2181 = vmatprep.mubr.bf16.mxu1 %v5374_v55 }
  0x47   :  { %2039 = vmatpush1.bf16.msra.mxu0 %v4622_v6  ;;  %v4630_v12 = vld [vmem:[#allocation5 + $0x84] ss:$16 sps:$4 sm:$0xff]   ;;  %v4634_v14 = vld [vmem:[#allocation5 + $0x80] ss:$16 sps:$4 sm:$0xff]  }
  0x48   :  { %2152 = vmatpush1.bf16.msra.mxu1 %v4623_v7  ;;  %2040 = vmatprep.subr.bf16.mxu0 %v4624_v8  ;;  %v4632_v13 = vld [vmem:[#allocation5 + $0x284] ss:$16 sps:$4 sm:$0xff]   ;;  %v4635_v15 = vld [vmem:[#allocation5 + $0x280] ss:$16 sps:$4 sm:$0xff]  }
  0x49   :  { %2153 = vmatprep.subr.bf16.mxu1 %v4626_v9  ;;  %v4636_v16 = vld [vmem:[#allocation5 + $0x64] ss:$16 sps:$4 sm:$0xff]   ;;  %v4640_v18 = vld [vmem:[#allocation5 + $0x60] ss:$16 sps:$4 sm:$0xff]  }
  0x4a   :  { %v4638_v17 = vld [vmem:[#allocation5 + $0x264] ss:$16 sps:$4 sm:$0xff]   ;;  %v4641_v19 = vld [vmem:[#allocation5 + $0x260] ss:$16 sps:$4 sm:$0xff]  }
  0x4b   :  { %2041 = vmatpush1.bf16.msra.mxu0 %v4628_v10  ;;  %v4642_v20 = vld [vmem:[#allocation5 + $0x44] ss:$16 sps:$4 sm:$0xff]   ;;  %v4646_v22 = vld [vmem:[#allocation5 + $0x40] ss:$16 sps:$4 sm:$0xff]  }
  0x4c   :  { %2154 = vmatpush1.bf16.msra.mxu1 %v4629_v11  ;;  %2042 = vmatprep.subr.bf16.mxu0 %v4630_v12  ;;  %v4644_v21 = vld [vmem:[#allocation5 + $0x244] ss:$16 sps:$4 sm:$0xff]   ;;  %v4647_v23 = vld [vmem:[#allocation5 + $0x240] ss:$16 sps:$4 sm:$0xff]   ;;  %v5380_v12 = vcombine.low %v95_v50, %v99_v51 }
  0x4d   :  { %2155 = vmatprep.subr.bf16.mxu1 %v4632_v13  ;;  %v4648_v24 = vld [vmem:[#allocation5 + $0x24] ss:$16 sps:$4 sm:$0xff]   ;;  %v4652_v26 = vld [vmem:[#allocation5 + $0x20] ss:$16 sps:$4 sm:$0xff]  }
  0x4e   :  { %v4650_v25 = vld [vmem:[#allocation5 + $0x224] ss:$16 sps:$4 sm:$0xff]   ;;  %v4653_v27 = vld [vmem:[#allocation5 + $0x220] ss:$16 sps:$4 sm:$0xff]  }
  0x4f   :  { %2043 = vmatpush1.bf16.msra.mxu0 %v4634_v14  ;;  %v4654_v28 = vld [vmem:[#allocation5 + $0x4] ss:$16 sps:$4 sm:$0xff]   ;;  %v4658_v30 = vld [vmem:[#allocation5] ss:$16 sps:$4 sm:$0xff]   ;;  %v103_v14 = vld [vmem:[#allocation2 + $0x48] sm:$0xff] }
  0x50   :  { %2156 = vmatpush1.bf16.msra.mxu1 %v4635_v15  ;;  %2044 = vmatprep.subr.bf16.mxu0 %v4636_v16  ;;  %v4656_v29 = vld [vmem:[#allocation5 + $0x204] ss:$16 sps:$4 sm:$0xff]   ;;  %v4659_v31 = vld [vmem:[#allocation5 + $0x200] ss:$16 sps:$4 sm:$0xff]   ;;  %v107_v15 = vld [vmem:[#allocation2 + $0x68] sm:$0xff] }
  0x51   :  { %2157 = vmatprep.subr.bf16.mxu1 %v4638_v17  ;;  %v4660_v32 = vld [vmem:[#allocation5 + $0x1e4] ss:$16 sps:$4 sm:$0xff]   ;;  %v4664_v34 = vld [vmem:[#allocation5 + $0x1e0] ss:$16 sps:$4 sm:$0xff]  }
  0x52   :  { %v4662_v33 = vld [vmem:[#allocation5 + $0x3e4] ss:$16 sps:$4 sm:$0xff]   ;;  %v4665_v35 = vld [vmem:[#allocation5 + $0x3e0] ss:$16 sps:$4 sm:$0xff]  }
  0x53   :  { %2045 = vmatpush1.bf16.msra.mxu0 %v4640_v18  ;;  %v4666_v36 = vld [vmem:[#allocation5 + $0x1c4] ss:$16 sps:$4 sm:$0xff]   ;;  %v4670_v38 = vld [vmem:[#allocation5 + $0x1c0] ss:$16 sps:$4 sm:$0xff]  }
  0x54   :  { %2158 = vmatpush1.bf16.msra.mxu1 %v4641_v19  ;;  %2046 = vmatprep.subr.bf16.mxu0 %v4642_v20  ;;  %v4668_v37 = vld [vmem:[#allocation5 + $0x3c4] ss:$16 sps:$4 sm:$0xff]   ;;  %v4671_v39 = vld [vmem:[#allocation5 + $0x3c0] ss:$16 sps:$4 sm:$0xff]   ;;  %v5384_v19 = vcombine.high %v103_v14, %v107_v15 }
  0x55   :  { %2159 = vmatprep.subr.bf16.mxu1 %v4644_v21  ;;  %v4672_v40 = vld [vmem:[#allocation5 + $0x1a4] ss:$16 sps:$4 sm:$0xff]   ;;  %v4676_v42 = vld [vmem:[#allocation5 + $0x1a0] ss:$16 sps:$4 sm:$0xff]  }
  0x56   :  { %v4674_v41 = vld [vmem:[#allocation5 + $0x3a4] ss:$16 sps:$4 sm:$0xff]   ;;  %v4677_v43 = vld [vmem:[#allocation5 + $0x3a0] ss:$16 sps:$4 sm:$0xff]  }
  0x57   :  { %2047 = vmatpush1.bf16.msra.mxu0 %v4646_v22  ;;  %v4678_v44 = vld [vmem:[#allocation5 + $0x184] ss:$16 sps:$4 sm:$0xff]   ;;  %v4682_v46 = vld [vmem:[#allocation5 + $0x180] ss:$16 sps:$4 sm:$0xff]  }
  0x58   :  { %2160 = vmatpush1.bf16.msra.mxu1 %v4647_v23  ;;  %2048 = vmatprep.subr.bf16.mxu0 %v4648_v24  ;;  %v4680_v45 = vld [vmem:[#allocation5 + $0x384] ss:$16 sps:$4 sm:$0xff]   ;;  %v4683_v47 = vld [vmem:[#allocation5 + $0x380] ss:$16 sps:$4 sm:$0xff]  }
  0x59   :  { %2161 = vmatprep.subr.bf16.mxu1 %v4650_v25  ;;  %v94_v48 = vld [vmem:[#allocation2] sm:$0xff] }
  0x5a   :  { %v98_v49 = vld [vmem:[#allocation2 + $0x20] sm:$0xff] }
  0x5b   :  { %2049 = vmatpush1.bf16.msra.mxu0 %v4652_v26  ;;  %v4684_v52 = vld [vmem:[#allocation5 + $0x164] ss:$16 sps:$4 sm:$0xff]   ;;  %v5372_v53 = vcombine.high %v94_v48, %v98_v49  ;;  %v4688_v56 = vld [vmem:[#allocation5 + $0x160] ss:$16 sps:$4 sm:$0xff]   ;;  %v5378_v11 = vcombine.low %v94_v48, %v98_v49 }
  0x5c   :  { %2162 = vmatpush1.bf16.msra.mxu1 %v4653_v27  ;;  %2050 = vmatprep.subr.bf16.mxu0 %v4654_v28  ;;  %v4686_v54 = vld [vmem:[#allocation5 + $0x364] ss:$16 sps:$4 sm:$0xff]   ;;  %v4689_v57 = vld [vmem:[#allocation5 + $0x360] ss:$16 sps:$4 sm:$0xff]  }
  0x5d   :  { %2163 = vmatprep.subr.bf16.mxu1 %v4656_v29  ;;  %2068 = vmatprep.mubr.bf16.mxu0 %v5372_v53  ;;  %v4690_v58 = vld [vmem:[#allocation5 + $0x144] ss:$16 sps:$4 sm:$0xff]   ;;  %v4694_v60 = vld [vmem:[#allocation5 + $0x140] ss:$16 sps:$4 sm:$0xff]   ;;  %v5392_v29 = vcombine.low %v103_v14, %v107_v15 }
  0x5e   :  { %v4692_v59 = vld [vmem:[#allocation5 + $0x344] ss:$16 sps:$4 sm:$0xff]   ;;  %v4695_v61 = vld [vmem:[#allocation5 + $0x340] ss:$16 sps:$4 sm:$0xff]  }
  0x5f   :  { %2051 = vmatpush1.bf16.msra.mxu0 %v4658_v30  ;;  %v4696_v62 = vld [vmem:[#allocation5 + $0x124] ss:$16 sps:$4 sm:$0xff]   ;;  %v4700_v0 = vld [vmem:[#allocation5 + $0x120] ss:$16 sps:$4 sm:$0xff]   ;;  %v111_v30 = vld [vmem:[#allocation2 + $0x88] sm:$0xff] }
  0x60   :  { %2164 = vmatpush1.bf16.msra.mxu1 %v4659_v31  ;;  %2052 = vmatprep.subr.bf16.mxu0 %v4660_v32  ;;  %v4698_v63 = vld [vmem:[#allocation5 + $0x324] ss:$16 sps:$4 sm:$0xff]   ;;  %v4701_v1 = vld [vmem:[#allocation5 + $0x320] ss:$16 sps:$4 sm:$0xff]   ;;  %v115_v31 = vld [vmem:[#allocation2 + $0xa8] sm:$0xff] }
  0x61   :  { %2165 = vmatprep.subr.bf16.mxu1 %v4662_v33  ;;  %v4702_v2 = vld [vmem:[#allocation5 + $0x104] ss:$16 sps:$4 sm:$0xff]   ;;  %v4706_v4 = vld [vmem:[#allocation5 + $0x100] ss:$16 sps:$4 sm:$0xff]  }
  0x62   :  { %v4704_v3 = vld [vmem:[#allocation5 + $0x304] ss:$16 sps:$4 sm:$0xff]   ;;  %v4707_v5 = vld [vmem:[#allocation5 + $0x300] ss:$16 sps:$4 sm:$0xff]  }
  0x63   :  { %2053 = vmatpush2.bf16.msra.mxu0 %v4664_v34  ;;  %v4710_v6 = vld [vmem:[#allocation5 + $0x4e4] ss:$16 sps:$4 sm:$0xff]   ;;  %v4708_v8 = vld [vmem:[#allocation5 + $0x4e0] ss:$16 sps:$4 sm:$0xff]  }
  0x64   :  { %2166 = vmatpush2.bf16.msra.mxu1 %v4665_v35  ;;  %2054 = vmatprep.subr.bf16.mxu0 %v4666_v36  ;;  %v4713_v7 = vld [vmem:[#allocation5 + $0x6e4] ss:$16 sps:$4 sm:$0xff]   ;;  %v4711_v9 = vld [vmem:[#allocation5 + $0x6e0] ss:$16 sps:$4 sm:$0xff]   ;;  %v5396_v35 = vcombine.high %v111_v30, %v115_v31 }
  0x65   :  { %2167 = vmatprep.subr.bf16.mxu1 %v4668_v37  ;;  %v102_v10 = vld [vmem:[#allocation2 + $0x40] sm:$0xff] }
  0x66   :  { %v106_v13 = vld [vmem:[#allocation2 + $0x60] sm:$0xff] }
  0x67   :  { %2055 = vmatpush2.bf16.msra.mxu0 %v4670_v38  ;;  %v4716_v16 = vld [vmem:[#allocation5 + $0x4c4] ss:$16 sps:$4 sm:$0xff]   ;;  %v5382_v18 = vcombine.high %v102_v10, %v106_v13  ;;  %v4714_v20 = vld [vmem:[#allocation5 + $0x4c0] ss:$16 sps:$4 sm:$0xff]   ;;  %v5390_v28 = vcombine.low %v102_v10, %v106_v13 }
  0x68   :  { %2168 = vmatpush2.bf16.msra.mxu1 %v4671_v39  ;;  %2056 = vmatprep.subr.bf16.mxu0 %v4672_v40  ;;  %v4719_v17 = vld [vmem:[#allocation5 + $0x6c4] ss:$16 sps:$4 sm:$0xff]   ;;  %v4717_v21 = vld [vmem:[#allocation5 + $0x6c0] ss:$16 sps:$4 sm:$0xff]  }
  0x69   :  { %2169 = vmatprep.subr.bf16.mxu1 %v4674_v41  ;;  %v4722_v22 = vld [vmem:[#allocation5 + $0x4a4] ss:$16 sps:$4 sm:$0xff]   ;;  %v4720_v24 = vld [vmem:[#allocation5 + $0x4a0] ss:$16 sps:$4 sm:$0xff]  }
  0x6a   :  { %v4725_v23 = vld [vmem:[#allocation5 + $0x6a4] ss:$16 sps:$4 sm:$0xff]   ;;  %v4723_v25 = vld [vmem:[#allocation5 + $0x6a0] ss:$16 sps:$4 sm:$0xff]  }
  0x6b   :  { %2057 = vmatpush2.bf16.msra.mxu0 %v4676_v42  ;;  %v110_v26 = vld [vmem:[#allocation2 + $0x80] sm:$0xff] }
  0x6c   :  { %2170 = vmatpush2.bf16.msra.mxu1 %v4677_v43  ;;  %2058 = vmatprep.subr.bf16.mxu0 %v4678_v44  ;;  %v114_v27 = vld [vmem:[#allocation2 + $0xa0] sm:$0xff] }
  0x6d   :  { %2171 = vmatprep.subr.bf16.mxu1 %v4680_v45  ;;  %v4728_v32 = vld [vmem:[#allocation5 + $0x484] ss:$16 sps:$4 sm:$0xff]   ;;  %v5394_v34 = vcombine.high %v110_v26, %v114_v27  ;;  %v4726_v36 = vld [vmem:[#allocation5 + $0x480] ss:$16 sps:$4 sm:$0xff]   ;;  %v5402_v44 = vcombine.low %v110_v26, %v114_v27  ;;  %v5404_v45 = vcombine.low %v111_v30, %v115_v31 }
  0x6e   :  { %v4731_v33 = vld [vmem:[#allocation5 + $0x684] ss:$16 sps:$4 sm:$0xff]   ;;  %v4729_v37 = vld [vmem:[#allocation5 + $0x680] ss:$16 sps:$4 sm:$0xff]  }
  0x6f   :  { %2059 = vmatpush2.bf16.msra.mxu0 %v4682_v46  ;;  %v4734_v38 = vld [vmem:[#allocation5 + $0x464] ss:$16 sps:$4 sm:$0xff]   ;;  %v4732_v40 = vld [vmem:[#allocation5 + $0x460] ss:$16 sps:$4 sm:$0xff]   ;;  %v119_v46 = vld [vmem:[#allocation2 + $0xc8] sm:$0xff] }
  0x70   :  { %2172 = vmatpush2.bf16.msra.mxu1 %v4683_v47  ;;  %2060 = vmatprep.subr.bf16.mxu0 %v4684_v52  ;;  %v4737_v39 = vld [vmem:[#allocation5 + $0x664] ss:$16 sps:$4 sm:$0xff]   ;;  %v4735_v41 = vld [vmem:[#allocation5 + $0x660] ss:$16 sps:$4 sm:$0xff]   ;;  %v123_v47 = vld [vmem:[#allocation2 + $0xe8] sm:$0xff] }
  0x71   :  { %2173 = vmatprep.subr.bf16.mxu1 %v4686_v54  ;;  %v118_v42 = vld [vmem:[#allocation2 + $0xc0] sm:$0xff]  ;;  %v5408_v51 = vcombine.high %v119_v46, %v123_v47 }
  0x72   :  { %v122_v43 = vld [vmem:[#allocation2 + $0xe0] sm:$0xff] }
  0x73   :  { %2061 = vmatpush2.bf16.msra.mxu0 %v4688_v56  ;;  %v4740_v48 = vld [vmem:[#allocation5 + $0x444] ss:$16 sps:$4 sm:$0xff]   ;;  %v5406_v50 = vcombine.high %v118_v42, %v122_v43  ;;  %v4738_v52 = vld [vmem:[#allocation5 + $0x440] ss:$16 sps:$4 sm:$0xff]  }
  0x74   :  { %2174 = vmatpush2.bf16.msra.mxu1 %v4689_v57  ;;  %2062 = vmatprep.subr.bf16.mxu0 %v4690_v58  ;;  %v4743_v49 = vld [vmem:[#allocation5 + $0x644] ss:$16 sps:$4 sm:$0xff]   ;;  %v4741_v54 = vld [vmem:[#allocation5 + $0x640] ss:$16 sps:$4 sm:$0xff]  }
  0x75   :  { %2175 = vmatprep.subr.bf16.mxu1 %v4692_v59  ;;  %v4746_v56 = vld [vmem:[#allocation5 + $0x424] ss:$16 sps:$4 sm:$0xff]   ;;  %v4744_v58 = vld [vmem:[#allocation5 + $0x420] ss:$16 sps:$4 sm:$0xff]  }
  0x76   :  { %v4749_v57 = vld [vmem:[#allocation5 + $0x624] ss:$16 sps:$4 sm:$0xff]   ;;  %v4762_v26 = vld [vmem:[#allocation5 + $0x5c0] ss:$16 sps:$4 sm:$0xff]  }
  0x77   :  { %2063 = vmatpush2.bf16.msra.mxu0 %v4694_v60  ;;  %v126_v59 = vld [vmem:[#allocation2 + $0x100] sm:$0xff] }
  0x78   :  { %2176 = vmatpush2.bf16.msra.mxu1 %v4695_v61  ;;  %2064 = vmatprep.subr.bf16.mxu0 %v4696_v62  ;;  %v130_v60 = vld [vmem:[#allocation2 + $0x120] sm:$0xff]  ;;  %v5414_v61 = vcombine.low %v118_v42, %v122_v43  ;;  %v5416_v62 = vcombine.low %v119_v46, %v123_v47 }
  0x79   :  { %2177 = vmatprep.subr.bf16.mxu1 %v4698_v63  ;;  %v127_v63 = vld [vmem:[#allocation2 + $0x108] sm:$0xff]  ;;  %v134_v10 = vld [vmem:[#allocation2 + $0x140] sm:$0xff]  ;;  %v5426_v14 = vcombine.low %v126_v59, %v130_v60 }
  0x7a   :  { %v138_v13 = vld [vmem:[#allocation2 + $0x160] sm:$0xff] }
  0x7b   :  { %2065 = vmatpush2.bf16.msra.mxu0 %v4700_v0  ;;  %v131_v0 = vld [vmem:[#allocation2 + $0x128] sm:$0xff]  ;;  %v4765_v27 = vld [vmem:[#allocation5 + $0x7c0] ss:$16 sps:$4 sm:$0xff]   ;;  %v4770_v30 = vld [vmem:[#allocation5 + $0x5a4] ss:$16 sps:$4 sm:$0xff]  }
  0x7c   :  { %2178 = vmatpush2.bf16.msra.mxu1 %v4701_v1  ;;  %2066 = vmatprep.subr.bf16.mxu0 %v4702_v2  ;;  %v4747_v1 = vld [vmem:[#allocation5 + $0x620] ss:$16 sps:$4 sm:$0xff]   ;;  %v4752_v2 = vld [vmem:[#allocation5 + $0x404] ss:$16 sps:$4 sm:$0xff]   ;;  %v5428_v15 = vcombine.low %v127_v63, %v131_v0 }
  0x7d   :  { %2179 = vmatprep.subr.bf16.mxu1 %v4704_v3  ;;  %v4755_v3 = vld [vmem:[#allocation5 + $0x604] ss:$16 sps:$4 sm:$0xff]  }
  0x7e   :  { %v4773_v31 = vld [vmem:[#allocation5 + $0x7a4] ss:$16 sps:$4 sm:$0xff]  }
  0x7f   :  { %2067 = vmatpush2.bf16.msra.mxu0 %v4706_v4  ;;  %v5418_v4 = vcombine.high %v126_v59, %v130_v60  ;;  %v4776_v42 = vld [vmem:[#allocation5 + $0x584] ss:$16 sps:$4 sm:$0xff]  }
  0x80   :  { %2180 = vmatpush2.bf16.msra.mxu1 %v4707_v5  ;;  %2262 = vmatprep.subr.bf16.mxu0 %v4710_v6  ;;  %v5420_v5 = vcombine.high %v127_v63, %v131_v0  ;;  %v4750_v6 = vld [vmem:[#allocation5 + $0x400] ss:$16 sps:$4 sm:$0xff]   ;;  %v4779_v43 = vld [vmem:[#allocation5 + $0x784] ss:$16 sps:$4 sm:$0xff]   ;;  %v151_v0 = vld [vmem:[#allocation2 + $0x1c8] sm:$0xff] }
  0x81   :  { %2375 = vmatprep.subr.bf16.mxu1 %v4713_v7  ;;  %v4753_v7 = vld [vmem:[#allocation5 + $0x600] ss:$16 sps:$4 sm:$0xff]  }
  0x82   :  { %2069 = vmatmul.mubr.bf16.vlgmr.msra.gmra.mxu0 %v5378_v11  ;;  %v154_v59 = vld [vmem:[#allocation2 + $0x1e0] sm:$0xff] }
  0x83   :  { %2182 = vmatmul.mubr.bf16.vlgmr.msra.gmra.mxu1 %v5380_v12  ;;  %2263 = vmatpush1.bf16.msra.mxu0 %v4708_v8  ;;  %v4758_v8 = vld [vmem:[#allocation5 + $0x5e4] ss:$16 sps:$4 sm:$0xff]  }
  0x84   :  { %2376 = vmatpush1.bf16.msra.mxu1 %v4711_v9  ;;  %2264 = vmatprep.subr.bf16.mxu0 %v4716_v16  ;;  %v4761_v9 = vld [vmem:[#allocation5 + $0x7e4] ss:$16 sps:$4 sm:$0xff]   ;;  %v135_v16 = vld [vmem:[#allocation2 + $0x148] sm:$0xff] }
  0x85   :  { %2377 = vmatprep.subr.bf16.mxu1 %v4719_v17  ;;  %2078 = vmatprep.mubr.bf16.mxu0 %v5382_v18  ;;  %v139_v17 = vld [vmem:[#allocation2 + $0x168] sm:$0xff] }
  0x86   :  { %2191 = vmatprep.mubr.bf16.mxu1 %v5384_v19 }
  0x87   :  { %2265 = vmatpush1.bf16.msra.mxu0 %v4714_v20  ;;  %v4756_v20 = vld [vmem:[#allocation5 + $0x5e0] ss:$16 sps:$4 sm:$0xff]  }
  0x88   :  { %2378 = vmatpush1.bf16.msra.mxu1 %v4717_v21  ;;  %2266 = vmatprep.subr.bf16.mxu0 %v4722_v22  ;;  %v4759_v21 = vld [vmem:[#allocation5 + $0x7e0] ss:$16 sps:$4 sm:$0xff]   ;;  %v4764_v22 = vld [vmem:[#allocation5 + $0x5c4] ss:$16 sps:$4 sm:$0xff]  }
  0x89   :  { %2379 = vmatprep.subr.bf16.mxu1 %v4725_v23  ;;  %v4767_v23 = vld [vmem:[#allocation5 + $0x7c4] ss:$16 sps:$4 sm:$0xff]  }
  0x8a   :  { %2079 = vmatmul.mubr.bf16.gmra.mxu0 %v5390_v28 }
  0x8b   :  { %2192 = vmatmul.mubr.bf16.gmra.mxu1 %v5392_v29  ;;  %2267 = vmatpush1.bf16.msra.mxu0 %v4720_v24  ;;  %v5430_v24 = vcombine.high %v134_v10, %v138_v13 }
  0x8c   :  { %2380 = vmatpush1.bf16.msra.mxu1 %v4723_v25  ;;  %2268 = vmatprep.subr.bf16.mxu0 %v4728_v32  ;;  %v5432_v25 = vcombine.high %v135_v16, %v139_v17  ;;  %v4768_v32 = vld [vmem:[#allocation5 + $0x5a0] ss:$16 sps:$4 sm:$0xff]  }
  0x8d   :  { %2381 = vmatprep.subr.bf16.mxu1 %v4731_v33  ;;  %2088 = vmatprep.mubr.bf16.mxu0 %v5394_v34  ;;  %v4771_v33 = vld [vmem:[#allocation5 + $0x7a0] ss:$16 sps:$4 sm:$0xff]  }
  0x8e   :  { %2201 = vmatprep.mubr.bf16.mxu1 %v5396_v35 }
  0x8f   :  { %2269 = vmatpush1.bf16.msra.mxu0 %v4726_v36  ;;  %v142_v36 = vld [vmem:[#allocation2 + $0x180] sm:$0xff] }
  0x90   :  { %2382 = vmatpush1.bf16.msra.mxu1 %v4729_v37  ;;  %2270 = vmatprep.subr.bf16.mxu0 %v4734_v38  ;;  %v5438_v37 = vcombine.low %v134_v10, %v138_v13  ;;  %v5440_v38 = vcombine.low %v135_v16, %v139_v17  ;;  %v4794_v10 = vld [vmem:[#allocation5 + $0x524] ss:$16 sps:$4 sm:$0xff]   ;;  %v4792_v16 = vld [vmem:[#allocation5 + $0x520] ss:$16 sps:$4 sm:$0xff]  }
  0x91   :  { %2383 = vmatprep.subr.bf16.mxu1 %v4737_v39  ;;  %v146_v39 = vld [vmem:[#allocation2 + $0x1a0] sm:$0xff] }
  0x92   :  { %2089 = vmatmul.mubr.bf16.gmra.mxu0 %v5402_v44  ;;  %v5442_v46 = vcombine.high %v142_v36, %v146_v39  ;;  %v5450_v60 = vcombine.low %v142_v36, %v146_v39  ;;  %v4797_v13 = vld [vmem:[#allocation5 + $0x724] ss:$16 sps:$4 sm:$0xff]   ;;  %v4795_v17 = vld [vmem:[#allocation5 + $0x720] ss:$16 sps:$4 sm:$0xff]  }
  0x93   :  { %2202 = vmatmul.mubr.bf16.gmra.mxu1 %v5404_v45  ;;  %2271 = vmatpush1.bf16.msra.mxu0 %v4732_v40  ;;  %v143_v40 = vld [vmem:[#allocation2 + $0x188] sm:$0xff]  ;;  %v4798_v36 = vld [vmem:[#allocation5 + $0x500] ss:$16 sps:$4 sm:$0xff]  }
  0x94   :  { %2384 = vmatpush1.bf16.msra.mxu1 %v4735_v41  ;;  %2272 = vmatprep.subr.bf16.mxu0 %v4740_v48  ;;  %v147_v41 = vld [vmem:[#allocation2 + $0x1a8] sm:$0xff]  ;;  %v4774_v48 = vld [vmem:[#allocation5 + $0x580] ss:$16 sps:$4 sm:$0xff]  }
  0x95   :  { %2385 = vmatprep.subr.bf16.mxu1 %v4743_v49  ;;  %2098 = vmatprep.mubr.bf16.mxu0 %v5406_v50  ;;  %v5444_v47 = vcombine.high %v143_v40, %v147_v41  ;;  %v4777_v49 = vld [vmem:[#allocation5 + $0x780] ss:$16 sps:$4 sm:$0xff]   ;;  %v5452_v63 = vcombine.low %v143_v40, %v147_v41  ;;  %v4806_v40 = vld [vmem:[#allocation5 + $0xec] ss:$16 sps:$4 sm:$0xff]  }
  0x96   :  { %2211 = vmatprep.mubr.bf16.mxu1 %v5408_v51  ;;  %v4801_v39 = vld [vmem:[#allocation5 + $0x700] ss:$16 sps:$4 sm:$0xff]   ;;  %v4809_v41 = vld [vmem:[#allocation5 + $0x2ec] ss:$16 sps:$4 sm:$0xff]  }
  0x97   :  { %2273 = vmatpush1.bf16.msra.mxu0 %v4738_v52  ;;  %v4782_v52 = vld [vmem:[#allocation5 + $0x564] ss:$16 sps:$4 sm:$0xff]  }
  0x98   :  { %2386 = vmatpush1.bf16.msra.mxu1 %v4741_v54  ;;  %2274 = vmatprep.subr.bf16.mxu0 %v4746_v56  ;;  %v4785_v54 = vld [vmem:[#allocation5 + $0x764] ss:$16 sps:$4 sm:$0xff]   ;;  %v4780_v56 = vld [vmem:[#allocation5 + $0x560] ss:$16 sps:$4 sm:$0xff]  }
  0x99   :  { %2387 = vmatprep.subr.bf16.mxu1 %v4749_v57  ;;  %v4783_v57 = vld [vmem:[#allocation5 + $0x760] ss:$16 sps:$4 sm:$0xff]  }
  0x9a   :  { %2099 = vmatmul.mubr.bf16.gmra.mxu0 %v5414_v61 }
  0x9b   :  { %2212 = vmatmul.mubr.bf16.gmra.mxu1 %v5416_v62  ;;  %2275 = vmatpush1.bf16.msra.mxu0 %v4744_v58  ;;  %v150_v58 = vld [vmem:[#allocation2 + $0x1c0] sm:$0xff] }
  0x9c   :  { %2388 = vmatpush1.bf16.msra.mxu1 %v4747_v1  ;;  %2276 = vmatprep.subr.bf16.mxu0 %v4752_v2  ;;  %v155_v1 = vld [vmem:[#allocation2 + $0x1e8] sm:$0xff]  ;;  %v4788_v2 = vld [vmem:[#allocation5 + $0x544] ss:$16 sps:$4 sm:$0xff]  }
  0x9d   :  { %2389 = vmatprep.subr.bf16.mxu1 %v4755_v3  ;;  %2108 = vmatprep.mubr.bf16.mxu0 %v5418_v4  ;;  %v4791_v3 = vld [vmem:[#allocation5 + $0x744] ss:$16 sps:$4 sm:$0xff]  }
  0x9e   :  { %2221 = vmatprep.mubr.bf16.mxu1 %v5420_v5 }
  0x9f   :  { %2277 = vmatpush1.bf16.msra.mxu0 %v4750_v6  ;;  %v5454_v6 = vcombine.high %v150_v58, %v154_v59 }
  0xa0   :  { %2390 = vmatpush1.bf16.msra.mxu1 %v4753_v7  ;;  %2278 = vmatprep.subr.bf16.mxu0 %v4758_v8  ;;  %v5456_v7 = vcombine.high %v151_v0, %v155_v1  ;;  %v4786_v8 = vld [vmem:[#allocation5 + $0x540] ss:$16 sps:$4 sm:$0xff]  }
  0xa1   :  { %2391 = vmatprep.subr.bf16.mxu1 %v4761_v9  ;;  %v4789_v9 = vld [vmem:[#allocation5 + $0x740] ss:$16 sps:$4 sm:$0xff]  }
  0xa2   :  { %2109 = vmatmul.mubr.bf16.gmra.mxu0 %v5426_v14 }
  0xa3   :  { %2222 = vmatmul.mubr.bf16.gmra.mxu1 %v5428_v15  ;;  %2279 = vmatpush2.bf16.msra.mxu0 %v4756_v20  ;;  %v96_v20 = vld [vmem:[#allocation2 + $0x10] sm:$0xff] }
  0xa4   :  { %2392 = vmatpush2.bf16.msra.mxu1 %v4759_v21  ;;  %2280 = vmatprep.subr.bf16.mxu0 %v4764_v22  ;;  %v100_v21 = vld [vmem:[#allocation2 + $0x30] sm:$0xff]  ;;  %v5462_v22 = vcombine.low %v150_v58, %v154_v59  ;;  %v4812_v58 = vld [vmem:[#allocation5 + $0xcc] ss:$16 sps:$4 sm:$0xff]  }
  0xa5   :  { %2393 = vmatprep.subr.bf16.mxu1 %v4767_v23  ;;  %2118 = vmatprep.mubr.bf16.mxu0 %v5430_v24  ;;  %v5464_v23 = vcombine.low %v151_v0, %v155_v1  ;;  %v4815_v59 = vld [vmem:[#allocation5 + $0x2cc] ss:$16 sps:$4 sm:$0xff]  }
  0xa6   :  { %2231 = vmatprep.mubr.bf16.mxu1 %v5432_v25 }
  0xa7   :  { %2281 = vmatpush2.bf16.msra.mxu0 %v4762_v26  ;;  %v97_v26 = vld [vmem:[#allocation2 + $0x18] sm:$0xff] }
  0xa8   :  { %2394 = vmatpush2.bf16.msra.mxu1 %v4765_v27  ;;  %2282 = vmatprep.subr.bf16.mxu0 %v4770_v30  ;;  %v101_v27 = vld [vmem:[#allocation2 + $0x38] sm:$0xff]  ;;  %v4800_v30 = vld [vmem:[#allocation5 + $0x504] ss:$16 sps:$4 sm:$0xff]  }
  0xa9   :  { %2395 = vmatprep.subr.bf16.mxu1 %v4773_v31  ;;  %v4803_v31 = vld [vmem:[#allocation5 + $0x704] ss:$16 sps:$4 sm:$0xff]  }
  0xaa   :  { %2119 = vmatmul.mubr.bf16.gmra.mxu0 %v5438_v37 }
  0xab   :  { %2232 = vmatmul.mubr.bf16.gmra.mxu1 %v5440_v38  ;;  %2283 = vmatpush2.bf16.msra.mxu0 %v4768_v32  ;;  %v5466_v32 = vcombine.high %v96_v20, %v100_v21 }
  0xac   :  { %2396 = vmatpush2.bf16.msra.mxu1 %v4771_v33  ;;  %2284 = vmatprep.subr.bf16.mxu0 %v4776_v42  ;;  %v5468_v33 = vcombine.high %v97_v26, %v101_v27  ;;  %v4804_v42 = vld [vmem:[#allocation5 + $0xe8] ss:$16 sps:$4 sm:$0xff]  }
  0xad   :  { %2397 = vmatprep.subr.bf16.mxu1 %v4779_v43  ;;  %2128 = vmatprep.mubr.bf16.mxu0 %v5442_v46  ;;  %v104_v43 = vld [vmem:[#allocation2 + $0x50] sm:$0xff] }
  0xae   :  { %2241 = vmatprep.mubr.bf16.mxu1 %v5444_v47 }
  0xaf   :  { %2285 = vmatpush2.bf16.msra.mxu0 %v4774_v48  ;;  %v108_v48 = vld [vmem:[#allocation2 + $0x70] sm:$0xff] }
  0xb0   :  { %2398 = vmatpush2.bf16.msra.mxu1 %v4777_v49  ;;  %2286 = vmatprep.subr.bf16.mxu0 %v4782_v52  ;;  %v5474_v49 = vcombine.low %v96_v20, %v100_v21  ;;  %v5476_v52 = vcombine.low %v97_v26, %v101_v27  ;;  %v5478_v0 = vcombine.high %v104_v43, %v108_v48  ;;  %v113_v20 = vld [vmem:[#allocation2 + $0x98] sm:$0xff] }
  0xb1   :  { %2399 = vmatprep.subr.bf16.mxu1 %v4785_v54  ;;  %v105_v54 = vld [vmem:[#allocation2 + $0x58] sm:$0xff] }
  0xb2   :  { %2129 = vmatmul.mubr.bf16.gmra.mxu0 %v5450_v60  ;;  %v117_v21 = vld [vmem:[#allocation2 + $0xb8] sm:$0xff] }
  0xb3   :  { %2242 = vmatmul.mubr.bf16.gmra.mxu1 %v5452_v63  ;;  %2287 = vmatpush2.bf16.msra.mxu0 %v4780_v56  ;;  %v109_v56 = vld [vmem:[#allocation2 + $0x78] sm:$0xff] }
  0xb4   :  { %2400 = vmatpush2.bf16.msra.mxu1 %v4783_v57  ;;  %2288 = vmatprep.subr.bf16.mxu0 %v4788_v2  ;;  %v4807_v57 = vld [vmem:[#allocation5 + $0x2e8] ss:$16 sps:$4 sm:$0xff]   ;;  %v5480_v1 = vcombine.high %v105_v54, %v109_v56 }
  0xb5   :  { %2401 = vmatprep.subr.bf16.mxu1 %v4791_v3  ;;  %2138 = vmatprep.mubr.bf16.mxu0 %v5454_v6  ;;  %v4810_v2 = vld [vmem:[#allocation5 + $0xc8] ss:$16 sps:$4 sm:$0xff]  }
  0xb6   :  { %2251 = vmatprep.mubr.bf16.mxu1 %v5456_v7  ;;  %v4813_v3 = vld [vmem:[#allocation5 + $0x2c8] ss:$16 sps:$4 sm:$0xff]  }
  0xb7   :  { %2289 = vmatpush2.bf16.msra.mxu0 %v4786_v8  ;;  %v4818_v8 = vld [vmem:[#allocation5 + $0xac] ss:$16 sps:$4 sm:$0xff]   ;;  %v4816_v26 = vld [vmem:[#allocation5 + $0xa8] ss:$16 sps:$4 sm:$0xff]  }
  0xb8   :  { %2402 = vmatpush2.bf16.msra.mxu1 %v4789_v9  ;;  %2290 = vmatprep.subr.bf16.mxu0 %v4794_v10  ;;  %v4821_v9 = vld [vmem:[#allocation5 + $0x2ac] ss:$16 sps:$4 sm:$0xff]   ;;  %v112_v10 = vld [vmem:[#allocation2 + $0x90] sm:$0xff]  ;;  %v4819_v27 = vld [vmem:[#allocation5 + $0x2a8] ss:$16 sps:$4 sm:$0xff]  }
  0xb9   :  { %2403 = vmatprep.subr.bf16.mxu1 %v4797_v13  ;;  %v116_v13 = vld [vmem:[#allocation2 + $0xb0] sm:$0xff] }
  0xba   :  { %2139 = vmatmul.mubr.bf16.gmra.mxu0 %v5462_v22 }
  0xbb   :  { %2252 = vmatmul.mubr.bf16.gmra.mxu1 %v5464_v23  ;;  %2291 = vmatpush2.bf16.msra.mxu0 %v4792_v16  ;;  %v5486_v16 = vcombine.low %v104_v43, %v108_v48  ;;  %v4833_v43 = vld [vmem:[#allocation5 + $0x26c] ss:$16 sps:$4 sm:$0xff]   ;;  %v4828_v48 = vld [vmem:[#allocation5 + $0x68] ss:$16 sps:$4 sm:$0xff]  }
  0xbc   :  { %2404 = vmatpush2.bf16.msra.mxu1 %v4795_v17  ;;  %2292 = vmatprep.subr.bf16.mxu0 %v4800_v30  ;;  %v5488_v17 = vcombine.low %v105_v54, %v109_v56  ;;  %v4824_v30 = vld [vmem:[#allocation5 + $0x8c] ss:$16 sps:$4 sm:$0xff]   ;;  %v4831_v54 = vld [vmem:[#allocation5 + $0x268] ss:$16 sps:$4 sm:$0xff]   ;;  %v120_v56 = vld [vmem:[#allocation2 + $0xd0] sm:$0xff] }
  0xbd   :  { %2405 = vmatprep.subr.bf16.mxu1 %v4803_v31  ;;  %2294 = vmatprep.mubr.bf16.mxu0 %v5466_v32  ;;  %v4827_v31 = vld [vmem:[#allocation5 + $0x28c] ss:$16 sps:$4 sm:$0xff]  }
  0xbe   :  { %2407 = vmatprep.mubr.bf16.mxu1 %v5468_v33 }
  0xbf   :  { %2293 = vmatpush2.bf16.msra.mxu0 %v4798_v36  ;;  %v5490_v36 = vcombine.high %v112_v10, %v116_v13 }
  0xc0   :  { %2406 = vmatpush2.bf16.msra.mxu1 %v4801_v39  ;;  %2488 = vmatprep.subr.bf16.mxu0 %v4806_v40  ;;  %v5492_v39 = vcombine.high %v113_v20, %v117_v21  ;;  %v4822_v40 = vld [vmem:[#allocation5 + $0x88] ss:$16 sps:$4 sm:$0xff]  }
  0xc1   :  { %2601 = vmatprep.subr.bf16.mxu1 %v4809_v41  ;;  %v4825_v41 = vld [vmem:[#allocation5 + $0x288] ss:$16 sps:$4 sm:$0xff]  }
  0xc2   :  { %2295 = vmatmul.mubr.bf16.vlgmr.msra.gmra.mxu0 %v5474_v49 }
  0xc3   :  { %2408 = vmatmul.mubr.bf16.vlgmr.msra.gmra.mxu1 %v5476_v52  ;;  %2489 = vmatpush1.bf16.msra.mxu0 %v4804_v42  ;;  %v4830_v42 = vld [vmem:[#allocation5 + $0x6c] ss:$16 sps:$4 sm:$0xff]  }
  0xc4   :  { %2602 = vmatpush1.bf16.msra.mxu1 %v4807_v57  ;;  %2490 = vmatprep.subr.bf16.mxu0 %v4812_v58  ;;  %v5498_v57 = vcombine.low %v112_v10, %v116_v13  ;;  %v5500_v58 = vcombine.low %v113_v20, %v117_v21  ;;  %v4834_v10 = vld [vmem:[#allocation5 + $0x48] ss:$16 sps:$4 sm:$0xff]   ;;  %v4842_v20 = vld [vmem:[#allocation5 + $0x2c] ss:$16 sps:$4 sm:$0xff]  }
  0xc5   :  { %2603 = vmatprep.subr.bf16.mxu1 %v4815_v59  ;;  %2304 = vmatprep.mubr.bf16.mxu0 %v5478_v0  ;;  %v124_v59 = vld [vmem:[#allocation2 + $0xf0] sm:$0xff]  ;;  %v4837_v13 = vld [vmem:[#allocation5 + $0x248] ss:$16 sps:$4 sm:$0xff]   ;;  %v4845_v21 = vld [vmem:[#allocation5 + $0x22c] ss:$16 sps:$4 sm:$0xff]  }
  0xc6   :  { %2417 = vmatprep.mubr.bf16.mxu1 %v5480_v1  ;;  %6262 = vst [vmem:[#allocation16_spill] sm:$0xff] %v5498_v57  ;;  %6263 = vst [vmem:[#allocation17_spill] sm:$0xff] %v5500_v58 }
  0xc7   :  { %2491 = vmatpush1.bf16.msra.mxu0 %v4810_v2  ;;  %v121_v2 = vld [vmem:[#allocation2 + $0xd8] sm:$0xff] }
  0xc8   :  { %2604 = vmatpush1.bf16.msra.mxu1 %v4813_v3  ;;  %2492 = vmatprep.subr.bf16.mxu0 %v4818_v8  ;;  %v125_v3 = vld [vmem:[#allocation2 + $0xf8] sm:$0xff] }
  0xc9   :  { %2605 = vmatprep.subr.bf16.mxu1 %v4821_v9  ;;  %v4836_v8 = vld [vmem:[#allocation5 + $0x4c] ss:$16 sps:$4 sm:$0xff]  }
  0xca   :  { %2305 = vmatmul.mubr.bf16.gmra.mxu0 %v5486_v16  ;;  %v4839_v9 = vld [vmem:[#allocation5 + $0x24c] ss:$16 sps:$4 sm:$0xff]  }
  0xcb   :  { %2418 = vmatmul.mubr.bf16.gmra.mxu1 %v5488_v17  ;;  %2493 = vmatpush1.bf16.msra.mxu0 %v4816_v26  ;;  %v5502_v26 = vcombine.high %v120_v56, %v124_v59 }
  0xcc   :  { %2606 = vmatpush1.bf16.msra.mxu1 %v4819_v27  ;;  %2494 = vmatprep.subr.bf16.mxu0 %v4824_v30  ;;  %v5504_v27 = vcombine.high %v121_v2, %v125_v3  ;;  %v4840_v30 = vld [vmem:[#allocation5 + $0x28] ss:$16 sps:$4 sm:$0xff]  }
  0xcd   :  { %2607 = vmatprep.subr.bf16.mxu1 %v4827_v31  ;;  %2314 = vmatprep.mubr.bf16.mxu0 %v5490_v36  ;;  %6264 = vst [vmem:[#allocation18_spill] sm:$0xff] %v5502_v26  ;;  %v4843_v31 = vld [vmem:[#allocation5 + $0x228] ss:$16 sps:$4 sm:$0xff]  }
  0xce   :  { %2427 = vmatprep.mubr.bf16.mxu1 %v5492_v39  ;;  %6265 = vst [vmem:[#allocation19_spill] sm:$0xff] %v5504_v27 }
  0xcf   :  { %2495 = vmatpush1.bf16.msra.mxu0 %v4822_v40  ;;  %v128_v40 = vld [vmem:[#allocation2 + $0x110] sm:$0xff] }
  0xd0   :  { %2608 = vmatpush1.bf16.msra.mxu1 %v4825_v41  ;;  %2496 = vmatprep.subr.bf16.mxu0 %v4830_v42  ;;  %v132_v41 = vld [vmem:[#allocation2 + $0x130] sm:$0xff]  ;;  %v5510_v42 = vcombine.low %v120_v56, %v124_v59  ;;  %v4846_v56 = vld [vmem:[#allocation5 + $0x8] ss:$16 sps:$4 sm:$0xff]  }
  0xd1   :  { %2609 = vmatprep.subr.bf16.mxu1 %v4833_v43  ;;  %v5512_v43 = vcombine.low %v121_v2, %v125_v3  ;;  %v4849_v59 = vld [vmem:[#allocation5 + $0x208] ss:$16 sps:$4 sm:$0xff]   ;;  %v4854_v2 = vld [vmem:[#allocation5 + $0x1ec] ss:$16 sps:$4 sm:$0xff]  }
  0xd2   :  { %2315 = vmatmul.mubr.bf16.gmra.mxu0 %v5498_v57  ;;  %6266 = vst [vmem:[#allocation20_spill] sm:$0xff] %v5510_v42  ;;  %v133_v57 = vld [vmem:[#allocation2 + $0x138] sm:$0xff] }
  0xd3   :  { %2428 = vmatmul.mubr.bf16.gmra.mxu1 %v5500_v58  ;;  %2497 = vmatpush1.bf16.msra.mxu0 %v4828_v48  ;;  %6267 = vst [vmem:[#allocation21_spill] sm:$0xff] %v5512_v43  ;;  %v129_v58 = vld [vmem:[#allocation2 + $0x118] sm:$0xff] }
  0xd4   :  { %2610 = vmatpush1.bf16.msra.mxu1 %v4831_v54  ;;  %2498 = vmatprep.subr.bf16.mxu0 %v4836_v8  ;;  %v4848_v48 = vld [vmem:[#allocation5 + $0xc] ss:$16 sps:$4 sm:$0xff]   ;;  %v5514_v8 = vcombine.high %v128_v40, %v132_v41 }
  0xd5   :  { %2611 = vmatprep.subr.bf16.mxu1 %v4839_v9  ;;  %2324 = vmatprep.mubr.bf16.mxu0 %v5502_v26  ;;  %v4851_v54 = vld [vmem:[#allocation5 + $0x20c] ss:$16 sps:$4 sm:$0xff]   ;;  %v5516_v9 = vcombine.high %v129_v58, %v133_v57 }
  0xd6   :  { %2437 = vmatprep.mubr.bf16.mxu1 %v5504_v27  ;;  %6268 = vst [vmem:[#allocation22_spill] sm:$0xff] %v5514_v8  ;;  %v4857_v3 = vld [vmem:[#allocation5 + $0x3ec] ss:$16 sps:$4 sm:$0xff]   ;;  %v5522_v27 = vcombine.low %v128_v40, %v132_v41  ;;  %v4858_v40 = vld [vmem:[#allocation5 + $0x1c8] ss:$16 sps:$4 sm:$0xff]  }
  0xd7   :  { %2499 = vmatpush1.bf16.msra.mxu0 %v4834_v10  ;;  %6269 = vst [vmem:[#allocation23_spill] sm:$0xff] %v5516_v9  ;;  %v4852_v10 = vld [vmem:[#allocation5 + $0x1e8] ss:$16 sps:$4 sm:$0xff]  }
  0xd8   :  { %2612 = vmatpush1.bf16.msra.mxu1 %v4837_v13  ;;  %2500 = vmatprep.subr.bf16.mxu0 %v4842_v20  ;;  %v4855_v13 = vld [vmem:[#allocation5 + $0x3e8] ss:$16 sps:$4 sm:$0xff]   ;;  %v136_v20 = vld [vmem:[#allocation2 + $0x150] sm:$0xff]  ;;  %6270 = vst [vmem:[#allocation24_spill] sm:$0xff] %v5522_v27 }
  0xd9   :  { %2613 = vmatprep.subr.bf16.mxu1 %v4845_v21  ;;  %v140_v21 = vld [vmem:[#allocation2 + $0x170] sm:$0xff]  ;;  %v141_v26 = vld [vmem:[#allocation2 + $0x178] sm:$0xff] }
  0xda   :  { %2325 = vmatmul.mubr.bf16.gmra.mxu0 %v5510_v42  ;;  %v5524_v42 = vcombine.low %v129_v58, %v133_v57  ;;  %v4861_v41 = vld [vmem:[#allocation5 + $0x3c8] ss:$16 sps:$4 sm:$0xff]   ;;  %v4866_v57 = vld [vmem:[#allocation5 + $0x1ac] ss:$16 sps:$4 sm:$0xff]  }
  0xdb   :  { %2438 = vmatmul.mubr.bf16.gmra.mxu1 %v5512_v43  ;;  %2501 = vmatpush1.bf16.msra.mxu0 %v4840_v30  ;;  %v137_v43 = vld [vmem:[#allocation2 + $0x158] sm:$0xff] }
  0xdc   :  { %2614 = vmatpush1.bf16.msra.mxu1 %v4843_v31  ;;  %2502 = vmatprep.subr.bf16.mxu0 %v4848_v48  ;;  %6271 = vst [vmem:[#allocation25_spill] sm:$0xff] %v5524_v42  ;;  %v4860_v30 = vld [vmem:[#allocation5 + $0x1cc] ss:$16 sps:$4 sm:$0xff]   ;;  %v5526_v48 = vcombine.high %v136_v20, %v140_v21 }
  0xdd   :  { %2615 = vmatprep.subr.bf16.mxu1 %v4851_v54  ;;  %2334 = vmatprep.mubr.bf16.mxu0 %v5514_v8  ;;  %v4863_v31 = vld [vmem:[#allocation5 + $0x3cc] ss:$16 sps:$4 sm:$0xff]   ;;  %v5528_v54 = vcombine.high %v137_v43, %v141_v26 }
  0xde   :  { %2447 = vmatprep.mubr.bf16.mxu1 %v5516_v9  ;;  %6272 = vst [vmem:[#allocation26_spill] sm:$0xff] %v5526_v48  ;;  %v4869_v58 = vld [vmem:[#allocation5 + $0x3ac] ss:$16 sps:$4 sm:$0xff]   ;;  %v5534_v9 = vcombine.low %v136_v20, %v140_v21  ;;  %v4870_v20 = vld [vmem:[#allocation5 + $0x188] ss:$16 sps:$4 sm:$0xff]  }
  0xdf   :  { %2503 = vmatpush1.bf16.msra.mxu0 %v4846_v56  ;;  %6273 = vst [vmem:[#allocation27_spill] sm:$0xff] %v5528_v54  ;;  %v4864_v56 = vld [vmem:[#allocation5 + $0x1a8] ss:$16 sps:$4 sm:$0xff]  }
  0xe0   :  { %2616 = vmatpush1.bf16.msra.mxu1 %v4849_v59  ;;  %2504 = vmatprep.subr.bf16.mxu0 %v4854_v2  ;;  %v4867_v59 = vld [vmem:[#allocation5 + $0x3a8] ss:$16 sps:$4 sm:$0xff]   ;;  %v144_v2 = vld [vmem:[#allocation2 + $0x190] sm:$0xff]  ;;  %6274 = vst [vmem:[#allocation28_spill] sm:$0xff] %v5534_v9 }
  0xe1   :  { %2617 = vmatprep.subr.bf16.mxu1 %v4857_v3  ;;  %v148_v3 = vld [vmem:[#allocation2 + $0x1b0] sm:$0xff]  ;;  %v149_v8 = vld [vmem:[#allocation2 + $0x1b8] sm:$0xff] }
  0xe2   :  { %2335 = vmatmul.mubr.bf16.gmra.mxu0 %v5522_v27  ;;  %v5536_v27 = vcombine.low %v137_v43, %v141_v26  ;;  %v4873_v21 = vld [vmem:[#allocation5 + $0x388] ss:$16 sps:$4 sm:$0xff]   ;;  %v4878_v26 = vld [vmem:[#allocation5 + $0x16c] ss:$16 sps:$4 sm:$0xff]  }
  0xe3   :  { %2448 = vmatmul.mubr.bf16.gmra.mxu1 %v5524_v42  ;;  %2505 = vmatpush2.bf16.msra.mxu0 %v4852_v10  ;;  %v145_v42 = vld [vmem:[#allocation2 + $0x198] sm:$0xff] }
  0xe4   :  { %2618 = vmatpush2.bf16.msra.mxu1 %v4855_v13  ;;  %2506 = vmatprep.subr.bf16.mxu0 %v4860_v30  ;;  %6275 = vst [vmem:[#allocation29_spill] sm:$0xff] %v5536_v27  ;;  %v4872_v10 = vld [vmem:[#allocation5 + $0x18c] ss:$16 sps:$4 sm:$0xff]   ;;  %v5538_v30 = vcombine.high %v144_v2, %v148_v3 }
  0xe5   :  { %2619 = vmatprep.subr.bf16.mxu1 %v4863_v31  ;;  %2344 = vmatprep.mubr.bf16.mxu0 %v5526_v48  ;;  %v4875_v13 = vld [vmem:[#allocation5 + $0x38c] ss:$16 sps:$4 sm:$0xff]   ;;  %v5540_v31 = vcombine.high %v145_v42, %v149_v8 }
  0xe6   :  { %2457 = vmatprep.mubr.bf16.mxu1 %v5528_v54  ;;  %v4881_v43 = vld [vmem:[#allocation5 + $0x36c] ss:$16 sps:$4 sm:$0xff]   ;;  %v5546_v54 = vcombine.low %v144_v2, %v148_v3  ;;  %v4882_v2 = vld [vmem:[#allocation5 + $0x148] ss:$16 sps:$4 sm:$0xff]  }
  0xe7   :  { %2507 = vmatpush2.bf16.msra.mxu0 %v4858_v40  ;;  %v4876_v40 = vld [vmem:[#allocation5 + $0x168] ss:$16 sps:$4 sm:$0xff]  }
  0xe8   :  { %2620 = vmatpush2.bf16.msra.mxu1 %v4861_v41  ;;  %2508 = vmatprep.subr.bf16.mxu0 %v4866_v57  ;;  %v4879_v41 = vld [vmem:[#allocation5 + $0x368] ss:$16 sps:$4 sm:$0xff]   ;;  %v152_v57 = vld [vmem:[#allocation2 + $0x1d0] sm:$0xff] }
  0xe9   :  { %2621 = vmatprep.subr.bf16.mxu1 %v4869_v58  ;;  %v156_v58 = vld [vmem:[#allocation2 + $0x1f0] sm:$0xff]  ;;  %v157_v48 = vld [vmem:[#allocation2 + $0x1f8] sm:$0xff] }
  0xea   :  { %2345 = vmatmul.mubr.bf16.gmra.mxu0 %v5534_v9  ;;  %v5548_v9 = vcombine.low %v145_v42, %v149_v8  ;;  %v4885_v3 = vld [vmem:[#allocation5 + $0x348] ss:$16 sps:$4 sm:$0xff]   ;;  %v4890_v42 = vld [vmem:[#allocation5 + $0x12c] ss:$16 sps:$4 sm:$0xff]  }
  0xeb   :  { %2458 = vmatmul.mubr.bf16.gmra.mxu1 %v5536_v27  ;;  %2509 = vmatpush2.bf16.msra.mxu0 %v4864_v56  ;;  %v153_v27 = vld [vmem:[#allocation2 + $0x1d8] sm:$0xff] }
  0xec   :  { %2622 = vmatpush2.bf16.msra.mxu1 %v4867_v59  ;;  %2510 = vmatprep.subr.bf16.mxu0 %v4872_v10  ;;  %6276 = vst [vmem:[#allocation30_spill] sm:$0xff] %v5548_v9  ;;  %v4884_v56 = vld [vmem:[#allocation5 + $0x14c] ss:$16 sps:$4 sm:$0xff]   ;;  %v5550_v10 = vcombine.high %v152_v57, %v156_v58 }
  0xed   :  { %2623 = vmatprep.subr.bf16.mxu1 %v4875_v13  ;;  %2354 = vmatprep.mubr.bf16.mxu0 %v5538_v30  ;;  %v4887_v59 = vld [vmem:[#allocation5 + $0x34c] ss:$16 sps:$4 sm:$0xff]   ;;  %v5552_v13 = vcombine.high %v153_v27, %v157_v48 }
  0xee   :  { %2467 = vmatprep.mubr.bf16.mxu1 %v5540_v31  ;;  %v4893_v8 = vld [vmem:[#allocation5 + $0x32c] ss:$16 sps:$4 sm:$0xff]  }
  0xef   :  { %2511 = vmatpush2.bf16.msra.mxu0 %v4870_v20  ;;  %v5558_v20 = vcombine.low %v152_v57, %v156_v58  ;;  %v4902_v57 = vld [vmem:[#allocation5 + $0x4ec] ss:$16 sps:$4 sm:$0xff]   ;;  %v4903_v58 = vld [vmem:[#allocation5 + $0x6e8] ss:$16 sps:$4 sm:$0xff]  }
  0xf0   :  { %2624 = vmatpush2.bf16.msra.mxu1 %v4873_v21  ;;  %2512 = vmatprep.subr.bf16.mxu0 %v4878_v26  ;;  %v5560_v21 = vcombine.low %v153_v27, %v157_v48  ;;  %v4888_v26 = vld [vmem:[#allocation5 + $0x128] ss:$16 sps:$4 sm:$0xff]   ;;  %v4905_v27 = vld [vmem:[#allocation5 + $0x6ec] ss:$16 sps:$4 sm:$0xff]  }
  0xf1   :  { %2625 = vmatprep.subr.bf16.mxu1 %v4881_v43  ;;  %v4891_v43 = vld [vmem:[#allocation5 + $0x328] ss:$16 sps:$4 sm:$0xff]  }
  0xf2   :  { %2355 = vmatmul.mubr.bf16.gmra.mxu0 %v5546_v54  ;;  %v4900_v48 = vld [vmem:[#allocation5 + $0x4e8] ss:$16 sps:$4 sm:$0xff]  }
  0xf3   :  { %2468 = vmatmul.mubr.bf16.gmra.mxu1 %v5548_v9  ;;  %2513 = vmatpush2.bf16.msra.mxu0 %v4876_v40  ;;  %v4896_v9 = vld [vmem:[#allocation5 + $0x10c] ss:$16 sps:$4 sm:$0xff]  }
  0xf4   :  { %2626 = vmatpush2.bf16.msra.mxu1 %v4879_v41  ;;  %2514 = vmatprep.subr.bf16.mxu0 %v4884_v56  ;;  %v4899_v40 = vld [vmem:[#allocation5 + $0x30c] ss:$16 sps:$4 sm:$0xff]   ;;  %v4894_v41 = vld [vmem:[#allocation5 + $0x108] ss:$16 sps:$4 sm:$0xff]  }
  0xf5   :  { %2627 = vmatprep.subr.bf16.mxu1 %v4887_v59  ;;  %2364 = vmatprep.mubr.bf16.mxu0 %v5550_v10  ;;  %v4897_v56 = vld [vmem:[#allocation5 + $0x308] ss:$16 sps:$4 sm:$0xff]   ;;  %v4908_v59 = vld [vmem:[#allocation5 + $0x4cc] ss:$16 sps:$4 sm:$0xff]  }
  0xf6   :  { %2477 = vmatprep.mubr.bf16.mxu1 %v5552_v13 }
  0xf7   :  { %2515 = vmatpush2.bf16.msra.mxu0 %v4882_v2  ;;  %v4911_v2 = vld [vmem:[#allocation5 + $0x6cc] ss:$16 sps:$4 sm:$0xff]  }
  0xf8   :  { %2628 = vmatpush2.bf16.msra.mxu1 %v4885_v3  ;;  %2516 = vmatprep.subr.bf16.mxu0 %v4890_v42  ;;  %v4906_v3 = vld [vmem:[#allocation5 + $0x4c8] ss:$16 sps:$4 sm:$0xff]  }
  0xf9   :  { %2629 = vmatprep.subr.bf16.mxu1 %v4893_v8  ;;  %v4912_v42 = vld [vmem:[#allocation5 + $0x4a8] ss:$16 sps:$4 sm:$0xff]  }
  0xfa   :  { %2365 = vmatmul.mubr.bf16.gmra.mxu0 %v5558_v20  ;;  %v4915_v8 = vld [vmem:[#allocation5 + $0x6a8] ss:$16 sps:$4 sm:$0xff]  }
  0xfb   :  { %2478 = vmatmul.mubr.bf16.gmra.mxu1 %v5560_v21  ;;  %2517 = vmatpush2.bf16.msra.mxu0 %v4888_v26  ;;  %v4918_v26 = vld [vmem:[#allocation5 + $0x488] ss:$16 sps:$4 sm:$0xff]  }
  0xfc   :  { %2630 = vmatpush2.bf16.msra.mxu1 %v4891_v43  ;;  %2518 = vmatprep.subr.bf16.mxu0 %v4896_v9  ;;  %v4909_v9 = vld [vmem:[#allocation5 + $0x6c8] ss:$16 sps:$4 sm:$0xff]  }
  0xfd   :  { %2631 = vmatprep.subr.bf16.mxu1 %v4899_v40  ;;  %2520 = vmatprep.mubr.bf16.mxu0 %v5372_v53  ;;  %v4914_v53 = vld [vmem:[#allocation5 + $0x4ac] ss:$16 sps:$4 sm:$0xff]   ;;  %v4921_v43 = vld [vmem:[#allocation5 + $0x688] ss:$16 sps:$4 sm:$0xff]  }
  0xfe   :  { %2633 = vmatprep.mubr.bf16.mxu1 %v5374_v55  ;;  %v4917_v55 = vld [vmem:[#allocation5 + $0x6ac] ss:$16 sps:$4 sm:$0xff]   ;;  %v4924_v40 = vld [vmem:[#allocation5 + $0x468] ss:$16 sps:$4 sm:$0xff]  }
  0xff   :  { %2519 = vmatpush2.bf16.msra.mxu0 %v4894_v41  ;;  %v4927_v41 = vld [vmem:[#allocation5 + $0x668] ss:$16 sps:$4 sm:$0xff]  }
 0x100   :  { %2632 = vmatpush2.bf16.msra.mxu1 %v4897_v56  ;;  %2714 = vmatprep.subr.bf16.mxu0 %v4902_v57  ;;  %v4930_v56 = vld [vmem:[#allocation5 + $0x448] ss:$16 sps:$4 sm:$0xff]  }
 0x101   :  { %2827 = vmatprep.subr.bf16.mxu1 %v4905_v27  ;;  %v4933_v57 = vld [vmem:[#allocation5 + $0x648] ss:$16 sps:$4 sm:$0xff]  }
 0x102   :  { %2521 = vmatmul.mubr.bf16.vlgmr.msra.gmra.mxu0 %v5378_v11  ;;  %v4920_v11 = vld [vmem:[#allocation5 + $0x48c] ss:$16 sps:$4 sm:$0xff]   ;;  %v4936_v27 = vld [vmem:[#allocation5 + $0x428] ss:$16 sps:$4 sm:$0xff]  }
 0x103   :  { %2634 = vmatmul.mubr.bf16.vlgmr.msra.gmra.mxu1 %v5380_v12  ;;  %2715 = vmatpush1.bf16.msra.mxu0 %v4900_v48  ;;  %v4923_v12 = vld [vmem:[#allocation5 + $0x68c] ss:$16 sps:$4 sm:$0xff]   ;;  %v4939_v48 = vld [vmem:[#allocation5 + $0x628] ss:$16 sps:$4 sm:$0xff]  }
 0x104   :  { %2828 = vmatpush1.bf16.msra.mxu1 %v4903_v58  ;;  %2716 = vmatprep.subr.bf16.mxu0 %v4908_v59  ;;  %v4944_v58 = vld [vmem:[#allocation5 + $0x40c] ss:$16 sps:$4 sm:$0xff]  }
 0x105   :  { %2829 = vmatprep.subr.bf16.mxu1 %v4911_v2  ;;  %2530 = vmatprep.mubr.bf16.mxu0 %v5382_v18  ;;  %v4926_v18 = vld [vmem:[#allocation5 + $0x46c] ss:$16 sps:$4 sm:$0xff]  }
 0x106   :  { %2643 = vmatprep.mubr.bf16.mxu1 %v5384_v19  ;;  %v4929_v19 = vld [vmem:[#allocation5 + $0x66c] ss:$16 sps:$4 sm:$0xff]  }
 0x107   :  { %2717 = vmatpush1.bf16.msra.mxu0 %v4906_v3  ;;  %v4947_v59 = vld [vmem:[#allocation5 + $0x60c] ss:$16 sps:$4 sm:$0xff]  }
 0x108   :  { %2830 = vmatpush1.bf16.msra.mxu1 %v4909_v9  ;;  %2718 = vmatprep.subr.bf16.mxu0 %v4914_v53  ;;  %v4950_v2 = vld [vmem:[#allocation5 + $0x5ec] ss:$16 sps:$4 sm:$0xff]  }
 0x109   :  { %2831 = vmatprep.subr.bf16.mxu1 %v4917_v55  ;;  %v4953_v3 = vld [vmem:[#allocation5 + $0x7ec] ss:$16 sps:$4 sm:$0xff]  }
 0x10a   :  { %2531 = vmatmul.mubr.bf16.gmra.mxu0 %v5390_v28  ;;  %v4932_v28 = vld [vmem:[#allocation5 + $0x44c] ss:$16 sps:$4 sm:$0xff]  }
 0x10b   :  { %2644 = vmatmul.mubr.bf16.gmra.mxu1 %v5392_v29  ;;  %2719 = vmatpush1.bf16.msra.mxu0 %v4912_v42  ;;  %v4935_v29 = vld [vmem:[#allocation5 + $0x64c] ss:$16 sps:$4 sm:$0xff]  }
 0x10c   :  { %2832 = vmatpush1.bf16.msra.mxu1 %v4915_v8  ;;  %2720 = vmatprep.subr.bf16.mxu0 %v4920_v11  ;;  %v4956_v9 = vld [vmem:[#allocation5 + $0x5cc] ss:$16 sps:$4 sm:$0xff]  }
 0x10d   :  { %2833 = vmatprep.subr.bf16.mxu1 %v4923_v12  ;;  %2540 = vmatprep.mubr.bf16.mxu0 %v5394_v34  ;;  %v4938_v34 = vld [vmem:[#allocation5 + $0x42c] ss:$16 sps:$4 sm:$0xff]   ;;  %v4972_v12 = vld [vmem:[#allocation5 + $0x568] ss:$16 sps:$4 sm:$0xff]  }
 0x10e   :  { %2653 = vmatprep.mubr.bf16.mxu1 %v5396_v35  ;;  %v4941_v35 = vld [vmem:[#allocation5 + $0x62c] ss:$16 sps:$4 sm:$0xff]  }
 0x10f   :  { %2721 = vmatpush1.bf16.msra.mxu0 %v4918_v26  ;;  %v4959_v53 = vld [vmem:[#allocation5 + $0x7cc] ss:$16 sps:$4 sm:$0xff]   ;;  %v4975_v26 = vld [vmem:[#allocation5 + $0x768] ss:$16 sps:$4 sm:$0xff]  }
 0x110   :  { %2834 = vmatpush1.bf16.msra.mxu1 %v4921_v43  ;;  %2722 = vmatprep.subr.bf16.mxu0 %v4926_v18  ;;  %v4962_v55 = vld [vmem:[#allocation5 + $0x5ac] ss:$16 sps:$4 sm:$0xff]   ;;  %v4978_v43 = vld [vmem:[#allocation5 + $0x548] ss:$16 sps:$4 sm:$0xff]  }
 0x111   :  { %2835 = vmatprep.subr.bf16.mxu1 %v4929_v19  ;;  %v4965_v42 = vld [vmem:[#allocation5 + $0x7ac] ss:$16 sps:$4 sm:$0xff]   ;;  %v4981_v18 = vld [vmem:[#allocation5 + $0x748] ss:$16 sps:$4 sm:$0xff]   ;;  %v416_v19 = vlaneseq }
 0x112   :  { %2541 = vmatmul.mubr.bf16.gmra.mxu0 %v5402_v44  ;;  %v4942_v44 = vld [vmem:[#allocation5 + $0x408] ss:$16 sps:$4 sm:$0xff]   ;;  %v4968_v8 = vld [vmem:[#allocation5 + $0x58c] ss:$16 sps:$4 sm:$0xff]  }
 0x113   :  { %2654 = vmatmul.mubr.bf16.gmra.mxu1 %v5404_v45  ;;  %2723 = vmatpush1.bf16.msra.mxu0 %v4924_v40  ;;  %v4945_v45 = vld [vmem:[#allocation5 + $0x608] ss:$16 sps:$4 sm:$0xff]   ;;  %v4971_v11 = vld [vmem:[#allocation5 + $0x78c] ss:$16 sps:$4 sm:$0xff]  }
 0x114   :  { %2836 = vmatpush1.bf16.msra.mxu1 %v4927_v41  ;;  %2724 = vmatprep.subr.bf16.mxu0 %v4932_v28  ;;  %v4984_v40 = vld [vmem:[#allocation5 + $0x528] ss:$16 sps:$4 sm:$0xff]   ;;  %v4995_v28 = vld [vmem:[#allocation5 + $0x70c] ss:$16 sps:$4 sm:$0xff]  }
 0x115   :  { %2837 = vmatprep.subr.bf16.mxu1 %v4935_v29  ;;  %2550 = vmatprep.mubr.bf16.mxu0 %v5406_v50  ;;  %v4948_v50 = vld [vmem:[#allocation5 + $0x5e8] ss:$16 sps:$4 sm:$0xff]  }
 0x116   :  { %2663 = vmatprep.mubr.bf16.mxu1 %v5408_v51  ;;  %v4951_v51 = vld [vmem:[#allocation5 + $0x7e8] ss:$16 sps:$4 sm:$0xff]  }
 0x117   :  { %2725 = vmatpush1.bf16.msra.mxu0 %v4930_v56  ;;  %v4987_v41 = vld [vmem:[#allocation5 + $0x728] ss:$16 sps:$4 sm:$0xff]   ;;  %v5599_v56 = vld [vmem:[#allocation7] sm:$0xf] }
 0x118   :  { %2838 = vmatpush1.bf16.msra.mxu1 %v4933_v57  ;;  %2726 = vmatprep.subr.bf16.mxu0 %v4938_v34  ;;  %v4990_v29 = vld [vmem:[#allocation5 + $0x508] ss:$16 sps:$4 sm:$0xff]   ;;  %6278 = vst [vmem:[#allocation32_spill] sm:$0xff] %v5599_v56 }
 0x119   :  { %2839 = vmatprep.subr.bf16.mxu1 %v4941_v35  ;;  %v4998_v57 = vld [vmem:[#allocation8 + $0x74] ss:$8 sps:$4 sm:$0xff]  }
 0x11a   :  { %2551 = vmatmul.mubr.bf16.gmra.mxu0 %v5414_v61  ;;  %v4954_v61 = vld [vmem:[#allocation5 + $0x5c8] ss:$16 sps:$4 sm:$0xff]  }
 0x11b   :  { %2664 = vmatmul.mubr.bf16.gmra.mxu1 %v5416_v62  ;;  %2727 = vmatpush1.bf16.msra.mxu0 %v4936_v27  ;;  %v4957_v62 = vld [vmem:[#allocation5 + $0x7c8] ss:$16 sps:$4 sm:$0xff]  }
 0x11c   :  { %2840 = vmatpush1.bf16.msra.mxu1 %v4939_v48  ;;  %2728 = vmatprep.subr.bf16.mxu0 %v4944_v58  ;;  %v5001_v27 = vld [vmem:[#allocation8 + $0x64] ss:$8 sps:$4 sm:$0xff]  }
 0x11d   :  { %2841 = vmatprep.subr.bf16.mxu1 %v4947_v59  ;;  %2560 = vmatprep.mubr.bf16.mxu0 %v5418_v4  ;;  %v4960_v4 = vld [vmem:[#allocation5 + $0x5a8] ss:$16 sps:$4 sm:$0xff]  }
 0x11e   :  { %2673 = vmatprep.mubr.bf16.mxu1 %v5420_v5  ;;  %v4963_v5 = vld [vmem:[#allocation5 + $0x7a8] ss:$16 sps:$4 sm:$0xff]  }
 0x11f   :  { %2729 = vmatpush1.bf16.msra.mxu0 %v4942_v44  ;;  %v4999_v44 = vld [vmem:[#allocation8 + $0x60] ss:$8 sps:$4 sm:$0xff]  }
 0x120   :  { %2842 = vmatpush1.bf16.msra.mxu1 %v4945_v45  ;;  %2730 = vmatprep.subr.bf16.mxu0 %v4950_v2 }
 0x121   :  { %2843 = vmatprep.subr.bf16.mxu1 %v4953_v3  ;;  %v5004_v3 = vld [vmem:[#allocation8 + $0x54] ss:$8 sps:$4 sm:$0xff]  }
 0x122   :  { %2561 = vmatmul.mubr.bf16.gmra.mxu0 %v5426_v14  ;;  %v4966_v14 = vld [vmem:[#allocation5 + $0x588] ss:$16 sps:$4 sm:$0xff]  }
 0x123   :  { %2674 = vmatmul.mubr.bf16.gmra.mxu1 %v5428_v15  ;;  %2731 = vmatpush2.bf16.msra.mxu0 %v4948_v50  ;;  %v4969_v15 = vld [vmem:[#allocation5 + $0x788] ss:$16 sps:$4 sm:$0xff]  }
 0x124   :  { %2844 = vmatpush2.bf16.msra.mxu1 %v4951_v51  ;;  %2732 = vmatprep.subr.bf16.mxu0 %v4956_v9  ;;  %v5007_v9 = vld [vmem:[#allocation8 + $0x44] ss:$8 sps:$4 sm:$0xff]  }
 0x125   :  { %2845 = vmatprep.subr.bf16.mxu1 %v4959_v53  ;;  %2570 = vmatprep.mubr.bf16.mxu0 %v5430_v24  ;;  %v4974_v24 = vld [vmem:[#allocation5 + $0x56c] ss:$16 sps:$4 sm:$0xff]  }
 0x126   :  { %2683 = vmatprep.mubr.bf16.mxu1 %v5432_v25  ;;  %v4977_v25 = vld [vmem:[#allocation5 + $0x76c] ss:$16 sps:$4 sm:$0xff]  }
 0x127   :  { %2733 = vmatpush2.bf16.msra.mxu0 %v4954_v61 }
 0x128   :  { %2846 = vmatpush2.bf16.msra.mxu1 %v4957_v62  ;;  %2734 = vmatprep.subr.bf16.mxu0 %v4962_v55 }
 0x129   :  { %2847 = vmatprep.subr.bf16.mxu1 %v4965_v42 }
 0x12a   :  { %2571 = vmatmul.mubr.bf16.gmra.mxu0 %v5438_v37  ;;  %v4980_v37 = vld [vmem:[#allocation5 + $0x54c] ss:$16 sps:$4 sm:$0xff]  }
 0x12b   :  { %2684 = vmatmul.mubr.bf16.gmra.mxu1 %v5440_v38  ;;  %2735 = vmatpush2.bf16.msra.mxu0 %v4960_v4  ;;  %v4983_v38 = vld [vmem:[#allocation5 + $0x74c] ss:$16 sps:$4 sm:$0xff]  }
 0x12c   :  { %2848 = vmatpush2.bf16.msra.mxu1 %v4963_v5  ;;  %2736 = vmatprep.subr.bf16.mxu0 %v4968_v8  ;;  %v5005_v4 = vld [vmem:[#allocation8 + $0x40] ss:$8 sps:$4 sm:$0xff]  }
 0x12d   :  { %2849 = vmatprep.subr.bf16.mxu1 %v4971_v11  ;;  %2580 = vmatprep.mubr.bf16.mxu0 %v5442_v46  ;;  %v4986_v46 = vld [vmem:[#allocation5 + $0x52c] ss:$16 sps:$4 sm:$0xff]   ;;  %v5010_v11 = vld [vmem:[#allocation8 + $0x34] ss:$8 sps:$4 sm:$0xff]  }
 0x12e   :  { %2693 = vmatprep.mubr.bf16.mxu1 %v5444_v47  ;;  %v4989_v47 = vld [vmem:[#allocation5 + $0x72c] ss:$16 sps:$4 sm:$0xff]  }
 0x12f   :  { %2737 = vmatpush2.bf16.msra.mxu0 %v4966_v14 }
 0x130   :  { %2850 = vmatpush2.bf16.msra.mxu1 %v4969_v15  ;;  %2738 = vmatprep.subr.bf16.mxu0 %v4974_v24  ;;  %v5046_v24 = vld [vmem:[#allocation8 + $0x174] ss:$8 sps:$4 sm:$0xff]  }
 0x131   :  { %2851 = vmatprep.subr.bf16.mxu1 %v4977_v25  ;;  %v5013_v25 = vld [vmem:[#allocation8 + $0x24] ss:$8 sps:$4 sm:$0xff]  }
 0x132   :  { %2581 = vmatmul.mubr.bf16.gmra.mxu0 %v5450_v60  ;;  %v5594_v60 = vshrl.u32 %v416_v19, 7  ;;  %v6281_v19 = vld [vmem:[#allocation18_spill] sm:$0xff] }
 0x133   :  { %2694 = vmatmul.mubr.bf16.gmra.mxu1 %v5452_v63  ;;  %2739 = vmatpush2.bf16.msra.mxu0 %v4972_v12  ;;  %v4992_v63 = vld [vmem:[#allocation5 + $0x50c] ss:$16 sps:$4 sm:$0xff]  }
 0x134   :  { %2852 = vmatpush2.bf16.msra.mxu1 %v4975_v26  ;;  %2740 = vmatprep.subr.bf16.mxu0 %v4980_v37  ;;  %6277 = vst [vmem:[#allocation31_spill] sm:$0xff] %v5594_v60  ;;  %v6256_v34 = vsub.s32 1, %v5594_v60  ;;  %v5044_v12 = vld [vmem:[#allocation8 + $0x170] ss:$8 sps:$4 sm:$0xff]  }
 0x135   :  { %2853 = vmatprep.subr.bf16.mxu1 %v4983_v38  ;;  %2590 = vmatprep.mubr.bf16.mxu0 %v5454_v6  ;;  %v4993_v6 = vld [vmem:[#allocation5 + $0x708] ss:$16 sps:$4 sm:$0xff]  }
 0x136   :  { %2703 = vmatprep.mubr.bf16.mxu1 %v5456_v7  ;;  %v6255_v7 = vsub.s32 0, %v5594_v60  ;;  %v5612_v35 = vrot.slane %v5599_v56, %v6256_v34  ;;  %v6279_v38 = vld [vmem:[#allocation16_spill] sm:$0xff] }
 0x137   :  { %2741 = vmatpush2.bf16.msra.mxu0 %v4978_v43  ;;  %v6280_v43 = vld [vmem:[#allocation17_spill] sm:$0xff] }
 0x138   :  { %2854 = vmatpush2.bf16.msra.mxu1 %v4981_v18  ;;  %2742 = vmatprep.subr.bf16.mxu0 %v4986_v46  ;;  %v6282_v46 = vld [vmem:[#allocation19_spill] sm:$0xff] }
 0x139   :  { %2855 = vmatprep.subr.bf16.mxu1 %v4989_v47 }
 0x13a   :  { %2591 = vmatmul.mubr.bf16.gmra.mxu0 %v5462_v22  ;;  %v5607_v22 = vrot.slane %v5599_v56, %v6255_v7 }
 0x13b   :  { %2704 = vmatmul.mubr.bf16.gmra.mxu1 %v5464_v23  ;;  %2743 = vmatpush2.bf16.msra.mxu0 %v4984_v40  ;;  %v4996_v23 = vld [vmem:[#allocation8 + $0x70] ss:$8 sps:$4 sm:$0xff]  }
 0x13c   :  { %2856 = vmatpush2.bf16.msra.mxu1 %v4987_v41  ;;  %2744 = vmatprep.subr.bf16.mxu0 %v4992_v63  ;;  %v5011_v41 = vld [vmem:[#allocation8 + $0x20] ss:$8 sps:$4 sm:$0xff]   ;;  %v5049_v63 = vld [vmem:[#allocation8 + $0x164] ss:$8 sps:$4 sm:$0xff]  }
 0x13d   :  { %2857 = vmatprep.subr.bf16.mxu1 %v4995_v28  ;;  %2746 = vmatprep.mubr.bf16.mxu0 %v5466_v32 }
 0x13e   :  { %2859 = vmatprep.mubr.bf16.mxu1 %v5468_v33 }
 0x13f   :  { %2745 = vmatpush2.bf16.msra.mxu0 %v4990_v29 }
 0x140   :  { %2858 = vmatpush2.bf16.msra.mxu1 %v4993_v6  ;;  %3432 = vmatprep.subr.bf16.mxu0 %v4998_v57  ;;  %v5016_v6 = vld [vmem:[#allocation8 + $0x14] ss:$8 sps:$4 sm:$0xff]   ;;  %v5047_v57 = vld [vmem:[#allocation8 + $0x160] ss:$8 sps:$4 sm:$0xff]  }
 0x141   :  { %3545 = vmatprep.subr.bf16.mxu1 %v5046_v24 }
 0x142   :  { %v2070_v32 = vpop.f32.mrf.mxu0  ;;  %2747 = vmatmul.mubr.bf16.vlgmr.msra.gmra.mxu0 %v5474_v49 }
 0x143   :  { %v2183_v48 = vpop.f32.mrf.mxu1  ;;  %2860 = vmatmul.mubr.bf16.vlgmr.msra.gmra.mxu1 %v5476_v52  ;;  %v2071_v33 = vadd.f32 %v2070_v32, %v5607_v22  ;;  %2756 = vmatprep.mubr.bf16.mxu0 %v5478_v0 }
 0x144   :  { %2869 = vmatprep.mubr.bf16.mxu1 %v5480_v1  ;;  %v2072_v58 = vpop.f32.mrf.mxu0  ;;  %3433 = vmatpush1.bf16.msra.mxu0 %v4996_v23  ;;  %v5002_v1 = vld [vmem:[#allocation8 + $0x50] ss:$8 sps:$4 sm:$0xff]  }
 0x145   :  { %v2185_v59 = vpop.f32.mrf.mxu1  ;;  %v5619_v45 = vadd.f32 %v2183_v48, %v2071_v33  ;;  %v2073_v2 = vadd.f32 %v2072_v58, %v5612_v35  ;;  %3434 = vmatprep.subr.bf16.mxu0 %v5001_v27  ;;  %3546 = vmatpush1.bf16.msra.mxu1 %v5044_v12  ;;  %v5014_v58 = vld [vmem:[#allocation8 + $0x10] ss:$8 sps:$4 sm:$0xff]   ;;  %v5053_v12 = vld [vmem:[#allocation8 + $0x140] ss:$8 sps:$4 sm:$0xff]  }
 0x146   :  { %v5622_v50 = vpop.f32.mrf.mxu0  ;;  %3547 = vmatprep.subr.bf16.mxu1 %v5049_v63 }
 0x147   :  { %v5624_v49 = vpop.f32.mrf.mxu1  ;;  %v5626_v52 = vadd.f32 %v2185_v59, %v2073_v2  ;;  %v5052_v59 = vld [vmem:[#allocation8 + $0x154] ss:$8 sps:$4 sm:$0xff]   ;;  %v5050_v2 = vld [vmem:[#allocation8 + $0x150] ss:$8 sps:$4 sm:$0xff]  }
 0x148   :  { %v5628_v51 = vpop.f32.mrf.mxu0  ;;  %3435 = vmatpush1.bf16.msra.mxu0 %v4999_v44  ;;  %v5019_v44 = vld [vmem:[#allocation8 + $0x4] ss:$8 sps:$4 sm:$0xff]  }
 0x149   :  { %v5630_v0 = vpop.f32.mrf.mxu1  ;;  %3436 = vmatprep.subr.bf16.mxu0 %v5004_v3  ;;  %3548 = vmatpush1.bf16.msra.mxu1 %v5047_v57 }
 0x14a   :  { %v2080_v53 = vpop.f32.mrf.mxu0  ;;  %2757 = vmatmul.mubr.bf16.gmra.mxu0 %v5486_v16  ;;  %3549 = vmatprep.subr.bf16.mxu1 %v5052_v59  ;;  %v6290_v59 = vld [vmem:[#allocation27_spill] sm:$0xff] }
 0x14b   :  { %v2193_v61 = vpop.f32.mrf.mxu1  ;;  %2870 = vmatmul.mubr.bf16.gmra.mxu1 %v5488_v17  ;;  %v2081_v62 = vadd.f32 %v2080_v53, %v5607_v22  ;;  %2766 = vmatprep.mubr.bf16.mxu0 %v5490_v36  ;;  %v6284_v53 = vld [vmem:[#allocation21_spill] sm:$0xff] }
 0x14c   :  { %2879 = vmatprep.mubr.bf16.mxu1 %v5492_v39  ;;  %v2082_v55 = vpop.f32.mrf.mxu0  ;;  %3437 = vmatpush1.bf16.msra.mxu0 %v5002_v1  ;;  %v5008_v39 = vld [vmem:[#allocation8 + $0x30] ss:$8 sps:$4 sm:$0xff]  }
 0x14d   :  { %v2195_v42 = vpop.f32.mrf.mxu1  ;;  %v5637_v5 = vadd.f32 %v2193_v61, %v2081_v62  ;;  %v2083_v8 = vadd.f32 %v2082_v55, %v5612_v35  ;;  %3438 = vmatprep.subr.bf16.mxu0 %v5007_v9  ;;  %v6283_v9 = vld [vmem:[#allocation20_spill] sm:$0xff]  ;;  %v6285_v62 = vld [vmem:[#allocation22_spill] sm:$0xff]  ;;  %v6286_v55 = vld [vmem:[#allocation23_spill] sm:$0xff]  ;;  %3550 = vmatpush1.bf16.msra.mxu1 %v5050_v2 }
 0x14e   :  { %v5640_v14 = vpop.f32.mrf.mxu0 }
 0x14f   :  { %v5642_v16 = vpop.f32.mrf.mxu1  ;;  %v5644_v17 = vadd.f32 %v2195_v42, %v2083_v8  ;;  %v5017_v8 = vld [vmem:[#allocation8] ss:$8 sps:$4 sm:$0xff]   ;;  %v2085_v60 = vadd.f32 %v5640_v14, %v5607_v22 }
 0x150   :  { %v5646_v15 = vpop.f32.mrf.mxu0  ;;  %3439 = vmatpush1.bf16.msra.mxu0 %v5005_v4 }
 0x151   :  { %v5648_v36 = vpop.f32.mrf.mxu1  ;;  %3440 = vmatprep.subr.bf16.mxu0 %v5010_v11  ;;  %v5055_v11 = vld [vmem:[#allocation8 + $0x144] ss:$8 sps:$4 sm:$0xff]  }
 0x152   :  { %v2090_v26 = vpop.f32.mrf.mxu0  ;;  %2767 = vmatmul.mubr.bf16.gmra.mxu0 %v6279_v38  ;;  %3551 = vmatprep.subr.bf16.mxu1 %v5055_v11 }
 0x153   :  { %v2203_v37 = vpop.f32.mrf.mxu1  ;;  %2880 = vmatmul.mubr.bf16.gmra.mxu1 %v6280_v43  ;;  %v2091_v18 = vadd.f32 %v2090_v26, %v5607_v22  ;;  %2776 = vmatprep.mubr.bf16.mxu0 %v6281_v19  ;;  %v5020_v19 = vld [vmem:[#allocation8 + $0xf0] ss:$8 sps:$4 sm:$0xff]  }
 0x154   :  { %2889 = vmatprep.mubr.bf16.mxu1 %v6282_v46  ;;  %v2092_v47 = vpop.f32.mrf.mxu0  ;;  %3441 = vmatpush1.bf16.msra.mxu0 %v5008_v39  ;;  %v5058_v46 = vld [vmem:[#allocation8 + $0x134] ss:$8 sps:$4 sm:$0xff]  }
 0x155   :  { %v2205_v40 = vpop.f32.mrf.mxu1  ;;  %v5655_v28 = vadd.f32 %v2203_v37, %v2091_v18  ;;  %v2093_v29 = vadd.f32 %v2092_v47, %v5612_v35  ;;  %3442 = vmatprep.subr.bf16.mxu0 %v5013_v25  ;;  %v5022_v25 = vld [vmem:[#allocation8 + $0xf4] ss:$8 sps:$4 sm:$0xff]   ;;  %v5025_v47 = vld [vmem:[#allocation8 + $0xe4] ss:$8 sps:$4 sm:$0xff]   ;;  %3552 = vmatpush1.bf16.msra.mxu1 %v5053_v12 }
 0x156   :  { %v5658_v23 = vpop.f32.mrf.mxu0  ;;  %3553 = vmatprep.subr.bf16.mxu1 %v5058_v46  ;;  %v5031_v12 = vld [vmem:[#allocation8 + $0xc4] ss:$8 sps:$4 sm:$0xff]  }
 0x157   :  { %v5660_v27 = vpop.f32.mrf.mxu1  ;;  %v5662_v32 = vadd.f32 %v2205_v40, %v2093_v29  ;;  %v5056_v40 = vld [vmem:[#allocation8 + $0x130] ss:$8 sps:$4 sm:$0xff]   ;;  %v6287_v29 = vld [vmem:[#allocation24_spill] sm:$0xff] }
 0x158   :  { %v5664_v48 = vpop.f32.mrf.mxu0  ;;  %3443 = vmatpush1.bf16.msra.mxu0 %v5011_v41 }
 0x159   :  { %v5666_v33 = vpop.f32.mrf.mxu1  ;;  %3444 = vmatprep.subr.bf16.mxu0 %v5016_v6  ;;  %v6288_v6 = vld [vmem:[#allocation25_spill] sm:$0xff]  ;;  %3554 = vmatpush1.bf16.msra.mxu1 %v5056_v40  ;;  %v6291_v40 = vld [vmem:[#allocation28_spill] sm:$0xff] }
 0x15a   :  { %v2100_v3 = vpop.f32.mrf.mxu0  ;;  %2777 = vmatmul.mubr.bf16.gmra.mxu0 %v6283_v9 }
 0x15b   :  { %v2213_v1 = vpop.f32.mrf.mxu1  ;;  %2890 = vmatmul.mubr.bf16.gmra.mxu1 %v6284_v53  ;;  %v2101_v61 = vadd.f32 %v2100_v3, %v5607_v22  ;;  %2786 = vmatprep.mubr.bf16.mxu0 %v6285_v62  ;;  %v5023_v3 = vld [vmem:[#allocation8 + $0xe0] ss:$8 sps:$4 sm:$0xff]  }
 0x15c   :  { %2899 = vmatprep.mubr.bf16.mxu1 %v6286_v55  ;;  %v2102_v42 = vpop.f32.mrf.mxu0  ;;  %3445 = vmatpush1.bf16.msra.mxu0 %v5014_v58  ;;  %v6289_v58 = vld [vmem:[#allocation26_spill] sm:$0xff]  ;;  %v5059_v62 = vld [vmem:[#allocation8 + $0x120] ss:$8 sps:$4 sm:$0xff]  }
 0x15d   :  { %v2215_v4 = vpop.f32.mrf.mxu1  ;;  %v5673_v39 = vadd.f32 %v2213_v1, %v2101_v61  ;;  %v2103_v24 = vadd.f32 %v2102_v42, %v5612_v35  ;;  %3446 = vmatprep.subr.bf16.mxu0 %v5019_v44  ;;  %v5061_v1 = vld [vmem:[#allocation8 + $0x124] ss:$8 sps:$4 sm:$0xff]   ;;  %v5028_v61 = vld [vmem:[#allocation8 + $0xd4] ss:$8 sps:$4 sm:$0xff]  }
 0x15e   :  { %v5676_v26 = vpop.f32.mrf.mxu0  ;;  %3555 = vmatprep.subr.bf16.mxu1 %v5061_v1 }
 0x15f   :  { %v5678_v37 = vpop.f32.mrf.mxu1  ;;  %v5680_v38 = vadd.f32 %v2215_v4, %v2103_v24  ;;  %v5026_v24 = vld [vmem:[#allocation8 + $0xd0] ss:$8 sps:$4 sm:$0xff]   ;;  %3556 = vmatpush1.bf16.msra.mxu1 %v5059_v62 }
 0x160   :  { %v5682_v43 = vpop.f32.mrf.mxu0  ;;  %3447 = vmatpush1.bf16.msra.mxu0 %v5017_v8  ;;  %v5032_v62 = vld [vmem:[#allocation8 + $0xb0] ss:$8 sps:$4 sm:$0xff]  }
 0x161   :  { %v5684_v18 = vpop.f32.mrf.mxu1  ;;  %3448 = vmatprep.subr.bf16.mxu0 %v5022_v25  ;;  %v5064_v25 = vld [vmem:[#allocation8 + $0x114] ss:$8 sps:$4 sm:$0xff]  }
 0x162   :  { %v2110_v41 = vpop.f32.mrf.mxu0  ;;  %2787 = vmatmul.mubr.bf16.gmra.mxu0 %v6287_v29  ;;  %3557 = vmatprep.subr.bf16.mxu1 %v5064_v25  ;;  %v5037_v25 = vld [vmem:[#allocation8 + $0xa4] ss:$8 sps:$4 sm:$0xff]  }
 0x163   :  { %v2223_v63 = vpop.f32.mrf.mxu1  ;;  %2900 = vmatmul.mubr.bf16.gmra.mxu1 %v6288_v6  ;;  %v2111_v57 = vadd.f32 %v2110_v41, %v5607_v22  ;;  %2796 = vmatprep.mubr.bf16.mxu0 %v6289_v58  ;;  %v6292_v41 = vld [vmem:[#allocation29_spill] sm:$0xff] }
 0x164   :  { %2909 = vmatprep.mubr.bf16.mxu1 %v6290_v59  ;;  %v2112_v44 = vpop.f32.mrf.mxu0  ;;  %3449 = vmatpush2.bf16.msra.mxu0 %v5020_v19  ;;  %v5062_v19 = vld [vmem:[#allocation8 + $0x110] ss:$8 sps:$4 sm:$0xff]   ;;  %v5067_v58 = vld [vmem:[#allocation8 + $0x104] ss:$8 sps:$4 sm:$0xff]  }
 0x165   :  { %v2225_v2 = vpop.f32.mrf.mxu1  ;;  %v5691_v9 = vadd.f32 %v2223_v63, %v2111_v57  ;;  %v2113_v53 = vadd.f32 %v2112_v44, %v5612_v35  ;;  %3450 = vmatprep.subr.bf16.mxu0 %v5025_v47  ;;  %v5029_v57 = vld [vmem:[#allocation8 + $0xc0] ss:$8 sps:$4 sm:$0xff]   ;;  %3558 = vmatpush1.bf16.msra.mxu1 %v5062_v19 }
 0x166   :  { %v5694_v55 = vpop.f32.mrf.mxu0  ;;  %3559 = vmatprep.subr.bf16.mxu1 %v5067_v58 }
 0x167   :  { %v5696_v42 = vpop.f32.mrf.mxu1  ;;  %v5698_v4 = vadd.f32 %v2225_v2, %v2113_v53  ;;  %v5034_v2 = vld [vmem:[#allocation8 + $0xb4] ss:$8 sps:$4 sm:$0xff]  }
 0x168   :  { %v5700_v8 = vpop.f32.mrf.mxu0  ;;  %3451 = vmatpush2.bf16.msra.mxu0 %v5023_v3  ;;  %v5065_v3 = vld [vmem:[#allocation8 + $0x100] ss:$8 sps:$4 sm:$0xff]  }
 0x169   :  { %v5702_v11 = vpop.f32.mrf.mxu1  ;;  %3452 = vmatprep.subr.bf16.mxu0 %v5028_v61  ;;  %3560 = vmatpush1.bf16.msra.mxu1 %v5065_v3 }
 0x16a   :  { %v2120_v46 = vpop.f32.mrf.mxu0  ;;  %2797 = vmatmul.mubr.bf16.gmra.mxu0 %v6291_v40 }
 0x16b   :  { %v2233_v47 = vpop.f32.mrf.mxu1  ;;  %2910 = vmatmul.mubr.bf16.gmra.mxu1 %v6292_v41  ;;  %v2121_v63 = vadd.f32 %v2120_v46, %v5607_v22  ;;  %2806 = vmatprep.mubr.bf16.mxu0 %v5538_v30 }
 0x16c   :  { %2919 = vmatprep.mubr.bf16.mxu1 %v5540_v31  ;;  %v2122_v29 = vpop.f32.mrf.mxu0  ;;  %3453 = vmatpush2.bf16.msra.mxu0 %v5026_v24  ;;  %v5070_v24 = vld [vmem:[#allocation8 + $0x1f4] ss:$8 sps:$4 sm:$0xff]  }
 0x16d   :  { %v2235_v6 = vpop.f32.mrf.mxu1  ;;  %v5709_v59 = vadd.f32 %v2233_v47, %v2121_v63  ;;  %v2123_v44 = vadd.f32 %v2122_v29, %v5612_v35  ;;  %3454 = vmatprep.subr.bf16.mxu0 %v5031_v12  ;;  %v5068_v12 = vld [vmem:[#allocation8 + $0x1f0] ss:$8 sps:$4 sm:$0xff]   ;;  %v5035_v29 = vld [vmem:[#allocation8 + $0xa0] ss:$8 sps:$4 sm:$0xff]   ;;  %3561 = vmatprep.subr.bf16.mxu1 %v5070_v24 }
 0x16e   :  { %v5712_v1 = vpop.f32.mrf.mxu0  ;;  %v6293_v47 = vld [vmem:[#allocation30_spill] sm:$0xff]  ;;  %3562 = vmatpush2.bf16.msra.mxu1 %v5068_v12 }
 0x16f   :  { %v5714_v53 = vpop.f32.mrf.mxu1  ;;  %v5716_v30 = vadd.f32 %v2235_v6, %v2123_v44  ;;  %v5073_v6 = vld [vmem:[#allocation8 + $0x1e4] ss:$8 sps:$4 sm:$0xff]   ;;  %v5071_v44 = vld [vmem:[#allocation8 + $0x1e0] ss:$8 sps:$4 sm:$0xff]   ;;  %v5038_v24 = vld [vmem:[#allocation8 + $0x90] ss:$8 sps:$4 sm:$0xff]  }
 0x170   :  { %v5718_v31 = vpop.f32.mrf.mxu0  ;;  %3455 = vmatpush2.bf16.msra.mxu0 %v5029_v57  ;;  %3563 = vmatprep.subr.bf16.mxu1 %v5073_v6  ;;  %v5041_v6 = vld [vmem:[#allocation8 + $0x80] ss:$8 sps:$4 sm:$0xff]  }
 0x171   :  { %v5720_v61 = vpop.f32.mrf.mxu1  ;;  %3456 = vmatprep.subr.bf16.mxu0 %v5034_v2 }
 0x172   :  { %v2130_v19 = vpop.f32.mrf.mxu0  ;;  %2807 = vmatmul.mubr.bf16.gmra.mxu0 %v5546_v54  ;;  %v5040_v54 = vld [vmem:[#allocation8 + $0x94] ss:$8 sps:$4 sm:$0xff]   ;;  %3564 = vmatpush2.bf16.msra.mxu1 %v5071_v44  ;;  %v5077_v44 = vld [vmem:[#allocation8 + $0x1c0] ss:$8 sps:$4 sm:$0xff]  }
 0x173   :  { %v2243_v46 = vpop.f32.mrf.mxu1  ;;  %2920 = vmatmul.mubr.bf16.gmra.mxu1 %v6293_v47  ;;  %v2131_v40 = vadd.f32 %v2130_v19, %v5607_v22  ;;  %2816 = vmatprep.mubr.bf16.mxu0 %v5550_v10  ;;  %v5076_v19 = vld [vmem:[#allocation8 + $0x1d4] ss:$8 sps:$4 sm:$0xff]  }
 0x174   :  { %2929 = vmatprep.mubr.bf16.mxu1 %v5552_v13  ;;  %v2132_v41 = vpop.f32.mrf.mxu0  ;;  %3457 = vmatpush2.bf16.msra.mxu0 %v5032_v62 }
 0x175   :  { %v2245_v63 = vpop.f32.mrf.mxu1  ;;  %v5727_v57 = vadd.f32 %v2243_v46, %v2131_v40  ;;  %v2133_v58 = vadd.f32 %v2132_v41, %v5612_v35  ;;  %3458 = vmatprep.subr.bf16.mxu0 %v5037_v25  ;;  %v5043_v46 = vld [vmem:[#allocation8 + $0x84] ss:$8 sps:$4 sm:$0xff]   ;;  %v5074_v25 = vld [vmem:[#allocation8 + $0x1d0] ss:$8 sps:$4 sm:$0xff]   ;;  %3565 = vmatprep.subr.bf16.mxu1 %v5076_v19 }
 0x176   :  { %v5730_v2 = vpop.f32.mrf.mxu0  ;;  %3566 = vmatpush2.bf16.msra.mxu1 %v5074_v25 }
 0x177   :  { %v5732_v3 = vpop.f32.mrf.mxu1  ;;  %v5734_v10 = vadd.f32 %v2245_v63, %v2133_v58 }
 0x178   :  { %v5736_v13 = vpop.f32.mrf.mxu0  ;;  %3459 = vmatpush2.bf16.msra.mxu0 %v5035_v29  ;;  %v5079_v29 = vld [vmem:[#allocation8 + $0x1c4] ss:$8 sps:$4 sm:$0xff]  }
 0x179   :  { %v5738_v62 = vpop.f32.mrf.mxu1  ;;  %3460 = vmatprep.subr.bf16.mxu0 %v5040_v54  ;;  %3567 = vmatprep.subr.bf16.mxu1 %v5079_v29 }
 0x17a   :  { %v2140_v12 = vpop.f32.mrf.mxu0  ;;  %2817 = vmatmul.mubr.bf16.gmra.mxu0 %v5558_v20  ;;  %3568 = vmatpush2.bf16.msra.mxu1 %v5077_v44 }
 0x17b   :  { %v2253_v47 = vpop.f32.mrf.mxu1  ;;  %2930 = vmatmul.mubr.bf16.gmra.mxu1 %v5560_v21  ;;  %v2141_v40 = vadd.f32 %v2140_v12, %v5607_v22 }
 0x17c   :  { %v2142_v41 = vpop.f32.mrf.mxu0  ;;  %3461 = vmatpush2.bf16.msra.mxu0 %v5038_v24  ;;  %v5082_v24 = vld [vmem:[#allocation8 + $0x1b4] ss:$8 sps:$4 sm:$0xff]  }
 0x17d   :  { %v2255_v63 = vpop.f32.mrf.mxu1  ;;  %v5743_v58 = vadd.f32 %v2253_v47, %v2141_v40  ;;  %v2143_v54 = vadd.f32 %v2142_v41, %v5612_v35  ;;  %3462 = vmatprep.subr.bf16.mxu0 %v5043_v46  ;;  %v2075_v47 = vadd.f32 %v5622_v50, %v5607_v22  ;;  %v5080_v46 = vld [vmem:[#allocation8 + $0x1b0] ss:$8 sps:$4 sm:$0xff]   ;;  %3569 = vmatprep.subr.bf16.mxu1 %v5082_v24 }
 0x17e   :  { %v5746_v7 = vpop.f32.mrf.mxu0  ;;  %v2077_v41 = vadd.f32 %v5628_v51, %v5612_v35  ;;  %3570 = vmatpush2.bf16.msra.mxu1 %v5080_v46  ;;  %v5088_v51 = vld [vmem:[#allocation8 + $0x194] ss:$8 sps:$4 sm:$0xff]  }
 0x17f   :  { %6294 = vst [vmem:[#allocation16_spill] sm:$0xff] %v5743_v58  ;;  %6295 = vst [vmem:[#allocation17_spill] sm:$0xff] %v5746_v7  ;;  %v5748_v20 = vpop.f32.mrf.mxu1  ;;  %v5750_v21 = vadd.f32 %v2255_v63, %v2143_v54  ;;  %v5085_v54 = vld [vmem:[#allocation8 + $0x1a4] ss:$8 sps:$4 sm:$0xff]   ;;  %v2188_v34 = vadd.f32 %v5624_v49, %v2075_v47  ;;  %v2198_v7 = vadd.f32 %v5642_v16, %v2085_v60 }
 0x180   :  { %6296 = vst [vmem:[#allocation18_spill] sm:$0xff] %v5748_v20  ;;  %v5752_v19 = vpop.f32.mrf.mxu0  ;;  %3463 = vmatpush2.bf16.msra.mxu0 %v5041_v6  ;;  %v5083_v6 = vld [vmem:[#allocation8 + $0x1a0] ss:$8 sps:$4 sm:$0xff]   ;;  %3571 = vmatprep.subr.bf16.mxu1 %v5085_v54  ;;  %v2190_v58 = vadd.f32 %v5630_v0, %v2077_v41 }
 0x181   :  { %6297 = vst [vmem:[#allocation19_spill] sm:$0xff] %v5750_v21  ;;  %6298 = vst [vmem:[#allocation20_spill] sm:$0xff] %v5752_v19  ;;  %v5754_v12 = vpop.f32.mrf.mxu1 }
 0x182   :  { %6299 = vst [vmem:[#allocation21_spill] sm:$0xff] %v5754_v12  ;;  %v2296_v25 = vpop.f32.mrf.mxu0  ;;  %3572 = vmatpush2.bf16.msra.mxu1 %v5083_v6 }
 0x183   :  { %v2409_v40 = vpop.f32.mrf.mxu1  ;;  %v2297_v12 = vadd.f32 %v2296_v25, %v5619_v45  ;;  %3573 = vmatprep.subr.bf16.mxu1 %v5088_v51  ;;  %v2087_v25 = vadd.f32 %v5646_v15, %v5612_v35 }
 0x184   :  { %v2298_v29 = vpop.f32.mrf.mxu0 }
 0x185   :  { %v2411_v63 = vpop.f32.mrf.mxu1  ;;  %v2299_v56 = vadd.f32 %v2298_v29, %v5626_v52  ;;  %v5086_v52 = vld [vmem:[#allocation8 + $0x190] ss:$8 sps:$4 sm:$0xff]   ;;  %v2410_v46 = vadd.f32 %v2409_v40, %v2297_v12  ;;  %v2200_v15 = vadd.f32 %v5648_v36, %v2087_v25  ;;  %v2097_v36 = vadd.f32 %v5664_v48, %v5612_v35 }
 0x186   :  { %v2300_v50 = vpop.f32.mrf.mxu0  ;;  %3574 = vmatpush2.bf16.msra.mxu1 %v5086_v52 }
 0x187   :  { %v2413_v44 = vpop.f32.mrf.mxu1  ;;  %v2301_v24 = vadd.f32 %v2300_v50, %v2188_v34  ;;  %v2412_v19 = vadd.f32 %v2411_v63, %v2299_v56  ;;  %v5091_v50 = vld [vmem:[#allocation8 + $0x184] ss:$8 sps:$4 sm:$0xff]   ;;  %v2940_v12 = vmax.f32 %v2410_v46, 0.0 }
 0x188   :  { %v2302_v21 = vpop.f32.mrf.mxu0  ;;  %3575 = vmatprep.subr.bf16.mxu1 %v5091_v50 }
 0x189   :  { %v2415_v20 = vpop.f32.mrf.mxu1  ;;  %v2414_v49 = vadd.f32 %v2413_v44, %v2301_v24  ;;  %v2303_v47 = vadd.f32 %v2302_v21, %v2190_v58  ;;  %v2941_v14 = vmax.f32 %v2412_v19, 0.0  ;;  %v5089_v21 = vld [vmem:[#allocation8 + $0x180] ss:$8 sps:$4 sm:$0xff]   ;;  %v2095_v24 = vadd.f32 %v5658_v23, %v5607_v22 }
 0x18a   :  { %v2306_v29 = vpop.f32.mrf.mxu0  ;;  %3576 = vmatpush2.bf16.msra.mxu1 %v5089_v21 }
 0x18b   :  { %v2419_v45 = vpop.f32.mrf.mxu1  ;;  %v2416_v0 = vadd.f32 %v2415_v20, %v2303_v47  ;;  %v2944_v34 = vmax.f32 %v2414_v49, 0.0  ;;  %v2307_v40 = vadd.f32 %v2306_v29, %v5637_v5  ;;  %v2208_v23 = vadd.f32 %v5660_v27, %v2095_v24 }
 0x18c   :  { %v2308_v41 = vpop.f32.mrf.mxu0 }
 0x18d   :  { %v2421_v54 = vpop.f32.mrf.mxu1  ;;  %v2945_v56 = vmax.f32 %v2416_v0, 0.0  ;;  %v2309_v58 = vadd.f32 %v2308_v41, %v5644_v17  ;;  %v3004_v60 = vpack.c.bf16 %v2944_v34, %v2940_v12  ;;  %v2420_v47 = vadd.f32 %v2419_v45, %v2307_v40 }
 0x18e   :  { %v2310_v63 = vpop.f32.mrf.mxu0 }
 0x18f   :  { %v2423_v6 = vpop.f32.mrf.mxu1  ;;  %v2311_v20 = vadd.f32 %v2310_v63, %v2198_v7  ;;  %v3005_v44 = vpack.c.bf16 %v2945_v56, %v2941_v14  ;;  %v2422_v51 = vadd.f32 %v2421_v54, %v2309_v58  ;;  %v2948_v54 = vmax.f32 %v2420_v47, 0.0 }
 0x190   :  { %v2312_v16 = vpop.f32.mrf.mxu0  ;;  %v2210_v56 = vadd.f32 %v5666_v33, %v2097_v36  ;;  %v2105_v63 = vadd.f32 %v5676_v26, %v5607_v22 }
 0x191   :  { %v2425_v19 = vpop.f32.mrf.mxu1  ;;  %v2424_v17 = vadd.f32 %v2423_v6, %v2311_v20  ;;  %v2313_v49 = vadd.f32 %v2312_v16, %v2200_v15  ;;  %3464 = vmatprep.mubr.bf16.mxu0 %v3005_v44  ;;  %v2949_v0 = vmax.f32 %v2422_v51, 0.0 }
 0x192   :  { %v2316_v5 = vpop.f32.mrf.mxu0  ;;  %3465 = vmatmul.mubr.bf16.vlgmr.msra.gmra.mxu0 %v3004_v60 }
 0x193   :  { %v2429_v52 = vpop.f32.mrf.mxu1  ;;  %v2426_v7 = vadd.f32 %v2425_v19, %v2313_v49  ;;  %v2952_v46 = vmax.f32 %v2424_v17, 0.0  ;;  %v2317_v50 = vadd.f32 %v2316_v5, %v5655_v28  ;;  %v2107_v28 = vadd.f32 %v5682_v43, %v5612_v35 }
 0x194   :  { %v2318_v29 = vpop.f32.mrf.mxu0  ;;  %v2218_v19 = vadd.f32 %v5678_v37, %v2105_v63 }
 0x195   :  { %v2431_v25 = vpop.f32.mrf.mxu1  ;;  %v2953_v34 = vmax.f32 %v2426_v7, 0.0  ;;  %v2319_v41 = vadd.f32 %v2318_v29, %v5662_v32  ;;  %v3008_v48 = vpack.c.bf16 %v2952_v46, %v2948_v54  ;;  %v2430_v32 = vadd.f32 %v2429_v52, %v2317_v50 }
 0x196   :  { %v2320_v45 = vpop.f32.mrf.mxu0  ;;  %v2220_v36 = vadd.f32 %v5684_v18, %v2107_v28 }
 0x197   :  { %v2433_v14 = vpop.f32.mrf.mxu1  ;;  %v2321_v58 = vadd.f32 %v2320_v45, %v2208_v23  ;;  %v3009_v21 = vpack.c.bf16 %v2953_v34, %v2949_v0  ;;  %v2432_v27 = vadd.f32 %v2431_v25, %v2319_v41  ;;  %v2956_v49 = vmax.f32 %v2430_v32, 0.0 }
 0x198   :  { %v2322_v12 = vpop.f32.mrf.mxu0  ;;  %v2115_v23 = vadd.f32 %v5694_v55, %v5607_v22 }
 0x199   :  { %v2435_v40 = vpop.f32.mrf.mxu1  ;;  %v2434_v6 = vadd.f32 %v2433_v14, %v2321_v58  ;;  %v2323_v15 = vadd.f32 %v2322_v12, %v2210_v56  ;;  %3474 = vmatprep.mubr.bf16.mxu0 %v3009_v21  ;;  %v2957_v51 = vmax.f32 %v2432_v27, 0.0 }
 0x19a   :  { %v2326_v20 = vpop.f32.mrf.mxu0  ;;  %3475 = vmatmul.mubr.bf16.gmra.mxu0 %v3008_v48  ;;  %v2228_v56 = vadd.f32 %v5696_v42, %v2115_v23  ;;  %v2135_v23 = vadd.f32 %v5730_v2, %v5607_v22 }
 0x19b   :  { %v2439_v44 = vpop.f32.mrf.mxu1  ;;  %v2436_v33 = vadd.f32 %v2435_v40, %v2323_v15  ;;  %v2960_v24 = vmax.f32 %v2434_v6, 0.0  ;;  %v2327_v47 = vadd.f32 %v2326_v20, %v5673_v39  ;;  %v2117_v39 = vadd.f32 %v5700_v8, %v5612_v35 }
 0x19c   :  { %v2328_v60 = vpop.f32.mrf.mxu0 }
 0x19d   :  { %v2441_v16 = vpop.f32.mrf.mxu1  ;;  %v2961_v17 = vmax.f32 %v2436_v33, 0.0  ;;  %v2329_v26 = vadd.f32 %v2328_v60, %v5680_v38  ;;  %v3012_v43 = vpack.c.bf16 %v2960_v24, %v2956_v49  ;;  %v2440_v38 = vadd.f32 %v2439_v44, %v2327_v47 }
 0x19e   :  { %v2330_v5 = vpop.f32.mrf.mxu0  ;;  %v2230_v27 = vadd.f32 %v5702_v11, %v2117_v39  ;;  %v2125_v44 = vadd.f32 %v5712_v1, %v5607_v22 }
 0x19f   :  { %v2443_v52 = vpop.f32.mrf.mxu1  ;;  %v2331_v7 = vadd.f32 %v2330_v5, %v2218_v19  ;;  %v3013_v46 = vpack.c.bf16 %v2961_v17, %v2957_v51  ;;  %v2442_v37 = vadd.f32 %v2441_v16, %v2329_v26  ;;  %v2964_v48 = vmax.f32 %v2440_v38, 0.0 }
 0x1a0   :  { %v2332_v29 = vpop.f32.mrf.mxu0  ;;  %v2238_v17 = vadd.f32 %v5714_v53, %v2125_v44 }
 0x1a1   :  { %v2445_v25 = vpop.f32.mrf.mxu1  ;;  %v2444_v0 = vadd.f32 %v2443_v52, %v2331_v7  ;;  %v2333_v34 = vadd.f32 %v2332_v29, %v2220_v36  ;;  %3484 = vmatprep.mubr.bf16.mxu0 %v3013_v46  ;;  %v2965_v58 = vmax.f32 %v2442_v37, 0.0 }
 0x1a2   :  { %v2336_v41 = vpop.f32.mrf.mxu0  ;;  %3485 = vmatmul.mubr.bf16.gmra.mxu0 %v3012_v43 }
 0x1a3   :  { %v2449_v54 = vpop.f32.mrf.mxu1  ;;  %v2446_v18 = vadd.f32 %v2445_v25, %v2333_v34  ;;  %v2968_v50 = vmax.f32 %v2444_v0, 0.0  ;;  %v2337_v12 = vadd.f32 %v2336_v41, %v5691_v9  ;;  %v2127_v9 = vadd.f32 %v5718_v31, %v5612_v35 }
 0x1a4   :  { %v2338_v45 = vpop.f32.mrf.mxu0 }
 0x1a5   :  { %v2451_v14 = vpop.f32.mrf.mxu1  ;;  %v2969_v21 = vmax.f32 %v2446_v18, 0.0  ;;  %v2339_v55 = vadd.f32 %v2338_v45, %v5698_v4  ;;  %v3016_v8 = vpack.c.bf16 %v2968_v50, %v2964_v48  ;;  %v2450_v4 = vadd.f32 %v2449_v54, %v2337_v12 }
 0x1a6   :  { %v2340_v40 = vpop.f32.mrf.mxu0  ;;  %v2240_v7 = vadd.f32 %v5720_v61, %v2127_v9  ;;  %v2248_v18 = vadd.f32 %v5732_v3, %v2135_v23 }
 0x1a7   :  { %v2453_v63 = vpop.f32.mrf.mxu1  ;;  %v2341_v6 = vadd.f32 %v2340_v40, %v2228_v56  ;;  %v3017_v15 = vpack.c.bf16 %v2969_v21, %v2965_v58  ;;  %v2452_v42 = vadd.f32 %v2451_v14, %v2339_v55  ;;  %v2972_v47 = vmax.f32 %v2450_v4, 0.0 }
 0x1a8   :  { %v2342_v32 = vpop.f32.mrf.mxu0 }
 0x1a9   :  { %v2455_v20 = vpop.f32.mrf.mxu1  ;;  %v2454_v28 = vadd.f32 %v2453_v63, %v2341_v6  ;;  %v2343_v33 = vadd.f32 %v2342_v32, %v2230_v27  ;;  %3494 = vmatprep.mubr.bf16.mxu0 %v3017_v15  ;;  %v2973_v26 = vmax.f32 %v2452_v42, 0.0  ;;  %v6300_v27 = vld [vmem:[#allocation17_spill] sm:$0xff]  ;;  %v6302_v42 = vld [vmem:[#allocation31_spill] sm:$0xff] }
 0x1aa   :  { %v2346_v24 = vpop.f32.mrf.mxu0  ;;  %3495 = vmatmul.mubr.bf16.gmra.mxu0 %v3016_v8  ;;  %v2145_v6 = vadd.f32 %v6300_v27, %v5607_v22  ;;  %v6303_v22 = vld [vmem:[#allocation18_spill] sm:$0xff] }
 0x1ab   :  { %v2459_v60 = vpop.f32.mrf.mxu1  ;;  %v2456_v11 = vadd.f32 %v2455_v20, %v2343_v33  ;;  %v2976_v16 = vmax.f32 %v2454_v28, 0.0  ;;  %v2347_v5 = vadd.f32 %v2346_v24, %v5709_v59  ;;  %v2137_v59 = vadd.f32 %v5736_v13, %v5612_v35 }
 0x1ac   :  { %v2348_v19 = vpop.f32.mrf.mxu0  ;;  %v426_v28 = vsub.s32 2, %v6302_v42  ;;  %v2258_v9 = vadd.f32 %v6303_v22, %v2145_v6 }
 0x1ad   :  { %v2461_v51 = vpop.f32.mrf.mxu1  ;;  %v2977_v49 = vmax.f32 %v2456_v11, 0.0  ;;  %v2349_v1 = vadd.f32 %v2348_v19, %v5716_v30  ;;  %v3020_v31 = vpack.c.bf16 %v2976_v16, %v2972_v47  ;;  %v2460_v30 = vadd.f32 %v2459_v60, %v2347_v5  ;;  %v6304_v19 = vld [vmem:[#allocation19_spill] sm:$0xff] }
 0x1ae   :  { %v2350_v52 = vpop.f32.mrf.mxu0  ;;  %v2250_v55 = vadd.f32 %v5738_v62, %v2137_v59  ;;  %v430_v60 = vsub.s32 3, %v6302_v42 }
 0x1af   :  { %v2463_v36 = vpop.f32.mrf.mxu1  ;;  %v2351_v46 = vadd.f32 %v2350_v52, %v2238_v17  ;;  %v3021_v43 = vpack.c.bf16 %v2977_v49, %v2973_v26  ;;  %v2462_v53 = vadd.f32 %v2461_v51, %v2349_v1  ;;  %v2980_v14 = vmax.f32 %v2460_v30, 0.0  ;;  %v6305_v26 = vld [vmem:[#allocation16_spill] sm:$0xff] }
 0x1b0   :  { %v2352_v29 = vpop.f32.mrf.mxu0 }
 0x1b1   :  { %v2465_v25 = vpop.f32.mrf.mxu1  ;;  %v2464_v37 = vadd.f32 %v2463_v36, %v2351_v46  ;;  %v2353_v0 = vadd.f32 %v2352_v29, %v2240_v7  ;;  %3504 = vmatprep.mubr.bf16.mxu0 %v3021_v43  ;;  %v2981_v50 = vmax.f32 %v2462_v53, 0.0  ;;  %v6307_v7 = vld [vmem:[#allocation32_spill] sm:$0xff] }
 0x1b2   :  { %v2356_v34 = vpop.f32.mrf.mxu0  ;;  %3505 = vmatmul.mubr.bf16.gmra.mxu0 %v3020_v31  ;;  %v5823_v46 = vrot.slane %v6307_v7, %v426_v28 }
 0x1b3   :  { %v2469_v38 = vpop.f32.mrf.mxu1  ;;  %v2466_v61 = vadd.f32 %v2465_v25, %v2353_v0  ;;  %v2984_v41 = vmax.f32 %v2464_v37, 0.0  ;;  %v2357_v56 = vadd.f32 %v2356_v34, %v5727_v57  ;;  %v6301_v57 = vld [vmem:[#allocation20_spill] sm:$0xff]  ;;  %v5826_v37 = vrot.slane %v6307_v7, %v430_v60 }
 0x1b4   :  { %v2358_v54 = vpop.f32.mrf.mxu0  ;;  %v2147_v44 = vadd.f32 %v6301_v57, %v5612_v35  ;;  %v6306_v35 = vld [vmem:[#allocation21_spill] sm:$0xff] }
 0x1b5   :  { %v2471_v39 = vpop.f32.mrf.mxu1  ;;  %v2985_v45 = vmax.f32 %v2466_v61, 0.0  ;;  %v2359_v2 = vadd.f32 %v2358_v54, %v5734_v10  ;;  %v3024_v13 = vpack.c.bf16 %v2984_v41, %v2980_v14  ;;  %v2470_v10 = vadd.f32 %v2469_v38, %v2357_v56 }
 0x1b6   :  { %v2360_v58 = vpop.f32.mrf.mxu0  ;;  %v2260_v5 = vadd.f32 %v6306_v35, %v2147_v44 }
 0x1b7   :  { %v2473_v21 = vpop.f32.mrf.mxu1  ;;  %v2361_v48 = vadd.f32 %v2360_v58, %v2248_v18  ;;  %v3025_v12 = vpack.c.bf16 %v2985_v45, %v2981_v50  ;;  %v2472_v3 = vadd.f32 %v2471_v39, %v2359_v2  ;;  %v2988_v17 = vmax.f32 %v2470_v10, 0.0 }
 0x1b8   :  { %v2362_v40 = vpop.f32.mrf.mxu0 }
 0x1b9   :  { %v2475_v63 = vpop.f32.mrf.mxu1  ;;  %v2474_v15 = vadd.f32 %v2473_v21, %v2361_v48  ;;  %v2363_v8 = vadd.f32 %v2362_v40, %v2250_v55  ;;  %3514 = vmatprep.mubr.bf16.mxu0 %v3025_v12  ;;  %v2989_v11 = vmax.f32 %v2472_v3, 0.0 }
 0x1ba   :  { %v2366_v32 = vpop.f32.mrf.mxu0  ;;  %3515 = vmatmul.mubr.bf16.gmra.mxu0 %v3024_v13 }
 0x1bb   :  { %v2479_v20 = vpop.f32.mrf.mxu1  ;;  %v2476_v62 = vadd.f32 %v2475_v63, %v2363_v8  ;;  %v2992_v33 = vmax.f32 %v2474_v15, 0.0  ;;  %v2367_v49 = vadd.f32 %v2366_v32, %v6305_v26 }
 0x1bc   :  { %v2368_v4 = vpop.f32.mrf.mxu0 }
 0x1bd   :  { %v2481_v24 = vpop.f32.mrf.mxu1  ;;  %v2993_v16 = vmax.f32 %v2476_v62, 0.0  ;;  %v2369_v51 = vadd.f32 %v2368_v4, %v6304_v19  ;;  %v3028_v43 = vpack.c.bf16 %v2992_v33, %v2988_v17  ;;  %v2480_v0 = vadd.f32 %v2479_v20, %v2367_v49 }
 0x1be   :  { %v2370_v1 = vpop.f32.mrf.mxu0 }
 0x1bf   :  { %v2483_v47 = vpop.f32.mrf.mxu1  ;;  %v2371_v52 = vadd.f32 %v2370_v1, %v2258_v9  ;;  %v3029_v36 = vpack.c.bf16 %v2993_v16, %v2989_v11  ;;  %v2482_v25 = vadd.f32 %v2481_v24, %v2369_v51  ;;  %v2996_v2 = vmax.f32 %v2480_v0, 0.0 }
 0x1c0   :  { %v2372_v31 = vpop.f32.mrf.mxu0 }
 0x1c1   :  { %v2485_v29 = vpop.f32.mrf.mxu1  ;;  %v2484_v23 = vadd.f32 %v2483_v47, %v2371_v52  ;;  %v2373_v53 = vadd.f32 %v2372_v31, %v2260_v5  ;;  %3524 = vmatprep.mubr.bf16.mxu0 %v3029_v36  ;;  %v2997_v39 = vmax.f32 %v2482_v25, 0.0 }
 0x1c2   :  { %v2522_v30 = vpop.f32.mrf.mxu0  ;;  %3525 = vmatmul.mubr.bf16.gmra.mxu0 %v3028_v43 }
 0x1c3   :  { %v2635_v34 = vpop.f32.mrf.mxu1  ;;  %v2486_v38 = vadd.f32 %v2485_v29, %v2373_v53  ;;  %v2523_v59 = vadd.f32 %v2522_v30, %v5823_v46  ;;  %v3000_v61 = vmax.f32 %v2484_v23, 0.0 }
 0x1c4   :  { %v2524_v41 = vpop.f32.mrf.mxu0 }
 0x1c5   :  { %v2637_v54 = vpop.f32.mrf.mxu1  ;;  %v3001_v18 = vmax.f32 %v2486_v38, 0.0  ;;  %v5829_v50 = vadd.f32 %v2635_v34, %v2523_v59  ;;  %v2525_v45 = vadd.f32 %v2524_v41, %v5826_v37  ;;  %v3032_v55 = vpack.c.bf16 %v3000_v61, %v2996_v2 }
 0x1c6   :  { %v5832_v14 = vpop.f32.mrf.mxu0 }
 0x1c7   :  { %v5834_v56 = vpop.f32.mrf.mxu1  ;;  %v5836_v58 = vadd.f32 %v2637_v54, %v2525_v45  ;;  %v3033_v21 = vpack.c.bf16 %v3001_v18, %v2997_v39 }
 0x1c8   :  { %v5838_v48 = vpop.f32.mrf.mxu0 }
 0x1c9   :  { %v5840_v12 = vpop.f32.mrf.mxu1  ;;  %3534 = vmatprep.mubr.bf16.mxu0 %v3033_v21 }
 0x1ca   :  { %v2532_v13 = vpop.f32.mrf.mxu0  ;;  %3535 = vmatmul.mubr.bf16.gmra.mxu0 %v3032_v55 }
 0x1cb   :  { %v2645_v40 = vpop.f32.mrf.mxu1  ;;  %v2533_v63 = vadd.f32 %v2532_v13, %v5823_v46 }
 0x1cc   :  { %v2534_v27 = vpop.f32.mrf.mxu0 }
 0x1cd   :  { %v2647_v6 = vpop.f32.mrf.mxu1  ;;  %v5843_v3 = vadd.f32 %v2645_v40, %v2533_v63  ;;  %v2535_v15 = vadd.f32 %v2534_v27, %v5826_v37 }
 0x1ce   :  { %v5846_v8 = vpop.f32.mrf.mxu0 }
 0x1cf   :  { %v5848_v10 = vpop.f32.mrf.mxu1  ;;  %v5850_v32 = vadd.f32 %v2647_v6, %v2535_v15 }
 0x1d0   :  { %v5852_v20 = vpop.f32.mrf.mxu0 }
 0x1d1   :  { %v5854_v57 = vpop.f32.mrf.mxu1 }
 0x1d2   :  { %v2542_v44 = vpop.f32.mrf.mxu0 }
 0x1d3   :  { %v2655_v62 = vpop.f32.mrf.mxu1  ;;  %v2543_v28 = vadd.f32 %v2542_v44, %v5823_v46 }
 0x1d4   :  { %v2544_v33 = vpop.f32.mrf.mxu0 }
 0x1d5   :  { %v2657_v4 = vpop.f32.mrf.mxu1  ;;  %v5857_v24 = vadd.f32 %v2655_v62, %v2543_v28  ;;  %v2545_v60 = vadd.f32 %v2544_v33, %v5826_v37 }
 0x1d6   :  { %v5860_v22 = vpop.f32.mrf.mxu0 }
 0x1d7   :  { %v5862_v9 = vpop.f32.mrf.mxu1  ;;  %v5864_v11 = vadd.f32 %v2657_v4, %v2545_v60 }
 0x1d8   :  { %v5866_v16 = vpop.f32.mrf.mxu0 }
 0x1d9   :  { %v5868_v19 = vpop.f32.mrf.mxu1 }
 0x1da   :  { %v2552_v51 = vpop.f32.mrf.mxu0 }
 0x1db   :  { %v2665_v17 = vpop.f32.mrf.mxu1  ;;  %v2553_v26 = vadd.f32 %v2552_v51, %v5823_v46 }
 0x1dc   :  { %v2554_v49 = vpop.f32.mrf.mxu0 }
 0x1dd   :  { %v2667_v1 = vpop.f32.mrf.mxu1  ;;  %v5871_v47 = vadd.f32 %v2665_v17, %v2553_v26  ;;  %v2555_v35 = vadd.f32 %v2554_v49, %v5826_v37 }
 0x1de   :  { %v5874_v5 = vpop.f32.mrf.mxu0 }
 0x1df   :  { %v5876_v52 = vpop.f32.mrf.mxu1  ;;  %v5878_v36 = vadd.f32 %v2667_v1, %v2555_v35 }
 0x1e0   :  { %v5880_v7 = vpop.f32.mrf.mxu0 }
 0x1e1   :  { %v5882_v43 = vpop.f32.mrf.mxu1 }
 0x1e2   :  { %v2562_v31 = vpop.f32.mrf.mxu0 }
 0x1e3   :  { %v2675_v29 = vpop.f32.mrf.mxu1  ;;  %v2563_v25 = vadd.f32 %v2562_v31, %v5823_v46 }
 0x1e4   :  { %v2564_v23 = vpop.f32.mrf.mxu0 }
 0x1e5   :  { %v2677_v53 = vpop.f32.mrf.mxu1  ;;  %v5885_v0 = vadd.f32 %v2675_v29, %v2563_v25  ;;  %v2565_v30 = vadd.f32 %v2564_v23, %v5826_v37 }
 0x1e6   :  { %v5888_v34 = vpop.f32.mrf.mxu0 }
 0x1e7   :  { %v5890_v38 = vpop.f32.mrf.mxu1  ;;  %v5892_v59 = vadd.f32 %v2677_v53, %v2565_v30 }
 0x1e8   :  { %v5894_v61 = vpop.f32.mrf.mxu0 }
 0x1e9   :  { %v5896_v41 = vpop.f32.mrf.mxu1 }
 0x1ea   :  { %v2572_v54 = vpop.f32.mrf.mxu0 }
 0x1eb   :  { %v2685_v39 = vpop.f32.mrf.mxu1  ;;  %v2573_v18 = vadd.f32 %v2572_v54, %v5823_v46 }
 0x1ec   :  { %v2574_v45 = vpop.f32.mrf.mxu0 }
 0x1ed   :  { %v2687_v2 = vpop.f32.mrf.mxu1  ;;  %v5899_v21 = vadd.f32 %v2685_v39, %v2573_v18  ;;  %v2575_v55 = vadd.f32 %v2574_v45, %v5826_v37 }
 0x1ee   :  { %v5902_v13 = vpop.f32.mrf.mxu0 }
 0x1ef   :  { %v5904_v40 = vpop.f32.mrf.mxu1  ;;  %v5906_v63 = vadd.f32 %v2687_v2, %v2575_v55  ;;  %v2527_v55 = vadd.f32 %v5832_v14, %v5823_v46 }
 0x1f0   :  { %v5908_v27 = vpop.f32.mrf.mxu0 }
 0x1f1   :  { %v5910_v6 = vpop.f32.mrf.mxu1 }
 0x1f2   :  { %v2582_v15 = vpop.f32.mrf.mxu0 }
 0x1f3   :  { %v2695_v44 = vpop.f32.mrf.mxu1  ;;  %v2583_v62 = vadd.f32 %v2582_v15, %v5823_v46 }
 0x1f4   :  { %v2584_v28 = vpop.f32.mrf.mxu0 }
 0x1f5   :  { %v2697_v33 = vpop.f32.mrf.mxu1  ;;  %v5913_v4 = vadd.f32 %v2695_v44, %v2583_v62  ;;  %v2585_v60 = vadd.f32 %v2584_v28, %v5826_v37  ;;  %v2529_v62 = vadd.f32 %v5838_v48, %v5826_v37 }
 0x1f6   :  { %v5916_v51 = vpop.f32.mrf.mxu0 }
 0x1f7   :  { %v5918_v17 = vpop.f32.mrf.mxu1  ;;  %v5920_v26 = vadd.f32 %v2697_v33, %v2585_v60  ;;  %v2640_v60 = vadd.f32 %v5834_v56, %v2527_v55 }
 0x1f8   :  { %v5922_v49 = vpop.f32.mrf.mxu0 }
 0x1f9   :  { %v5924_v1 = vpop.f32.mrf.mxu1 }
 0x1fa   :  { %v2592_v35 = vpop.f32.mrf.mxu0 }
 0x1fb   :  { %v2705_v31 = vpop.f32.mrf.mxu1  ;;  %v2593_v29 = vadd.f32 %v2592_v35, %v5823_v46 }
 0x1fc   :  { %v2594_v25 = vpop.f32.mrf.mxu0 }
 0x1fd   :  { %v2707_v23 = vpop.f32.mrf.mxu1  ;;  %v5927_v53 = vadd.f32 %v2705_v31, %v2593_v29  ;;  %v2595_v30 = vadd.f32 %v2594_v25, %v5826_v37 }
 0x1fe   :  { %v5930_v54 = vpop.f32.mrf.mxu0 }
 0x1ff   :  { %6308 = vst [vmem:[#allocation22_spill] sm:$0xff] %v5927_v53  ;;  %v5932_v39 = vpop.f32.mrf.mxu1  ;;  %v5934_v18 = vadd.f32 %v2707_v23, %v2595_v30  ;;  %v2642_v23 = vadd.f32 %v5840_v12, %v2529_v62 }
 0x200   :  { %6309 = vst [vmem:[#allocation23_spill] sm:$0xff] %v5932_v39  ;;  %v5936_v45 = vpop.f32.mrf.mxu0 }
 0x201   :  { %6310 = vst [vmem:[#allocation24_spill] sm:$0xff] %v5934_v18  ;;  %6311 = vst [vmem:[#allocation25_spill] sm:$0xff] %v5936_v45  ;;  %v5938_v2 = vpop.f32.mrf.mxu1 }
 0x202   :  { %6312 = vst [vmem:[#allocation26_spill] sm:$0xff] %v5938_v2  ;;  %v2748_v15 = vpop.f32.mrf.mxu0  ;;  %v2537_v2 = vadd.f32 %v5846_v8, %v5823_v46 }
 0x203   :  { %v2861_v44 = vpop.f32.mrf.mxu1  ;;  %v2749_v31 = vadd.f32 %v2748_v15, %v5829_v50 }
 0x204   :  { %v2750_v28 = vpop.f32.mrf.mxu0  ;;  %v2650_v12 = vadd.f32 %v5848_v10, %v2537_v2 }
 0x205   :  { %v2863_v33 = vpop.f32.mrf.mxu1  ;;  %v2751_v35 = vadd.f32 %v2750_v28, %v5836_v58  ;;  %v2862_v39 = vadd.f32 %v2861_v44, %v2749_v31  ;;  %v2539_v58 = vadd.f32 %v5852_v20, %v5826_v37 }
 0x206   :  { %v2752_v29 = vpop.f32.mrf.mxu0 }
 0x207   :  { %v2865_v25 = vpop.f32.mrf.mxu1  ;;  %v2753_v30 = vadd.f32 %v2752_v29, %v2640_v60  ;;  %v2864_v53 = vadd.f32 %v2863_v33, %v2751_v35  ;;  %v2942_v8 = vmax.f32 %v2862_v39, 0.0  ;;  %v2652_v35 = vadd.f32 %v5854_v57, %v2539_v58  ;;  %v5093_v39 = vld [vmem:[#allocation10 + $0x38] sm:$0xff]  }
 0x208   :  { %v2754_v42 = vpop.f32.mrf.mxu0  ;;  %v2549_v57 = vadd.f32 %v5866_v16, %v5826_v37 }
 0x209   :  { %v2867_v14 = vpop.f32.mrf.mxu1  ;;  %v2866_v48 = vadd.f32 %v2865_v25, %v2753_v30  ;;  %v2755_v18 = vadd.f32 %v2754_v42, %v2642_v23  ;;  %v2943_v62 = vmax.f32 %v2864_v53, 0.0  ;;  %v2547_v30 = vadd.f32 %v5860_v22, %v5823_v46 }
 0x20a   :  { %v2758_v45 = vpop.f32.mrf.mxu0 }
 0x20b   :  { %v2871_v56 = vpop.f32.mrf.mxu1  ;;  %v2868_v50 = vadd.f32 %v2867_v14, %v2755_v18  ;;  %v2946_v55 = vmax.f32 %v2866_v48, 0.0  ;;  %v2759_v33 = vadd.f32 %v2758_v45, %v5843_v3  ;;  %v5094_v14 = vld [vmem:[#allocation10 + $0x70] sm:$0xff]  }
 0x20c   :  { %v2760_v15 = vpop.f32.mrf.mxu0 }
 0x20d   :  { %v2873_v28 = vpop.f32.mrf.mxu1  ;;  %v2947_v60 = vmax.f32 %v2868_v50, 0.0  ;;  %v2761_v29 = vadd.f32 %v2760_v15, %v5850_v32  ;;  %v3006_v20 = vpack.c.bf16 %v2946_v55, %v2942_v8  ;;  %v5092_v32 = vld [vmem:[#allocation10 + $0x78] sm:$0xff]   ;;  %v2872_v3 = vadd.f32 %v2871_v56, %v2759_v33  ;;  %v5095_v15 = vld [vmem:[#allocation10 + $0x30] sm:$0xff]  }
 0x20e   :  { %v2762_v42 = vpop.f32.mrf.mxu0  ;;  %4518 = vmatprep.subr.bf16.mxu0 %v5092_v32  ;;  %4582 = vmatprep.subr.bf16.mxu1 %v5092_v32 }
 0x20f   :  { %v2875_v44 = vpop.f32.mrf.mxu1  ;;  %v3007_v31 = vpack.c.bf16 %v2947_v60, %v2943_v62  ;;  %v2763_v25 = vadd.f32 %v2762_v42, %v2650_v12  ;;  %v2874_v10 = vadd.f32 %v2873_v28, %v2761_v29  ;;  %4519 = vmatpush3.bf16.msra.mxu0 %v5093_v39  ;;  %v2660_v28 = vadd.f32 %v5862_v9, %v2547_v30  ;;  %v5096_v60 = vld [vmem:[#allocation10 + $0x68] sm:$0xff]  }
 0x210   :  { %v2764_v18 = vpop.f32.mrf.mxu0  ;;  %4520 = vmatprep.subr.bf16.mxu0 %v5094_v14  ;;  %v2950_v29 = vmax.f32 %v2872_v3, 0.0  ;;  %v2662_v42 = vadd.f32 %v5868_v19, %v2549_v57  ;;  %v5099_v3 = vld [vmem:[#allocation10 + $0x20] sm:$0xff]  }
 0x211   :  { %v2877_v23 = vpop.f32.mrf.mxu1  ;;  %v2876_v53 = vadd.f32 %v2875_v44, %v2763_v25  ;;  %v2765_v2 = vadd.f32 %v2764_v18, %v2652_v35  ;;  %3577 = vmatprep.mubr.bf16.mxu1 %v3007_v31  ;;  %v2951_v12 = vmax.f32 %v2874_v10, 0.0  ;;  %v2557_v31 = vadd.f32 %v5874_v5, %v5823_v46 }
 0x212   :  { %v2768_v45 = vpop.f32.mrf.mxu0  ;;  %3578 = vmatmul.mubr.bf16.vlgmr.msra.gmra.mxu1 %v3006_v20  ;;  %v2559_v5 = vadd.f32 %v5880_v7, %v5826_v37 }
 0x213   :  { %v2881_v48 = vpop.f32.mrf.mxu1  ;;  %v2878_v58 = vadd.f32 %v2877_v23, %v2765_v2  ;;  %v2954_v50 = vmax.f32 %v2876_v53, 0.0  ;;  %4590 = vmatpush3.bf16.msra.mxu1 %v5093_v39  ;;  %v2769_v16 = vadd.f32 %v2768_v45, %v5857_v24  ;;  %4521 = vmatpush3.bf16.msra.mxu0 %v5095_v15  ;;  %v5098_v24 = vld [vmem:[#allocation10 + $0x60] sm:$0xff]   ;;  %v2670_v45 = vadd.f32 %v5876_v52, %v2557_v31 }
 0x214   :  { %v2770_v55 = vpop.f32.mrf.mxu0  ;;  %4583 = vmatprep.subr.bf16.mxu1 %v5094_v14  ;;  %4522 = vmatprep.subr.bf16.mxu0 %v5096_v60 }
 0x215   :  { %v2883_v22 = vpop.f32.mrf.mxu1  ;;  %v2955_v62 = vmax.f32 %v2878_v58, 0.0  ;;  %v2771_v56 = vadd.f32 %v2770_v55, %v5864_v11  ;;  %v3010_v9 = vpack.c.bf16 %v2954_v50, %v2950_v29  ;;  %v5097_v11 = vld [vmem:[#allocation10 + $0x28] sm:$0xff]   ;;  %v2882_v10 = vadd.f32 %v2881_v48, %v2769_v16  ;;  %v5100_v50 = vld [vmem:[#allocation10 + $0x58] sm:$0xff]  }
 0x216   :  { %v2772_v8 = vpop.f32.mrf.mxu0 }
 0x217   :  { %v2885_v33 = vpop.f32.mrf.mxu1  ;;  %v3011_v44 = vpack.c.bf16 %v2955_v62, %v2951_v12  ;;  %v2773_v35 = vadd.f32 %v2772_v8, %v2660_v28  ;;  %4591 = vmatpush3.bf16.msra.mxu1 %v5095_v15  ;;  %v2884_v18 = vadd.f32 %v2883_v22, %v2771_v56  ;;  %4523 = vmatpush3.bf16.msra.mxu0 %v5097_v11  ;;  %v2958_v55 = vmax.f32 %v2882_v10, 0.0 }
 0x218   :  { %v2774_v25 = vpop.f32.mrf.mxu0  ;;  %4584 = vmatprep.subr.bf16.mxu1 %v5096_v60  ;;  %4524 = vmatprep.subr.bf16.mxu0 %v5098_v24  ;;  %v2672_v28 = vadd.f32 %v5882_v43, %v2559_v5  ;;  %v2567_v56 = vadd.f32 %v5888_v34, %v5823_v46  ;;  %v2569_v43 = vadd.f32 %v5894_v61, %v5826_v37 }
 0x219   :  { %v2887_v20 = vpop.f32.mrf.mxu1  ;;  %v2886_v23 = vadd.f32 %v2885_v33, %v2773_v35  ;;  %v2775_v30 = vadd.f32 %v2774_v25, %v2662_v42  ;;  %3587 = vmatprep.mubr.bf16.mxu1 %v3011_v44  ;;  %v2959_v57 = vmax.f32 %v2884_v18, 0.0 }
 0x21a   :  { %v2778_v53 = vpop.f32.mrf.mxu0  ;;  %3588 = vmatmul.mubr.bf16.gmra.mxu1 %v3010_v9  ;;  %v2680_v25 = vadd.f32 %v5890_v38, %v2567_v56 }
 0x21b   :  { %v2891_v19 = vpop.f32.mrf.mxu1  ;;  %v2888_v2 = vadd.f32 %v2887_v20, %v2775_v30  ;;  %v2962_v32 = vmax.f32 %v2886_v23, 0.0  ;;  %4592 = vmatpush3.bf16.msra.mxu1 %v5097_v11  ;;  %v2779_v22 = vadd.f32 %v2778_v53, %v5871_v47  ;;  %4525 = vmatpush3.bf16.msra.mxu0 %v5099_v3  ;;  %v2682_v53 = vadd.f32 %v5896_v41, %v2569_v43 }
 0x21c   :  { %v2780_v39 = vpop.f32.mrf.mxu0  ;;  %4585 = vmatprep.subr.bf16.mxu1 %v5098_v24  ;;  %4526 = vmatprep.subr.bf16.mxu0 %v5100_v50 }
 0x21d   :  { %v2893_v14 = vpop.f32.mrf.mxu1  ;;  %v2963_v58 = vmax.f32 %v2888_v2, 0.0  ;;  %v2781_v48 = vadd.f32 %v2780_v39, %v5878_v36  ;;  %v3014_v52 = vpack.c.bf16 %v2962_v32, %v2958_v55  ;;  %v5101_v36 = vld [vmem:[#allocation10 + $0x18] sm:$0xff]   ;;  %v2892_v47 = vadd.f32 %v2891_v19, %v2779_v22 }
 0x21e   :  { %v2782_v7 = vpop.f32.mrf.mxu0  ;;  %v2577_v39 = vadd.f32 %v5902_v13, %v5823_v46 }
 0x21f   :  { %v2895_v15 = vpop.f32.mrf.mxu1  ;;  %v3015_v12 = vpack.c.bf16 %v2963_v58, %v2959_v57  ;;  %v2783_v62 = vadd.f32 %v2782_v7, %v2670_v45  ;;  %4593 = vmatpush3.bf16.msra.mxu1 %v5099_v3  ;;  %v2894_v16 = vadd.f32 %v2893_v14, %v2781_v48  ;;  %4527 = vmatpush3.bf16.msra.mxu0 %v5101_v36  ;;  %v2966_v23 = vmax.f32 %v2892_v47, 0.0 }
 0x220   :  { %v2784_v60 = vpop.f32.mrf.mxu0  ;;  %4586 = vmatprep.subr.bf16.mxu1 %v5100_v50  ;;  %v2690_v55 = vadd.f32 %v5904_v40, %v2577_v39 }
 0x221   :  { %v2897_v29 = vpop.f32.mrf.mxu1  ;;  %v2896_v8 = vadd.f32 %v2895_v15, %v2783_v62  ;;  %v2785_v33 = vadd.f32 %v2784_v60, %v2672_v28  ;;  %3597 = vmatprep.mubr.bf16.mxu1 %v3015_v12  ;;  %v2967_v20 = vmax.f32 %v2894_v16, 0.0  ;;  %v2587_v16 = vadd.f32 %v5916_v51, %v5823_v46 }
 0x222   :  { %v2788_v42 = vpop.f32.mrf.mxu0  ;;  %3598 = vmatmul.mubr.bf16.gmra.mxu1 %v3014_v52 }
 0x223   :  { %v2901_v44 = vpop.f32.mrf.mxu1  ;;  %v2898_v34 = vadd.f32 %v2897_v29, %v2785_v33  ;;  %v2970_v35 = vmax.f32 %v2896_v8, 0.0  ;;  %4594 = vmatpush3.bf16.msra.mxu1 %v5101_v36  ;;  %v2789_v30 = vadd.f32 %v2788_v42, %v5885_v0  ;;  %v2579_v0 = vadd.f32 %v5908_v27, %v5826_v37 }
 0x224   :  { %v2790_v31 = vpop.f32.mrf.mxu0 }
 0x225   :  { %v2903_v9 = vpop.f32.mrf.mxu1  ;;  %v2971_v11 = vmax.f32 %v2898_v34, 0.0  ;;  %v2791_v18 = vadd.f32 %v2790_v31, %v5892_v59  ;;  %v3018_v5 = vpack.c.bf16 %v2970_v35, %v2966_v23  ;;  %v2902_v59 = vadd.f32 %v2901_v44, %v2789_v30 }
 0x226   :  { %v2792_v24 = vpop.f32.mrf.mxu0  ;;  %v2692_v56 = vadd.f32 %v5910_v6, %v2579_v0  ;;  %v2700_v35 = vadd.f32 %v5918_v17, %v2587_v16 }
 0x227   :  { %v2905_v10 = vpop.f32.mrf.mxu1  ;;  %v3019_v61 = vpack.c.bf16 %v2971_v11, %v2967_v20  ;;  %v2793_v19 = vadd.f32 %v2792_v24, %v2680_v25  ;;  %v2904_v38 = vadd.f32 %v2903_v9, %v2791_v18  ;;  %v2974_v15 = vmax.f32 %v2902_v59, 0.0  ;;  %v6314_v59 = vld [vmem:[#allocation23_spill] sm:$0xff] }
 0x228   :  { %v2794_v2 = vpop.f32.mrf.mxu0 }
 0x229   :  { %v2907_v32 = vpop.f32.mrf.mxu1  ;;  %v2906_v14 = vadd.f32 %v2905_v10, %v2793_v19  ;;  %v2795_v3 = vadd.f32 %v2794_v2, %v2682_v53  ;;  %3607 = vmatprep.mubr.bf16.mxu1 %v3019_v61  ;;  %v2975_v22 = vmax.f32 %v2904_v38, 0.0  ;;  %v2597_v61 = vadd.f32 %v5930_v54, %v5823_v46  ;;  %v6315_v46 = vld [vmem:[#allocation24_spill] sm:$0xff] }
 0x22a   :  { %v2798_v45 = vpop.f32.mrf.mxu0  ;;  %3608 = vmatmul.mubr.bf16.gmra.mxu1 %v3018_v5 }
 0x22b   :  { %v2911_v57 = vpop.f32.mrf.mxu1  ;;  %v2908_v41 = vadd.f32 %v2907_v32, %v2795_v3  ;;  %v2978_v58 = vmax.f32 %v2906_v14, 0.0  ;;  %v2799_v28 = vadd.f32 %v2798_v45, %v5899_v21  ;;  %v2589_v21 = vadd.f32 %v5922_v49, %v5826_v37 }
 0x22c   :  { %v2800_v48 = vpop.f32.mrf.mxu0  ;;  %v2710_v45 = vadd.f32 %v6314_v59, %v2597_v61  ;;  %v3100_v61 = vld [vmem:[%s6236_s4] sm:$0x3] }
 0x22d   :  { %v2913_v50 = vpop.f32.mrf.mxu1  ;;  %v2979_v7 = vmax.f32 %v2908_v41, 0.0  ;;  %v2801_v13 = vadd.f32 %v2800_v48, %v5906_v63  ;;  %v3022_v27 = vpack.c.bf16 %v2978_v58, %v2974_v15  ;;  %v2912_v63 = vadd.f32 %v2911_v57, %v2799_v28  ;;  %v6316_v58 = vld [vmem:[#allocation22_spill] sm:$0xff] }
 0x22e   :  { %v2802_v12 = vpop.f32.mrf.mxu0  ;;  %v2702_v23 = vadd.f32 %v5924_v1, %v2589_v21  ;;  %v5105_v21 = vld [vmem:[#allocation10 + $0x8] sm:$0xff]  }
 0x22f   :  { %v2915_v62 = vpop.f32.mrf.mxu1  ;;  %v3023_v52 = vpack.c.bf16 %v2979_v7, %v2975_v22  ;;  %v2803_v60 = vadd.f32 %v2802_v12, %v2690_v55  ;;  %v2914_v40 = vadd.f32 %v2913_v50, %v2801_v13  ;;  %v2982_v25 = vmax.f32 %v2912_v63, 0.0  ;;  %v6317_v22 = vld [vmem:[#allocation26_spill] sm:$0xff] }
 0x230   :  { %v2804_v29 = vpop.f32.mrf.mxu0  ;;  %v5102_v63 = vld [vmem:[#allocation10 + $0x50] sm:$0xff]  }
 0x231   :  { %v2917_v36 = vpop.f32.mrf.mxu1  ;;  %v2916_v8 = vadd.f32 %v2915_v62, %v2803_v60  ;;  %v2805_v33 = vadd.f32 %v2804_v29, %v2692_v56  ;;  %3617 = vmatprep.mubr.bf16.mxu1 %v3023_v52  ;;  %v2983_v31 = vmax.f32 %v2914_v40, 0.0  ;;  %4528 = vmatprep.subr.bf16.mxu0 %v5102_v63 }
 0x232   :  { %v2808_v47 = vpop.f32.mrf.mxu0  ;;  %3618 = vmatmul.mubr.bf16.gmra.mxu1 %v3022_v27  ;;  %4587 = vmatprep.subr.bf16.mxu1 %v5102_v63 }
 0x233   :  { %v2921_v42 = vpop.f32.mrf.mxu1  ;;  %v2918_v6 = vadd.f32 %v2917_v36, %v2805_v33  ;;  %v2986_v44 = vmax.f32 %v2916_v8, 0.0  ;;  %v2809_v20 = vadd.f32 %v2808_v47, %v5913_v4  ;;  %v6313_v4 = vld [vmem:[#allocation25_spill] sm:$0xff]  ;;  %v5103_v47 = vld [vmem:[#allocation10 + $0x10] sm:$0xff]  }
 0x234   :  { %v2810_v43 = vpop.f32.mrf.mxu0  ;;  %v2599_v39 = vadd.f32 %v6313_v4, %v5826_v37  ;;  %4529 = vmatpush3.bf16.msra.mxu0 %v5103_v47  ;;  %4595 = vmatpush3.bf16.msra.mxu1 %v5103_v47 }
 0x235   :  { %v2923_v34 = vpop.f32.mrf.mxu1  ;;  %v2987_v9 = vmax.f32 %v2918_v6, 0.0  ;;  %v2811_v51 = vadd.f32 %v2810_v43, %v5920_v26  ;;  %v3026_v49 = vpack.c.bf16 %v2986_v44, %v2982_v25  ;;  %v2922_v26 = vadd.f32 %v2921_v42, %v2809_v20  ;;  %v5104_v42 = vld [vmem:[#allocation10 + $0x48] sm:$0xff]   ;;  %v5106_v6 = vld [vmem:[#allocation10 + $0x40] sm:$0xff]  }
 0x236   :  { %v2812_v11 = vpop.f32.mrf.mxu0  ;;  %v2712_v7 = vadd.f32 %v6317_v22, %v2599_v39  ;;  %4530 = vmatprep.subr.bf16.mxu0 %v5104_v42  ;;  %4588 = vmatprep.subr.bf16.mxu1 %v5104_v42  ;;  %v5107_v44 = vld [vmem:[#allocation10] sm:$0xff]  }
 0x237   :  { %v2925_v18 = vpop.f32.mrf.mxu1  ;;  %v3027_v30 = vpack.c.bf16 %v2987_v9, %v2983_v31  ;;  %v2813_v24 = vadd.f32 %v2812_v11, %v2700_v35  ;;  %v2924_v17 = vadd.f32 %v2923_v34, %v2811_v51  ;;  %v2990_v41 = vmax.f32 %v2922_v26, 0.0 }
 0x238   :  { %v2814_v10 = vpop.f32.mrf.mxu0  ;;  %4531 = vmatpush3.bf16.msra.mxu0 %v5105_v21  ;;  %4596 = vmatpush3.bf16.msra.mxu1 %v5105_v21 }
 0x239   :  { %v2927_v53 = vpop.f32.mrf.mxu1  ;;  %v2926_v19 = vadd.f32 %v2925_v18, %v2813_v24  ;;  %v2815_v5 = vadd.f32 %v2814_v10, %v2702_v23  ;;  %3627 = vmatprep.mubr.bf16.mxu1 %v3027_v30  ;;  %v2991_v57 = vmax.f32 %v2924_v17, 0.0  ;;  %4532 = vmatprep.subr.bf16.mxu0 %v5106_v6 }
 0x23a   :  { %v2818_v2 = vpop.f32.mrf.mxu0  ;;  %3628 = vmatmul.mubr.bf16.gmra.mxu1 %v3026_v49  ;;  %4589 = vmatprep.subr.bf16.mxu1 %v5106_v6 }
 0x23b   :  { %v2931_v32 = vpop.f32.mrf.mxu1  ;;  %v2928_v1 = vadd.f32 %v2927_v53, %v2815_v5  ;;  %v2994_v38 = vmax.f32 %v2926_v19, 0.0  ;;  %v2819_v48 = vadd.f32 %v2818_v2, %v6316_v58  ;;  %v6318_v19 = vld [vmem:[#allocation31_spill] sm:$0xff] }
 0x23c   :  { %v2820_v14 = vpop.f32.mrf.mxu0  ;;  %4533 = vmatpush3.bf16.msra.mxu0 %v5107_v44  ;;  %4597 = vmatpush3.bf16.msra.mxu1 %v5107_v44  ;;  %v6319_v5 = vsub.s32 1, %v6318_v19  ;;  %v6320_v2 = vsub.s32 0, %v6318_v19 }
 0x23d   :  { %v2933_v3 = vpop.f32.mrf.mxu1  ;;  %v2995_v0 = vmax.f32 %v2928_v1, 0.0  ;;  %v2821_v54 = vadd.f32 %v2820_v14, %v6315_v46  ;;  %v3030_v37 = vpack.c.bf16 %v2994_v38, %v2990_v41  ;;  %v2932_v52 = vadd.f32 %v2931_v32, %v2819_v48 }
 0x23e   :  { %v2822_v50 = vpop.f32.mrf.mxu0  ;;  %v6019_v26 = vrot.slane %v3100_v61, %v6319_v5  ;;  %v6023_v32 = vrot.slane %v3100_v61, %v6320_v2 }
 0x23f   :  { %v2935_v55 = vpop.f32.mrf.mxu1  ;;  %v3031_v13 = vpack.c.bf16 %v2995_v0, %v2991_v57  ;;  %v2823_v15 = vadd.f32 %v2822_v50, %v2710_v45  ;;  %v2934_v12 = vadd.f32 %v2933_v3, %v2821_v54  ;;  %v2998_v40 = vmax.f32 %v2932_v52, 0.0 }
 0x240   :  { %v2824_v28 = vpop.f32.mrf.mxu0 }
 0x241   :  { %v2936_v62 = vadd.f32 %v2935_v55, %v2823_v15  ;;  %v2825_v56 = vadd.f32 %v2824_v28, %v2712_v7  ;;  %3637 = vmatprep.mubr.bf16.mxu1 %v3031_v13  ;;  %v2937_v60 = vpop.f32.mrf.mxu1  ;;  %v2999_v36 = vmax.f32 %v2934_v12, 0.0 }
 0x242   :  { %3638 = vmatmul.mubr.bf16.gmra.mxu1 %v3030_v37 }
 0x243   :  { %v2938_v27 = vadd.f32 %v2937_v60, %v2825_v56  ;;  %v3002_v29 = vmax.f32 %v2936_v62, 0.0 }
 0x245   :  { %v3003_v16 = vmax.f32 %v2938_v27, 0.0  ;;  %v3034_v33 = vpack.c.bf16 %v3002_v29, %v2998_v40 }
 0x247   :  { %v3035_v8 = vpack.c.bf16 %v3003_v16, %v2999_v36 }
 0x249   :  { %3647 = vmatprep.mubr.bf16.mxu1 %v3035_v8 }
 0x24a   :  { %3648 = vmatmul.mubr.bf16.gmra.mxu1 %v3034_v33 }
 0x252   :  { %v3466_v43 = vpop.f32.mrf.mxu0 }
 0x253   :  { %v3467_v3 = vadd.f32 %v3466_v43, %v6023_v32 }
 0x254   :  { %v3468_v34 = vpop.f32.mrf.mxu0 }
 0x255   :  { %v3469_v38 = vadd.f32 %v3468_v34, %v6019_v26 }
 0x256   :  { %v3470_v35 = vpop.f32.mrf.mxu0 }
 0x257   :  { %v3471_v14 = vadd.f32 %v3470_v35, %v6023_v32 }
 0x258   :  { %v3472_v31 = vpop.f32.mrf.mxu0 }
 0x259   :  { %v3473_v45 = vadd.f32 %v3472_v31, %v6019_v26 }
 0x25a   :  { %v3476_v9 = vpop.f32.mrf.mxu0 }
 0x25b   :  { %v3477_v62 = vadd.f32 %v3476_v9, %v6023_v32 }
 0x25c   :  { %v3478_v51 = vpop.f32.mrf.mxu0 }
 0x25d   :  { %v3479_v37 = vadd.f32 %v3478_v51, %v6019_v26 }
 0x25e   :  { %v3480_v25 = vpop.f32.mrf.mxu0 }
 0x25f   :  { %v3481_v28 = vadd.f32 %v3480_v25, %v6023_v32 }
 0x260   :  { %v3482_v20 = vpop.f32.mrf.mxu0 }
 0x261   :  { %v3483_v60 = vadd.f32 %v3482_v20, %v6019_v26 }
 0x262   :  { %v3486_v11 = vpop.f32.mrf.mxu0 }
 0x263   :  { %v3487_v31 = vadd.f32 %v3486_v11, %v6023_v32 }
 0x264   :  { %v3488_v18 = vpop.f32.mrf.mxu0 }
 0x265   :  { %v3489_v43 = vadd.f32 %v3488_v18, %v6019_v26 }
 0x266   :  { %v3490_v23 = vpop.f32.mrf.mxu0 }
 0x267   :  { %v3491_v34 = vadd.f32 %v3490_v23, %v6023_v32 }
 0x268   :  { %v3492_v30 = vpop.f32.mrf.mxu0 }
 0x269   :  { %v3493_v25 = vadd.f32 %v3492_v30, %v6019_v26 }
 0x26a   :  { %v6004_v24 = vpop.f32.mrf.mxu0 }
 0x26c   :  { %v6006_v49 = vpop.f32.mrf.mxu0 }
 0x26d   :  { %v3499_v11 = vadd.f32 %v6006_v49, %v6019_v26 }
 0x26e   :  { %v6008_v10 = vpop.f32.mrf.mxu0 }
 0x26f   :  { %v3501_v30 = vadd.f32 %v6008_v10, %v6023_v32 }
 0x270   :  { %v6010_v53 = vpop.f32.mrf.mxu0 }
 0x272   :  { %v6015_v17 = vpop.f32.mrf.mxu0 }
 0x274   :  { %v6025_v39 = vpop.f32.mrf.mxu0 }
 0x276   :  { %v6031_v46 = vpop.f32.mrf.mxu0 }
 0x278   :  { %v6033_v7 = vpop.f32.mrf.mxu0 }
 0x27a   :  { %v6039_v36 = vpop.f32.mrf.mxu0 }
 0x27c   :  { %v6041_v21 = vpop.f32.mrf.mxu0 }
 0x27e   :  { %v3520_v19 = vpop.f32.mrf.mxu0 }
 0x280   :  { %v3522_v23 = vpop.f32.mrf.mxu0 }
 0x2d2   :  { %v3579_v4 = vpop.f32.mrf.mxu1 }
 0x2d3   :  { %v3580_v54 = vadd.f32 %v3579_v4, %v3467_v3 }
 0x2d4   :  { %v3581_v1 = vpop.f32.mrf.mxu1 }
 0x2d5   :  { %v3582_v57 = vadd.f32 %v3581_v1, %v3469_v38  ;;  %v3658_v13 = vmax.f32 %v3580_v54, 0.0 }
 0x2d6   :  { %v3583_v59 = vpop.f32.mrf.mxu1 }
 0x2d7   :  { %v3584_v0 = vadd.f32 %v3583_v59, %v3471_v14  ;;  %v3659_v55 = vmax.f32 %v3582_v57, 0.0  ;;  %v3497_v57 = vadd.f32 %v6004_v24, %v6023_v32 }
 0x2d8   :  { %v3585_v41 = vpop.f32.mrf.mxu1 }
 0x2d9   :  { %v3586_v58 = vadd.f32 %v3585_v41, %v3473_v45  ;;  %v3660_v48 = vmax.f32 %v3584_v0, 0.0  ;;  %v3503_v41 = vadd.f32 %v6010_v53, %v6019_v26  ;;  %v3511_v53 = vadd.f32 %v6031_v46, %v6023_v32 }
 0x2da   :  { %v3589_v50 = vpop.f32.mrf.mxu1 }
 0x2db   :  { %v3661_v22 = vmax.f32 %v3586_v58, 0.0  ;;  %v3690_v56 = vpack.c.bf16 %v3660_v48, %v3658_v13  ;;  %v3590_v16 = vadd.f32 %v3589_v50, %v3477_v62  ;;  %v3526_v50 = vpop.f32.mrf.mxu0  ;;  %v3509_v62 = vadd.f32 %v6025_v39, %v6019_v26 }
 0x2dc   :  { %v3591_v15 = vpop.f32.mrf.mxu1 }
 0x2dd   :  { %v3691_v12 = vpack.c.bf16 %v3661_v22, %v3659_v55  ;;  %v3592_v27 = vadd.f32 %v3591_v15, %v3479_v37  ;;  %v3662_v6 = vmax.f32 %v3590_v16, 0.0 }
 0x2de   :  { %v3593_v52 = vpop.f32.mrf.mxu1 }
 0x2df   :  { %v3594_v29 = vadd.f32 %v3593_v52, %v3481_v28  ;;  %3873 = vmatprep.mubr.bf16.mxu0 %v3691_v12  ;;  %v3663_v47 = vmax.f32 %v3592_v27, 0.0  ;;  %v3528_v28 = vpop.f32.mrf.mxu0  ;;  %v3507_v52 = vadd.f32 %v6015_v17, %v6023_v32 }
 0x2e0   :  { %v3595_v40 = vpop.f32.mrf.mxu1  ;;  %3874 = vmatmul.mubr.bf16.vlgmr.msra.gmra.mxu0 %v3690_v56 }
 0x2e1   :  { %v3596_v8 = vadd.f32 %v3595_v40, %v3483_v60  ;;  %v3664_v33 = vmax.f32 %v3594_v29, 0.0  ;;  %v3513_v29 = vadd.f32 %v6033_v7, %v6019_v26  ;;  %v3521_v7 = vadd.f32 %v3520_v19, %v6023_v32 }
 0x2e2   :  { %v3599_v63 = vpop.f32.mrf.mxu1 }
 0x2e3   :  { %v3665_v42 = vmax.f32 %v3596_v8, 0.0  ;;  %v3692_v9 = vpack.c.bf16 %v3664_v33, %v3662_v6  ;;  %v3600_v5 = vadd.f32 %v3599_v63, %v3487_v31  ;;  %v3530_v8 = vpop.f32.mrf.mxu0  ;;  %v3517_v31 = vadd.f32 %v6039_v36, %v6023_v32 }
 0x2e4   :  { %v3601_v44 = vpop.f32.mrf.mxu1  ;;  %v3529_v36 = vadd.f32 %v3528_v28, %v6019_v26 }
 0x2e5   :  { %v3693_v35 = vpack.c.bf16 %v3665_v42, %v3663_v47  ;;  %v3602_v20 = vadd.f32 %v3601_v44, %v3489_v43  ;;  %v3666_v3 = vmax.f32 %v3600_v5, 0.0  ;;  %v3532_v44 = vpop.f32.mrf.mxu0 }
 0x2e6   :  { %v3603_v51 = vpop.f32.mrf.mxu1 }
 0x2e7   :  { %v3604_v61 = vadd.f32 %v3603_v51, %v3491_v34  ;;  %3881 = vmatprep.mubr.bf16.mxu0 %v3693_v35  ;;  %v3667_v18 = vmax.f32 %v3602_v20, 0.0  ;;  %v3519_v34 = vadd.f32 %v6041_v21, %v6019_v26  ;;  %v3536_v5 = vpop.f32.mrf.mxu0 }
 0x2e8   :  { %v3605_v2 = vpop.f32.mrf.mxu1  ;;  %3882 = vmatmul.mubr.bf16.gmra.mxu0 %v3692_v9 }
 0x2e9   :  { %v3606_v4 = vadd.f32 %v3605_v2, %v3493_v25  ;;  %v3668_v1 = vmax.f32 %v3604_v61, 0.0  ;;  %v3523_v25 = vadd.f32 %v3522_v23, %v6019_v26 }
 0x2ea   :  { %v3609_v38 = vpop.f32.mrf.mxu1 }
 0x2eb   :  { %v3669_v14 = vmax.f32 %v3606_v4, 0.0  ;;  %v3694_v0 = vpack.c.bf16 %v3668_v1, %v3666_v3  ;;  %v3610_v55 = vadd.f32 %v3609_v38, %v3497_v57 }
 0x2ec   :  { %v3611_v59 = vpop.f32.mrf.mxu1 }
 0x2ed   :  { %v3695_v45 = vpack.c.bf16 %v3669_v14, %v3667_v18  ;;  %v3612_v58 = vadd.f32 %v3611_v59, %v3499_v11  ;;  %v3670_v12 = vmax.f32 %v3610_v55, 0.0  ;;  %v3538_v14 = vpop.f32.mrf.mxu0  ;;  %v3531_v11 = vadd.f32 %v3530_v8, %v6023_v32 }
 0x2ee   :  { %v3613_v54 = vpop.f32.mrf.mxu1 }
 0x2ef   :  { %v3614_v48 = vadd.f32 %v3613_v54, %v3501_v30  ;;  %3889 = vmatprep.mubr.bf16.mxu0 %v3695_v45  ;;  %v3671_v10 = vmax.f32 %v3612_v58, 0.0  ;;  %v3527_v30 = vadd.f32 %v3526_v50, %v6023_v32  ;;  %v3540_v58 = vpop.f32.mrf.mxu0  ;;  %v3539_v50 = vadd.f32 %v3538_v14, %v6019_v26 }
 0x2f0   :  { %v3615_v22 = vpop.f32.mrf.mxu1  ;;  %3890 = vmatmul.mubr.bf16.gmra.mxu0 %v3694_v0  ;;  %v3533_v0 = vadd.f32 %v3532_v44, %v6019_v26 }
 0x2f1   :  { %v3616_v49 = vadd.f32 %v3615_v22, %v3503_v41  ;;  %v3672_v13 = vmax.f32 %v3614_v48, 0.0 }
 0x2f2   :  { %v3619_v15 = vpop.f32.mrf.mxu1 }
 0x2f3   :  { %v3673_v37 = vmax.f32 %v3616_v49, 0.0  ;;  %v3696_v60 = vpack.c.bf16 %v3672_v13, %v3670_v12  ;;  %v3620_v33 = vadd.f32 %v3619_v15, %v3507_v52 }
 0x2f4   :  { %v3621_v24 = vpop.f32.mrf.mxu1 }
 0x2f5   :  { %v3697_v56 = vpack.c.bf16 %v3673_v37, %v3671_v10  ;;  %v3622_v16 = vadd.f32 %v3621_v24, %v3509_v62  ;;  %v3674_v43 = vmax.f32 %v3620_v33, 0.0  ;;  %v3542_v37 = vpop.f32.mrf.mxu0  ;;  %v3541_v24 = vadd.f32 %v3540_v58, %v6023_v32 }
 0x2f6   :  { %v3623_v27 = vpop.f32.mrf.mxu1 }
 0x2f7   :  { %v3624_v40 = vadd.f32 %v3623_v27, %v3511_v53  ;;  %3897 = vmatprep.mubr.bf16.mxu0 %v3697_v56  ;;  %v3675_v46 = vmax.f32 %v3622_v16, 0.0  ;;  %v3537_v53 = vadd.f32 %v3536_v5, %v6023_v32 }
 0x2f8   :  { %v3625_v63 = vpop.f32.mrf.mxu1  ;;  %3898 = vmatmul.mubr.bf16.gmra.mxu0 %v3696_v60  ;;  %v3543_v60 = vadd.f32 %v3542_v37, %v6019_v26  ;;  %v6080_v26 = vld [vmem:[%s6238_s6] ss:$0 sm:$0xff]  ;;  %s5313_s6 = smov [#allocation11]  }
 0x2f9   :  { %v3626_v39 = vadd.f32 %v3625_v63, %v3513_v29  ;;  %v3676_v47 = vmax.f32 %v3624_v40, 0.0  ;;  %s4103_s9 = sshll.u32 %s5313_s6, 4  ;;  %s4104_s9 = int_to_ptr.vmem [resolvable:$true] %s4103_s9 }
 0x2fa   :  { %v3629_v42 = vpop.f32.mrf.mxu1  ;;  %s5272_s10 = scalar_lea.vmem %s4104_s9, 2048  ;;  %p5277_p12 = scmp.lt.s32.totalorder %s4104_s9, %s4104_s9 }
 0x2fb   :  { %v3677_v6 = vmax.f32 %v3626_v39, 0.0  ;;  %v3698_v9 = vpack.c.bf16 %v3676_v47, %v3674_v43  ;;  %v3630_v2 = vadd.f32 %v3629_v42, %v3517_v31  ;;  %p5273_p11 = scmp.ne.s32.totalorder %s4104_s9, %s5272_s10  ;;  %p5278_p13 = scmp.lt.s32.totalorder %s5272_s10, %s5272_s10 }
 0x2fc   :  { %v3631_v17 = vpop.f32.mrf.mxu1 }
 0x2fd   :  { %v3699_v35 = vpack.c.bf16 %v3677_v6, %v3675_v46  ;;  %v3632_v20 = vadd.f32 %v3631_v17, %v3519_v34  ;;  %v3678_v3 = vmax.f32 %v3630_v2, 0.0  ;;  %p5279_p0 = por %p5278_p13, %p5277_p12 }
 0x2fe   :  { %v3633_v51 = vpop.f32.mrf.mxu1 }
 0x2ff   :  { %v3634_v61 = vadd.f32 %v3633_v51, %v3521_v7  ;;  %3905 = vmatprep.mubr.bf16.mxu1 %v3699_v35  ;;  %v3679_v18 = vmax.f32 %v3632_v20, 0.0  ;;  %p5280_p1 = pnand %p5279_p0, %p5273_p11 }
 0x300   :  { %v3635_v4 = vpop.f32.mrf.mxu1  ;;  %3906 = vmatmul.mubr.bf16.vlgmr.msra.gmra.mxu1 %v3698_v9 }
 0x301   :  { %v3636_v1 = vadd.f32 %v3635_v4, %v3523_v25  ;;  %v3680_v38 = vmax.f32 %v3634_v61, 0.0 }
 0x302   :  { %v3639_v21 = vpop.f32.mrf.mxu1 }
 0x303   :  { %v3681_v19 = vmax.f32 %v3636_v1, 0.0  ;;  %v3700_v45 = vpack.c.bf16 %v3680_v38, %v3678_v3  ;;  %v3640_v48 = vadd.f32 %v3639_v21, %v3527_v30 }
 0x304   :  { %v3641_v59 = vpop.f32.mrf.mxu1 }
 0x305   :  { %v3701_v23 = vpack.c.bf16 %v3681_v19, %v3679_v18  ;;  %v3642_v54 = vadd.f32 %v3641_v59, %v3529_v36  ;;  %v3682_v28 = vmax.f32 %v3640_v48, 0.0 }
 0x306   :  { %v3643_v57 = vpop.f32.mrf.mxu1 }
 0x307   :  { %v3644_v41 = vadd.f32 %v3643_v57, %v3531_v11  ;;  %3913 = vmatprep.mubr.bf16.mxu1 %v3701_v23  ;;  %v3683_v15 = vmax.f32 %v3642_v54, 0.0 }
 0x308   :  { %v3645_v55 = vpop.f32.mrf.mxu1  ;;  %3914 = vmatmul.mubr.bf16.gmra.mxu1 %v3700_v45 }
 0x309   :  { %v3646_v22 = vadd.f32 %v3645_v55, %v3533_v0  ;;  %v3684_v49 = vmax.f32 %v3644_v41, 0.0 }
 0x30a   :  { %v3649_v13 = vpop.f32.mrf.mxu1 }
 0x30b   :  { %v3685_v10 = vmax.f32 %v3646_v22, 0.0  ;;  %v3702_v56 = vpack.c.bf16 %v3684_v49, %v3682_v28  ;;  %v3650_v16 = vadd.f32 %v3649_v13, %v3537_v53 }
 0x30c   :  { %v3651_v12 = vpop.f32.mrf.mxu1 }
 0x30d   :  { %v3703_v62 = vpack.c.bf16 %v3685_v10, %v3683_v15  ;;  %v3652_v27 = vadd.f32 %v3651_v12, %v3539_v50  ;;  %v3686_v47 = vmax.f32 %v3650_v16, 0.0 }
 0x30e   :  { %v3653_v52 = vpop.f32.mrf.mxu1 }
 0x30f   :  { %v3654_v29 = vadd.f32 %v3653_v52, %v3541_v24  ;;  %3921 = vmatprep.mubr.bf16.mxu1 %v3703_v62  ;;  %v3687_v63 = vmax.f32 %v3652_v27, 0.0 }
 0x310   :  { %v3655_v40 = vpop.f32.mrf.mxu1  ;;  %3922 = vmatmul.mubr.bf16.gmra.mxu1 %v3702_v56 }
 0x311   :  { %v3656_v8 = vadd.f32 %v3655_v40, %v3543_v60  ;;  %v3688_v33 = vmax.f32 %v3654_v29, 0.0 }
 0x313   :  { %v3689_v39 = vmax.f32 %v3656_v8, 0.0  ;;  %v3704_v46 = vpack.c.bf16 %v3688_v33, %v3686_v47 }
 0x315   :  { %v3705_v42 = vpack.c.bf16 %v3689_v39, %v3687_v63 }
 0x317   :  { %3929 = vmatprep.mubr.bf16.mxu1 %v3705_v42 }
 0x318   :  { %3930 = vmatmul.mubr.bf16.gmra.mxu1 %v3704_v46 }
 0x3a0   :  { %v4534_v32 = vpop.f32.mrf.mxu0 }
 0x3a2   :  { %v4535_v6 = vpop.f32.mrf.mxu0 }
 0x3a3   :  { %v4536_v44 = vadd.f32 %v4535_v6, %v4534_v32 }
 0x3a4   :  { %v4537_v43 = vpop.f32.mrf.mxu0 }
 0x3a5   :  { %v6083_v17 = vadd.f32 %v4536_v44, %v6080_v26 }
 0x3a6   :  { %v4538_v34 = vpop.f32.mrf.mxu0 }
 0x3a7   :  { %v4539_v7 = vadd.f32 %v4538_v34, %v4537_v43  ;;  %3938 = vmax.xlane.f32.xlu0 %v6083_v17 }
 0x3a8   :  { %v4540_v35 = vpop.f32.mrf.mxu0 }
 0x3a9   :  { %v6087_v31 = vadd.f32 %v4539_v7, %v6080_v26 }
 0x3aa   :  { %v4541_v9 = vpop.f32.mrf.mxu0 }
 0x3ab   :  { %v4542_v51 = vadd.f32 %v4541_v9, %v4540_v35  ;;  %3940 = vmax.xlane.f32.xlu0 %v6087_v31 }
 0x3ac   :  { %v4543_v25 = vpop.f32.mrf.mxu0 }
 0x3ad   :  { %v6091_v20 = vadd.f32 %v4542_v51, %v6080_v26 }
 0x3ae   :  { %v4544_v61 = vpop.f32.mrf.mxu0 }
 0x3af   :  { %v4545_v5 = vadd.f32 %v4544_v61, %v4543_v25  ;;  %3942 = vmax.xlane.f32.xlu1 %v6091_v20 }
 0x3b0   :  { %v4546_v2 = vpop.f32.mrf.mxu0 }
 0x3b1   :  { %v6095_v4 = vadd.f32 %v4545_v5, %v6080_v26 }
 0x3b2   :  { %v4547_v1 = vpop.f32.mrf.mxu0 }
 0x3b3   :  { %v4548_v38 = vadd.f32 %v4547_v1, %v4546_v2  ;;  %3944 = vmax.xlane.f32.xlu1 %v6095_v4 }
 0x3b4   :  { %v4549_v21 = vpop.f32.mrf.mxu0 }
 0x3b5   :  { %v6099_v18 = vadd.f32 %v4548_v38, %v6080_v26 }
 0x3b6   :  { %v4550_v19 = vpop.f32.mrf.mxu0 }
 0x3b7   :  { %v4551_v14 = vadd.f32 %v4550_v19, %v4549_v21  ;;  %3946 = vmax.xlane.f32.xlu0 %v6099_v18 }
 0x3b8   :  { %v4552_v3 = vpop.f32.mrf.mxu0 }
 0x3b9   :  { %v6103_v59 = vadd.f32 %v4551_v14, %v6080_v26 }
 0x3ba   :  { %v4553_v36 = vpop.f32.mrf.mxu0 }
 0x3bb   :  { %v4554_v11 = vadd.f32 %v4553_v36, %v4552_v3  ;;  %3948 = vmax.xlane.f32.xlu1 %v6103_v59 }
 0x3bc   :  { %v4555_v23 = vpop.f32.mrf.mxu0 }
 0x3bd   :  { %v6107_v30 = vadd.f32 %v4554_v11, %v6080_v26 }
 0x3be   :  { %v4556_v45 = vpop.f32.mrf.mxu0 }
 0x3bf   :  { %v4557_v57 = vadd.f32 %v4556_v45, %v4555_v23  ;;  %3950 = vmax.xlane.f32.xlu0 %v6107_v30 }
 0x3c0   :  { %v4558_v0 = vpop.f32.mrf.mxu1 }
 0x3c1   :  { %v6111_v54 = vadd.f32 %v4557_v57, %v6080_v26 }
 0x3c2   :  { %v4559_v41 = vpop.f32.mrf.mxu1 }
 0x3c3   :  { %v4560_v58 = vadd.f32 %v4559_v41, %v4558_v0  ;;  %3952 = vmax.xlane.f32.xlu1 %v6111_v54 }
 0x3c4   :  { %v4561_v48 = vpop.f32.mrf.mxu1 }
 0x3c5   :  { %v6115_v55 = vadd.f32 %v4560_v58, %v6080_v26 }
 0x3c6   :  { %v4562_v22 = vpop.f32.mrf.mxu1 }
 0x3c7   :  { %v4563_v49 = vadd.f32 %v4562_v22, %v4561_v48  ;;  %3954 = vmax.xlane.f32.xlu0 %v6115_v55 }
 0x3c8   :  { %v4564_v13 = vpop.f32.mrf.mxu1 }
 0x3c9   :  { %v6119_v15 = vadd.f32 %v4563_v49, %v6080_v26 }
 0x3ca   :  { %v4565_v10 = vpop.f32.mrf.mxu1 }
 0x3cb   :  { %v4566_v37 = vadd.f32 %v4565_v10, %v4564_v13  ;;  %3956 = vmax.xlane.f32.xlu1 %v6119_v15 }
 0x3cc   :  { %v4567_v28 = vpop.f32.mrf.mxu1 }
 0x3cd   :  { %v6123_v12 = vadd.f32 %v4566_v37, %v6080_v26 }
 0x3ce   :  { %v4568_v50 = vpop.f32.mrf.mxu1 }
 0x3cf   :  { %v4569_v24 = vadd.f32 %v4568_v50, %v4567_v28  ;;  %3958 = vmax.xlane.f32.xlu0 %v6123_v12 }
 0x3d0   :  { %v4570_v62 = vpop.f32.mrf.mxu1 }
 0x3d1   :  { %v6127_v53 = vadd.f32 %v4569_v24, %v6080_v26 }
 0x3d2   :  { %v4571_v56 = vpop.f32.mrf.mxu1 }
 0x3d3   :  { %v4572_v52 = vadd.f32 %v4571_v56, %v4570_v62  ;;  %3960 = vmax.xlane.f32.xlu1 %v6127_v53 }
 0x3d4   :  { %v4573_v60 = vpop.f32.mrf.mxu1 }
 0x3d5   :  { %v6131_v27 = vadd.f32 %v4572_v52, %v6080_v26 }
 0x3d6   :  { %v4574_v29 = vpop.f32.mrf.mxu1 }
 0x3d7   :  { %v4575_v16 = vadd.f32 %v4574_v29, %v4573_v60  ;;  %3962 = vmax.xlane.f32.xlu0 %v6131_v27 }
 0x3d8   :  { %v4576_v40 = vpop.f32.mrf.mxu1 }
 0x3d9   :  { %v6135_v8 = vadd.f32 %v4575_v16, %v6080_v26 }
 0x3da   :  { %v4577_v33 = vpop.f32.mrf.mxu1 }
 0x3db   :  { %v4578_v63 = vadd.f32 %v4577_v33, %v4576_v40  ;;  %3964 = vmax.xlane.f32.xlu1 %v6135_v8 }
 0x3dc   :  { %v4579_v39 = vpop.f32.mrf.mxu1 }
 0x3dd   :  { %v6139_v47 = vadd.f32 %v4578_v63, %v6080_v26 }
 0x3de   :  { %v4580_v42 = vpop.f32.mrf.mxu1 }
 0x3df   :  { %v4581_v46 = vadd.f32 %v4580_v42, %v4579_v39  ;;  %3966 = vmax.xlane.f32.xlu0 %v6139_v47 }
 0x3e1   :  { %v6143_v32 = vadd.f32 %v4581_v46, %v6080_v26 }
 0x3e3   :  { %3968 = vmax.xlane.f32.xlu1 %v6143_v32 }
 0x430   :  { %v3939_v6 = vpop.xlane.xlu0 %3938 }
 0x431   :  { %v3970_v44 = vsub.f32 %v6083_v17, %v3939_v6 }
 0x433   :  { %v3986_v43 = vmul.f32 1.442695, %v3970_v44 }
 0x434   :  { %v3941_v34 = vpop.xlane.xlu0 %3940 }
 0x435   :  { %5108 = vpow2.f32 %v3986_v43  ;;  %v3971_v7 = vsub.f32 %v6087_v31, %v3941_v34 }
 0x437   :  { %v3988_v35 = vmul.f32 1.442695, %v3971_v7 }
 0x438   :  { %v3943_v9 = vpop.xlane.xlu1 %3942 }
 0x439   :  { %5110 = vpow2.f32 %v3988_v35  ;;  %v3972_v51 = vsub.f32 %v6091_v20, %v3943_v9 }
 0x43b   :  { %v3990_v25 = vmul.f32 1.442695, %v3972_v51 }
 0x43c   :  { %v3945_v61 = vpop.xlane.xlu1 %3944 }
 0x43d   :  { %5112 = vpow2.f32 %v3990_v25  ;;  %v3973_v26 = vsub.f32 %v6095_v4, %v3945_v61 }
 0x43f   :  { %v3992_v5 = vmul.f32 1.442695, %v3973_v26 }
 0x440   :  { %v3947_v2 = vpop.xlane.xlu0 %3946 }
 0x441   :  { %5114 = vpow2.f32 %v3992_v5  ;;  %v3974_v17 = vsub.f32 %v6099_v18, %v3947_v2 }
 0x442   :  { %v6151_v1 = vpop.eup %5108 }
 0x443   :  { %v3994_v38 = vmul.f32 1.442695, %v3974_v17  ;;  %4018 = vadd.xlane.f32.xlu0 %v6151_v1 }
 0x444   :  { %v3949_v31 = vpop.xlane.xlu1 %3948 }
 0x445   :  { %5116 = vpow2.f32 %v3994_v38  ;;  %v3975_v21 = vsub.f32 %v6103_v59, %v3949_v31 }
 0x446   :  { %v6155_v20 = vpop.eup %5110 }
 0x447   :  { %v3996_v19 = vmul.f32 1.442695, %v3975_v21  ;;  %4020 = vadd.xlane.f32.xlu1 %v6155_v20 }
 0x448   :  { %v3951_v4 = vpop.xlane.xlu0 %3950 }
 0x449   :  { %5118 = vpow2.f32 %v3996_v19  ;;  %v3976_v14 = vsub.f32 %v6107_v30, %v3951_v4 }
 0x44a   :  { %v6159_v3 = vpop.eup %5112 }
 0x44b   :  { %v3998_v18 = vmul.f32 1.442695, %v3976_v14  ;;  %4022 = vadd.xlane.f32.xlu0 %v6159_v3 }
 0x44c   :  { %v3953_v36 = vpop.xlane.xlu1 %3952 }
 0x44d   :  { %5120 = vpow2.f32 %v3998_v18  ;;  %v3977_v11 = vsub.f32 %v6111_v54, %v3953_v36 }
 0x44e   :  { %v6163_v23 = vpop.eup %5114 }
 0x44f   :  { %v4000_v59 = vmul.f32 1.442695, %v3977_v11  ;;  %4024 = vadd.xlane.f32.xlu1 %v6163_v23 }
 0x450   :  { %v3955_v45 = vpop.xlane.xlu0 %3954 }
 0x451   :  { %5122 = vpow2.f32 %v4000_v59  ;;  %v3978_v57 = vsub.f32 %v6115_v55, %v3955_v45 }
 0x452   :  { %v6167_v0 = vpop.eup %5116 }
 0x453   :  { %v4002_v30 = vmul.f32 1.442695, %v3978_v57  ;;  %4026 = vadd.xlane.f32.xlu0 %v6167_v0 }
 0x454   :  { %v3957_v41 = vpop.xlane.xlu1 %3956 }
 0x455   :  { %5124 = vpow2.f32 %v4002_v30  ;;  %v3979_v58 = vsub.f32 %v6119_v15, %v3957_v41 }
 0x456   :  { %v6171_v48 = vpop.eup %5118 }
 0x457   :  { %v4004_v54 = vmul.f32 1.442695, %v3979_v58  ;;  %4028 = vadd.xlane.f32.xlu1 %v6171_v48 }
 0x458   :  { %v3959_v22 = vpop.xlane.xlu0 %3958 }
 0x459   :  { %5126 = vpow2.f32 %v4004_v54  ;;  %v3980_v49 = vsub.f32 %v6123_v12, %v3959_v22 }
 0x45a   :  { %v6175_v13 = vpop.eup %5120 }
 0x45b   :  { %v4006_v55 = vmul.f32 1.442695, %v3980_v49  ;;  %4030 = vadd.xlane.f32.xlu0 %v6175_v13 }
 0x45c   :  { %v3961_v10 = vpop.xlane.xlu1 %3960 }
 0x45d   :  { %5128 = vpow2.f32 %v4006_v55  ;;  %v3981_v37 = vsub.f32 %v6127_v53, %v3961_v10 }
 0x45e   :  { %v6179_v28 = vpop.eup %5122 }
 0x45f   :  { %v4008_v15 = vmul.f32 1.442695, %v3981_v37  ;;  %4032 = vadd.xlane.f32.xlu1 %v6179_v28 }
 0x460   :  { %v3963_v50 = vpop.xlane.xlu0 %3962 }
 0x461   :  { %5130 = vpow2.f32 %v4008_v15  ;;  %v3982_v24 = vsub.f32 %v6131_v27, %v3963_v50 }
 0x462   :  { %v6183_v62 = vpop.eup %5124 }
 0x463   :  { %v4010_v12 = vmul.f32 1.442695, %v3982_v24  ;;  %4034 = vadd.xlane.f32.xlu0 %v6183_v62 }
 0x464   :  { %v3965_v56 = vpop.xlane.xlu1 %3964 }
 0x465   :  { %5132 = vpow2.f32 %v4010_v12  ;;  %v3983_v52 = vsub.f32 %v6135_v8, %v3965_v56 }
 0x466   :  { %v6187_v60 = vpop.eup %5126 }
 0x467   :  { %v4012_v53 = vmul.f32 1.442695, %v3983_v52  ;;  %4036 = vadd.xlane.f32.xlu1 %v6187_v60 }
 0x468   :  { %v3967_v29 = vpop.xlane.xlu0 %3966 }
 0x469   :  { %5134 = vpow2.f32 %v4012_v53  ;;  %v3984_v16 = vsub.f32 %v6139_v47, %v3967_v29 }
 0x46a   :  { %v6191_v40 = vpop.eup %5128 }
 0x46b   :  { %v4014_v27 = vmul.f32 1.442695, %v3984_v16  ;;  %4038 = vadd.xlane.f32.xlu0 %v6191_v40 }
 0x46c   :  { %v3969_v33 = vpop.xlane.xlu1 %3968 }
 0x46d   :  { %5136 = vpow2.f32 %v4014_v27  ;;  %v3985_v63 = vsub.f32 %v6143_v32, %v3969_v33 }
 0x46e   :  { %v6195_v39 = vpop.eup %5130 }
 0x46f   :  { %v4016_v8 = vmul.f32 1.442695, %v3985_v63  ;;  %4040 = vadd.xlane.f32.xlu1 %v6195_v39 }
 0x471   :  { %5138 = vpow2.f32 %v4016_v8 }
 0x472   :  { %v6198_v42 = vpop.eup %5132 }
 0x473   :  { %4042 = vadd.xlane.f32.xlu0 %v6198_v42 }
 0x476   :  { %v6201_v47 = vpop.eup %5134 }
 0x477   :  { %4044 = vadd.xlane.f32.xlu1 %v6201_v47 }
 0x47a   :  { %v6204_v46 = vpop.eup %5136 }
 0x47b   :  { %4046 = vadd.xlane.f32.xlu0 %v6204_v46 }
 0x47e   :  { %v6207_v6 = vpop.eup %5138 }
 0x47f   :  { %4048 = vadd.xlane.f32.xlu1 %v6207_v6 }
 0x4cc   :  { %v4019_v32 = vpop.xlane.xlu0 %4018 }
 0x4cd   :  { %5140 = vrcp.f32 %v4019_v32 }
 0x4d0   :  { %v4021_v44 = vpop.xlane.xlu1 %4020 }
 0x4d1   :  { %5142 = vrcp.f32 %v4021_v44 }
 0x4d4   :  { %v4023_v43 = vpop.xlane.xlu0 %4022 }
 0x4d5   :  { %5144 = vrcp.f32 %v4023_v43 }
 0x4d8   :  { %v4025_v34 = vpop.xlane.xlu1 %4024 }
 0x4d9   :  { %5146 = vrcp.f32 %v4025_v34 }
 0x4da   :  { %v5141_v7 = vpop.eup %5140 }
 0x4db   :  { %v4066_v35 = vmul.f32 %v5141_v7, %v6151_v1 }
 0x4dc   :  { %v4027_v9 = vpop.xlane.xlu0 %4026 }
 0x4dd   :  { %4082 = vst [vmem:[#allocation11] sm:$0xff] %v4066_v35  ;;  %5148 = vrcp.f32 %v4027_v9 }
 0x4de   :  { %v5143_v51 = vpop.eup %5142 }
 0x4df   :  { %v4067_v25 = vmul.f32 %v5143_v51, %v6155_v20 }
 0x4e0   :  { %v4029_v61 = vpop.xlane.xlu1 %4028 }
 0x4e1   :  { %4083 = vst [vmem:[#allocation11 + $0x8] sm:$0xff] %v4067_v25  ;;  %5150 = vrcp.f32 %v4029_v61 }
 0x4e2   :  { %v5145_v26 = vpop.eup %5144 }
 0x4e3   :  { %v4068_v5 = vmul.f32 %v5145_v26, %v6159_v3 }
 0x4e4   :  { %v4031_v2 = vpop.xlane.xlu0 %4030 }
 0x4e5   :  { %4084 = vst [vmem:[#allocation11 + $0x10] sm:$0xff] %v4068_v5  ;;  %5152 = vrcp.f32 %v4031_v2 }
 0x4e6   :  { %v5147_v17 = vpop.eup %5146 }
 0x4e7   :  { %v4069_v38 = vmul.f32 %v5147_v17, %v6163_v23 }
 0x4e8   :  { %v4033_v31 = vpop.xlane.xlu1 %4032 }
 0x4e9   :  { %4085 = vst [vmem:[#allocation11 + $0x18] sm:$0xff] %v4069_v38  ;;  %5154 = vrcp.f32 %v4033_v31 }
 0x4ea   :  { %v5149_v1 = vpop.eup %5148 }
 0x4eb   :  { %v4070_v21 = vmul.f32 %v5149_v1, %v6167_v0 }
 0x4ec   :  { %v4035_v19 = vpop.xlane.xlu0 %4034 }
 0x4ed   :  { %4086 = vst [vmem:[#allocation11 + $0x20] sm:$0xff] %v4070_v21  ;;  %5156 = vrcp.f32 %v4035_v19 }
 0x4ee   :  { %v5151_v20 = vpop.eup %5150 }
 0x4ef   :  { %v4071_v4 = vmul.f32 %v5151_v20, %v6171_v48 }
 0x4f0   :  { %v4037_v14 = vpop.xlane.xlu1 %4036 }
 0x4f1   :  { %4087 = vst [vmem:[#allocation11 + $0x28] sm:$0xff] %v4071_v4  ;;  %5158 = vrcp.f32 %v4037_v14 }
 0x4f2   :  { %v5153_v3 = vpop.eup %5152 }
 0x4f3   :  { %v4072_v18 = vmul.f32 %v5153_v3, %v6175_v13 }
 0x4f4   :  { %v4039_v36 = vpop.xlane.xlu0 %4038 }
 0x4f5   :  { %4088 = vst [vmem:[#allocation11 + $0x30] sm:$0xff] %v4072_v18  ;;  %5160 = vrcp.f32 %v4039_v36 }
 0x4f6   :  { %v5155_v11 = vpop.eup %5154 }
 0x4f7   :  { %v4073_v23 = vmul.f32 %v5155_v11, %v6179_v28 }
 0x4f8   :  { %v4041_v59 = vpop.xlane.xlu1 %4040 }
 0x4f9   :  { %4089 = vst [vmem:[#allocation11 + $0x38] sm:$0xff] %v4073_v23  ;;  %5162 = vrcp.f32 %v4041_v59 }
 0x4fa   :  { %v5157_v45 = vpop.eup %5156 }
 0x4fb   :  { %v4074_v57 = vmul.f32 %v5157_v45, %v6183_v62 }
 0x4fc   :  { %v4043_v0 = vpop.xlane.xlu0 %4042 }
 0x4fd   :  { %4090 = vst [vmem:[#allocation11 + $0x40] sm:$0xff] %v4074_v57  ;;  %5164 = vrcp.f32 %v4043_v0 }
 0x4fe   :  { %v5159_v30 = vpop.eup %5158 }
 0x4ff   :  { %v4075_v41 = vmul.f32 %v5159_v30, %v6187_v60 }
 0x500   :  { %v4045_v58 = vpop.xlane.xlu1 %4044 }
 0x501   :  { %4091 = vst [vmem:[#allocation11 + $0x48] sm:$0xff] %v4075_v41  ;;  %5166 = vrcp.f32 %v4045_v58 }
 0x502   :  { %v5161_v48 = vpop.eup %5160 }
 0x503   :  { %v4076_v54 = vmul.f32 %v5161_v48, %v6191_v40 }
 0x504   :  { %v4047_v22 = vpop.xlane.xlu0 %4046 }
 0x505   :  { %4092 = vst [vmem:[#allocation11 + $0x50] sm:$0xff] %v4076_v54  ;;  %5168 = vrcp.f32 %v4047_v22 }
 0x506   :  { %v5163_v49 = vpop.eup %5162 }
 0x507   :  { %v4077_v13 = vmul.f32 %v5163_v49, %v6195_v39 }
 0x508   :  { %v4049_v55 = vpop.xlane.xlu1 %4048 }
 0x509   :  { %4093 = vst [vmem:[#allocation11 + $0x58] sm:$0xff] %v4077_v13  ;;  %5170 = vrcp.f32 %v4049_v55 }
 0x50a   :  { %v5165_v10 = vpop.eup %5164 }
 0x50b   :  { %v4078_v37 = vmul.f32 %v5165_v10, %v6198_v42 }
 0x50d   :  { %4094 = vst [vmem:[#allocation11 + $0x60] sm:$0xff] %v4078_v37 }
 0x50e   :  { %v5167_v28 = vpop.eup %5166 }
 0x50f   :  { %v4079_v15 = vmul.f32 %v5167_v28, %v6201_v47 }
 0x511   :  { %4095 = vst [vmem:[#allocation11 + $0x68] sm:$0xff] %v4079_v15 }
 0x512   :  { %v5169_v50 = vpop.eup %5168 }
 0x513   :  { %v4080_v24 = vmul.f32 %v5169_v50, %v6204_v46 }
 0x515   :  { %4096 = vst [vmem:[#allocation11 + $0x70] sm:$0xff] %v4080_v24 }
 0x516   :  { %v5171_v62 = vpop.eup %5170 }
 0x517   :  { %v4081_v12 = vmul.f32 %v5171_v62, %v6207_v6 }
 0x519   :  { %4097 = vst [vmem:[#allocation11 + $0x78] sm:$0xff] %v4081_v12 }
 0x51a   :  { %5283 = shalt.err (!%p5280_p1)
}
 0x51b   :  { %4109 = dma.vmem_to_hbm [thread:$0]  %s4104_s9, 2048, %s6239_s7, [#allocation4], %s5304_s11, %s5304_s11, %s5305_s12  }
 0x51c   :  { %5298 = dma.done.wait [#allocation4], 2048  }
 0x51d   :  { %5299 = vsyncadd [#allocation4], 4294965248 }
 0x51e   :  { %4113 = vsyncpa [#allocation3], 1 }
 0x51f   :  { %4114 = vsyncpa [#allocation6], 1 }
 0x520   :  { %4115 = vsyncpa [#allocation9], 1 }
 0x521   :  { %4116 = vsyncpa [#allocation4], 1 }

</bundles_post_ra>
